<compile_context>
chip_gen: v7x
topology: tpu7x:2x2x1
jax: 0.10.0
libtpu: 0.0.40
codegen_flags: <defaults>
</compile_context>

<pallas_src>
import functools

import numpy as np
import jax
import jax.numpy as jnp
from jax.experimental import pallas as pl
from jax.experimental.pallas import tpu as pltpu  # noqa: F401  (TPU tuning hooks)

# Make the pure-JAX reference use full-f32 matmuls so the tight tolerance is
# meaningful (the in-kernel MXU matmuls are full precision as well).
jax.config.update("jax_default_matmul_precision", "highest")

NEG_SLOPE = 0.2    # negative_slope of the LeakyReLU inside GATConv
MASK_VAL = -1e30   # additive mask for non-edges


# ------------------------------ Pallas kernel -------------------------------

def _fused_gat_kernel(*refs, residual_modes, num_heads, head_dim, n_nodes):
    """Whole GAT forward (all layers + head-mean) in one kernel invocation.

    ref order:
      x          [N, Fin0]
      adj_tiled  [N, H*N]   adjacency tiled H times along lanes (adj[dst, src])
      tile_i     [N, H*N]   H copies of I_N along lanes (row-gather selector)
      seg_ones   [H*N, H]   per-head segment-sum matrix
      erep       [H, H*N]   per-head lane-expansion matrix
      head_mask  [H, H*D]   0/1 lane mask of each head's feature columns
      mean_mat   [H*D, D]   eye(D)/H per head block (final .mean(1))
      per layer: w [Fin,H*D], ar_exp [H*D,H*N], al_exp [H*D,H*N], bias [1,H*D],
                 (resw [Fin,H*D] iff residual mode == "proj")
      out        [N, D]
    """
    H = num_heads
    it = iter(refs)
    x_ref = next(it)
    adj_ref = next(it)
    tilei_ref = next(it)
    segones_ref = next(it)
    erep_ref = next(it)
    hmask_ref = next(it)
    mean_ref = next(it)
    layer_refs = []
    for mode in residual_modes:
        w = next(it); arx = next(it); alx = next(it); b = next(it)
        rw = next(it) if mode == "proj" else None
        layer_refs.append((w, arx, alx, b, rw))
    out_ref = next(it)

    adj_t = adj_ref[...]          # [N, H*N]
    tile_i = tilei_ref[...]       # [N, H*N]
    seg_ones = segones_ref[...]   # [H*N, H]
    erep = erep_ref[...]          # [H, H*N]
    hmask = hmask_ref[...]        # [H, H*D]

    h = x_ref[...]                # current activation [N, Fin_l]
    for (w_ref, arx_ref, alx_ref, b_ref, rw_ref), mode in zip(layer_refs,
                                                              residual_modes):
        # fc for all heads: lane-dense [N, H*D], head-major columns (col=h*D+d).
        feat = jnp.dot(h, w_ref[...], preferred_element_type=jnp.float32)

        # Destination scores, already broadcast over src lanes (one MXU push):
        #   er_exp[dst, h*N+src] = <feat[dst, hD:(h+1)D], attn_r[h]>
        er_exp = jnp.dot(feat, arx_ref[...], preferred_element_type=jnp.float32)
        # Source scores: same block expansion, then a row-gather via the tiled
        # identity + one sublane reduction puts el[src, h] on lane h*N+src.
        el_pre = jnp.dot(feat, alx_ref[...], preferred_element_type=jnp.float32)
        el_row = jnp.sum(el_pre * tile_i, axis=0, keepdims=True)     # [1, H*N]

        e = er_exp + el_row                          # e[dst, h*N+src]
        e = jnp.where(e >= 0, e, NEG_SLOPE * e)      # LeakyReLU
        e = jnp.where(adj_t > 0, e, MASK_VAL)        # mask non-edges

        # Edge softmax over incoming edges, all heads in one lane-dense pass.
        # Subtracting the per-row max over ALL heads is exact per head segment
        # (shift invariance). Self-loops keep every segment non-empty, so the
        # denominators are strictly positive (otherwise 1/denom -> inf/NaN).
        m = jnp.max(e, axis=1, keepdims=True)        # [N, 1]
        p = jnp.exp(e - m)                           # masked entries -> 0
        denom = jnp.dot(p, seg_ones, preferred_element_type=jnp.float32)  # [N, H]
        a = p * jnp.dot(1.0 / denom, erep, preferred_element_type=jnp.float32)

        # Fused aggregation for all heads: block-diagonal feat, one 128-wide
        # MXU push; result is already lane-dense and head-major.
        feat_bd = jnp.concatenate(
            [feat * hmask[hh:hh + 1, :] for hh in range(H)], axis=0)  # [H*N, H*D]
        rst = jnp.dot(a, feat_bd, preferred_element_type=jnp.float32)  # [N, H*D]

        if mode == "proj":
            rst = rst + jnp.dot(h, rw_ref[...], preferred_element_type=jnp.float32)
        elif mode == "identity":                     # Fin == H*D (DGL Identity)
            rst = rst + h
        rst = rst + b_ref[...]
        # ELU activation
        h = jnp.where(rst > 0, rst, jnp.exp(jnp.minimum(rst, 0.0)) - 1.0)

    # Final `.mean(1)` over heads as one matmul (head-major columns).
    out_ref[...] = jnp.dot(h, mean_ref[...], preferred_element_type=jnp.float32)


# --------------------------- host-side constants ----------------------------

def _expand_attn(vec, n_nodes):
    """[H, D] attention vector -> [H*D, H*N] block matrix so that
    (feat @ out)[i, h*N+src] = <feat[i, hD:(h+1)D], vec[h]> for every src."""
    H, D = vec.shape
    out = np.zeros((H * D, H * n_nodes), np.float32)
    v = np.asarray(vec, np.float32)
    for hh in range(H):
        out[hh * D:(hh + 1) * D, hh * n_nodes:(hh + 1) * n_nodes] = v[hh][:, None]
    return out


def _shared_constants(n_nodes, num_heads, head_dim):
    N, H, D = n_nodes, num_heads, head_dim
    HN, HD = H * N, H * D
    seg_ones = np.zeros((HN, H), np.float32)
    erep = np.zeros((H, HN), np.float32)
    hmask = np.zeros((H, HD), np.float32)
    mean_mat = np.zeros((HD, D), np.float32)
    for hh in range(H):
        seg_ones[hh * N:(hh + 1) * N, hh] = 1.0
        erep[hh, hh * N:(hh + 1) * N] = 1.0
        hmask[hh, hh * D:(hh + 1) * D] = 1.0
        mean_mat[hh * D:(hh + 1) * D, :] = np.eye(D, dtype=np.float32) / H
    tile_i = np.tile(np.eye(N, dtype=np.float32), (1, H))
    return tile_i, seg_ones, erep, hmask, mean_mat


def gat_forward(params, adj, x):
    """GAT.forward: every layer + flatten(1) + final mean(1) in one pallas_call."""
    N = x.shape[0]
    H, D = params[0]["num_heads"], params[0]["head_dim"]
    HD, HN = H * D, H * N
    assert all(p["num_heads"] == H and p["head_dim"] == D for p in params), \
        "fused kernel assumes a uniform head count / head width"
    modes = tuple(p["residual_mode"] for p in params)

    tile_i, seg_ones, erep, hmask, mean_mat = _shared_constants(N, H, D)
    inputs = [x, jnp.tile(adj, (1, H)), jnp.asarray(tile_i), jnp.asarray(seg_ones),
              jnp.asarray(erep), jnp.asarray(hmask), jnp.asarray(mean_mat)]
    for p in params:
        inputs += [p["w"],
                   jnp.asarray(_expand_attn(p["ar"], N)),
                   jnp.asarray(_expand_attn(p["al"], N)),
                   p["bias"].reshape(1, HD)]
        if p["residual_mode"] == "proj":
            inputs.append(p["resw"])

    # Advisory cost estimate for XLA's scheduler.
    flops = 2 * N * HD * D
    trans = 0
    for p in params:
        fin = p["w"].shape[0]
        flops += (2 * N * fin * HD + 4 * N * HD * HN + 2 * N * HN * H
                  + 2 * N * H * HN + 2 * N * HN * HD + 25 * N * HN)
        if p["residual_mode"] == "proj":
            flops += 2 * N * fin * HD
        trans += N * HN + N * HD
    bytes_accessed = 4 * (sum(int(np.prod(a.shape)) for a in inputs) + N * D)

    kernel = functools.partial(_fused_gat_kernel, residual_modes=modes,
                               num_heads=H, head_dim=D, n_nodes=N)
    # Grid-less call: all operands (< ~0.5 MiB total) stay VMEM-resident for the
    # whole fused forward, so there is exactly one launch and one adj DMA.
    return pl.pallas_call(
        kernel,
        out_shape=jax.ShapeDtypeStruct((N, D), jnp.float32),
        cost_estimate=pl.CostEstimate(flops=int(flops),
                                      transcendentals=int(trans),
                                      bytes_accessed=int(bytes_accessed)),
    )(*inputs)


# ---------------- parameters (deterministic synthetic init) -----------------

def init_gat_params(key, num_layers, in_dim, heads, num_hidden):
    params = []
    fin = in_dim
    for l in range(num_layers):
        H, D = heads[l], num_hidden
        HD = H * D
        key, k1, k2, k3, k4 = jax.random.split(key, 5)
        w = jax.random.normal(k1, (fin, HD), jnp.float32) / np.sqrt(fin)
        al = jax.random.normal(k2, (H, D), jnp.float32) * 0.1
        ar = jax.random.normal(k3, (H, D), jnp.float32) * 0.1
        bias = jax.random.normal(k4, (H, D), jnp.float32) * 0.01
        if l == 0:                       # residual=False on the first GATConv
            mode, resw = "none", None
        elif fin == HD:                  # DGL uses nn.Identity residual
            mode, resw = "identity", None
        else:                            # projection residual
            mode = "proj"
            key, k5 = jax.random.split(key)
            resw = jax.random.normal(k5, (fin, HD), jnp.float32) / np.sqrt(fin)
        params.append(dict(w=w, al=al, ar=ar, bias=bias, resw=resw,
                           residual_mode=mode, num_heads=H, head_dim=D))
        fin = HD
    return params


# ---------------- pure-JAX reference (for correctness check) ----------------

def gat_conv_ref(x, p, adj):
    H, D = p["num_heads"], p["head_dim"]
    N = x.shape[0]
    feat = (x @ p["w"]).reshape(N, H, D)                       # [N, H, D]
    el = jnp.einsum("nhd,hd->nh", feat, p["al"])
    er = jnp.einsum("nhd,hd->nh", feat, p["ar"])
    e = er[:, None, :] + el[None, :, :]                        # [dst, src, H]
    e = jnp.where(e >= 0, e, NEG_SLOPE * e)
    e = jnp.where(adj[:, :, None] > 0, e, MASK_VAL)
    a = jax.nn.softmax(e, axis=1)
    rst = jnp.einsum("vuh,uhd->vhd", a, feat)
    if p["residual_mode"] == "proj":
        rst = rst + (x @ p["resw"]).reshape(N, H, D)
    elif p["residual_mode"] == "identity":
        rst = rst + x.reshape(N, H, D)
    rst = rst + p["bias"][None]
    return jax.nn.elu(rst)                                     # [N, H, D]


def gat_forward_ref(params, adj, x):
    h = x
    for l, p in enumerate(params):
        out = gat_conv_ref(h, p, adj)
        if l < len(params) - 1:
            h = out.reshape(out.shape[0], -1)                  # .flatten(1)
        else:
            h = out.mean(axis=1)                               # .mean(1)
    return h


if __name__ == "__main__":
    # Small deterministic problem: N=32 nodes, in_dim=16, 2 layers, 4 heads, hidden=32.
    N, in_dim, num_layers, heads, num_hidden = 32, 16, 2, [4, 4], 32

    key = jax.random.PRNGKey(0)
    kx, kadj, kparams = jax.random.split(key, 3)

    x = jax.random.normal(kx, (N, in_dim), jnp.float32)
    adj = (jax.random.uniform(kadj, (N, N)) < 0.2).astype(jnp.float32)
    adj = jnp.maximum(adj, jnp.eye(N, dtype=jnp.float32))      # self-loops: no empty rows

    params = init_gat_params(kparams, num_layers, in_dim, heads, num_hidden)

    out = gat_forward(params, adj, x)                          # [N, num_hidden]
    jax.block_until_ready(out)

    ref = gat_forward_ref(params, adj, x)
    # Exact division in the edge softmax -> tight tolerance (per review).
    np.testing.assert_allclose(np.asarray(out), np.asarray(ref),
                               rtol=2e-4, atol=2e-5)

    print("KERNEL_OK")
</pallas_src>

<mosaic_0001>
module attributes {stable_mosaic.version = 11 : i64} {
  func.func @_fused_gat_kernel(%arg0: memref<32x16xf32, #tpu.memory_space<vmem>>, %arg1: memref<32x128xf32, #tpu.memory_space<vmem>>, %arg2: memref<32x128xf32, #tpu.memory_space<vmem>>, %arg3: memref<128x4xf32, #tpu.memory_space<vmem>>, %arg4: memref<4x128xf32, #tpu.memory_space<vmem>>, %arg5: memref<4x128xf32, #tpu.memory_space<vmem>>, %arg6: memref<128x32xf32, #tpu.memory_space<vmem>>, %arg7: memref<16x128xf32, #tpu.memory_space<vmem>>, %arg8: memref<128x128xf32, #tpu.memory_space<vmem>>, %arg9: memref<128x128xf32, #tpu.memory_space<vmem>>, %arg10: memref<1x128xf32, #tpu.memory_space<vmem>>, %arg11: memref<128x128xf32, #tpu.memory_space<vmem>>, %arg12: memref<128x128xf32, #tpu.memory_space<vmem>>, %arg13: memref<128x128xf32, #tpu.memory_space<vmem>>, %arg14: memref<1x128xf32, #tpu.memory_space<vmem>>, %arg15: memref<32x32xf32, #tpu.memory_space<vmem>>) attributes {dimension_semantics = [], scalar_prefetch = 0 : i64, scratch_operands = 0 : i64, tpu.core_type = #tpu.core_type<tc>} {
    %c0 = arith.constant 0 : index
    %c0_0 = arith.constant 0 : index
    %0 = vector.load %arg1[%c0, %c0_0] : memref<32x128xf32, #tpu.memory_space<vmem>>, vector<32x128xf32>
    %c0_1 = arith.constant 0 : index
    %c0_2 = arith.constant 0 : index
    %1 = vector.load %arg2[%c0_1, %c0_2] : memref<32x128xf32, #tpu.memory_space<vmem>>, vector<32x128xf32>
    %c0_3 = arith.constant 0 : index
    %c0_4 = arith.constant 0 : index
    %2 = vector.load %arg3[%c0_3, %c0_4] : memref<128x4xf32, #tpu.memory_space<vmem>>, vector<128x4xf32>
    %c0_5 = arith.constant 0 : index
    %c0_6 = arith.constant 0 : index
    %3 = vector.load %arg4[%c0_5, %c0_6] : memref<4x128xf32, #tpu.memory_space<vmem>>, vector<4x128xf32>
    %c0_7 = arith.constant 0 : index
    %c0_8 = arith.constant 0 : index
    %4 = vector.load %arg5[%c0_7, %c0_8] : memref<4x128xf32, #tpu.memory_space<vmem>>, vector<4x128xf32>
    %c0_9 = arith.constant 0 : index
    %c0_10 = arith.constant 0 : index
    %5 = vector.load %arg0[%c0_9, %c0_10] : memref<32x16xf32, #tpu.memory_space<vmem>>, vector<32x16xf32>
    %c0_11 = arith.constant 0 : index
    %c0_12 = arith.constant 0 : index
    %6 = vector.load %arg7[%c0_11, %c0_12] : memref<16x128xf32, #tpu.memory_space<vmem>>, vector<16x128xf32>
    %cst = arith.constant dense<0.000000e+00> : vector<32x128xf32>
    %7 = tpu.matmul %5, %6, %cst {dimension_numbers = #tpu.dot_dimension_numbers<[1], [0], [0], [1], [0, 0, 1, 1], [], []>, precision = #tpu.contract_precision<fp32>} : vector<32x16xf32>, vector<16x128xf32>, vector<32x128xf32> -> vector<32x128xf32>
    %c0_13 = arith.constant 0 : index
    %c0_14 = arith.constant 0 : index
    %8 = vector.load %arg8[%c0_13, %c0_14] : memref<128x128xf32, #tpu.memory_space<vmem>>, vector<128x128xf32>
    %cst_15 = arith.constant dense<0.000000e+00> : vector<32x128xf32>
    %9 = tpu.matmul %7, %8, %cst_15 {dimension_numbers = #tpu.dot_dimension_numbers<[1], [0], [0], [1], [0, 0, 1, 1], [], []>, precision = #tpu.contract_precision<fp32>} : vector<32x128xf32>, vector<128x128xf32>, vector<32x128xf32> -> vector<32x128xf32>
    %c0_16 = arith.constant 0 : index
    %c0_17 = arith.constant 0 : index
    %10 = vector.load %arg9[%c0_16, %c0_17] : memref<128x128xf32, #tpu.memory_space<vmem>>, vector<128x128xf32>
    %cst_18 = arith.constant dense<0.000000e+00> : vector<32x128xf32>
    %11 = tpu.matmul %7, %10, %cst_18 {dimension_numbers = #tpu.dot_dimension_numbers<[1], [0], [0], [1], [0, 0, 1, 1], [], []>, precision = #tpu.contract_precision<fp32>} : vector<32x128xf32>, vector<128x128xf32>, vector<32x128xf32> -> vector<32x128xf32>
    %12 = arith.mulf %11, %1 : vector<32x128xf32>
    %cst_19 = arith.constant dense<0.000000e+00> : vector<128xf32>
    %13 = vector.multi_reduction <add>, %12, %cst_19 [0] : vector<32x128xf32> to vector<128xf32>
    %14 = vector.shape_cast %13 : vector<128xf32> to vector<1x128xf32>
    %15 = vector.broadcast %14 : vector<1x128xf32> to vector<32x128xf32>
    %16 = arith.addf %9, %15 : vector<32x128xf32>
    %cst_20 = arith.constant 0.000000e+00 : f32
    %17 = vector.broadcast %cst_20 : f32 to vector<32x128xf32>
    %18 = arith.cmpf oge, %16, %17 : vector<32x128xf32>
    %cst_21 = arith.constant 2.000000e-01 : f32
    %19 = vector.broadcast %cst_21 : f32 to vector<32x128xf32>
    %20 = arith.mulf %19, %16 : vector<32x128xf32>
    %21 = arith.select %18, %16, %20 : vector<32x128xi1>, vector<32x128xf32>
    %cst_22 = arith.constant 0.000000e+00 : f32
    %22 = vector.broadcast %cst_22 : f32 to vector<32x128xf32>
    %23 = arith.cmpf ogt, %0, %22 : vector<32x128xf32>
    %cst_23 = arith.constant -1.000000e+30 : f32
    %24 = vector.broadcast %cst_23 : f32 to vector<32x128xf32>
    %25 = arith.select %23, %21, %24 : vector<32x128xi1>, vector<32x128xf32>
    %cst_24 = arith.constant dense<0xFF800000> : vector<32xf32>
    %26 = vector.multi_reduction <maximumf>, %25, %cst_24 [1] : vector<32x128xf32> to vector<32xf32>
    %27 = vector.shape_cast %26 : vector<32xf32> to vector<32x1xf32>
    %28 = vector.broadcast %27 : vector<32x1xf32> to vector<32x128xf32>
    %29 = arith.subf %25, %28 : vector<32x128xf32>
    %30 = math.exp %29 : vector<32x128xf32>
    %cst_25 = arith.constant dense<0.000000e+00> : vector<32x4xf32>
    %31 = tpu.matmul %30, %2, %cst_25 {dimension_numbers = #tpu.dot_dimension_numbers<[1], [0], [0], [1], [0, 0, 1, 1], [], []>, precision = #tpu.contract_precision<fp32>} : vector<32x128xf32>, vector<128x4xf32>, vector<32x4xf32> -> vector<32x4xf32>
    %cst_26 = arith.constant 1.000000e+00 : f32
    %32 = vector.broadcast %cst_26 : f32 to vector<32x4xf32>
    %33 = arith.divf %32, %31 : vector<32x4xf32>
    %cst_27 = arith.constant dense<0.000000e+00> : vector<32x128xf32>
    %34 = tpu.matmul %33, %3, %cst_27 {dimension_numbers = #tpu.dot_dimension_numbers<[1], [0], [0], [1], [0, 0, 1, 1], [], []>, precision = #tpu.contract_precision<fp32>} : vector<32x4xf32>, vector<4x128xf32>, vector<32x128xf32> -> vector<32x128xf32>
    %35 = arith.mulf %30, %34 : vector<32x128xf32>
    %36 = vector.extract_strided_slice %4 {offsets = [0, 0], sizes = [1, 128], strides = [1, 1]} : vector<4x128xf32> to vector<1x128xf32>
    %37 = vector.broadcast %36 : vector<1x128xf32> to vector<32x128xf32>
    %38 = arith.mulf %7, %37 : vector<32x128xf32>
    %39 = vector.extract_strided_slice %4 {offsets = [1, 0], sizes = [1, 128], strides = [1, 1]} : vector<4x128xf32> to vector<1x128xf32>
    %40 = vector.broadcast %39 : vector<1x128xf32> to vector<32x128xf32>
    %41 = arith.mulf %7, %40 : vector<32x128xf32>
    %42 = vector.extract_strided_slice %4 {offsets = [2, 0], sizes = [1, 128], strides = [1, 1]} : vector<4x128xf32> to vector<1x128xf32>
    %43 = vector.broadcast %42 : vector<1x128xf32> to vector<32x128xf32>
    %44 = arith.mulf %7, %43 : vector<32x128xf32>
    %45 = vector.extract_strided_slice %4 {offsets = [3, 0], sizes = [1, 128], strides = [1, 1]} : vector<4x128xf32> to vector<1x128xf32>
    %46 = vector.broadcast %45 : vector<1x128xf32> to vector<32x128xf32>
    %47 = arith.mulf %7, %46 : vector<32x128xf32>
    %48 = tpu.concatenate %38, %41, %44, %47 in 0 : vector<32x128xf32>, vector<32x128xf32>, vector<32x128xf32>, vector<32x128xf32> -> vector<128x128xf32>
    %cst_28 = arith.constant dense<0.000000e+00> : vector<32x128xf32>
    %49 = tpu.matmul %35, %48, %cst_28 {dimension_numbers = #tpu.dot_dimension_numbers<[1], [0], [0], [1], [0, 0, 1, 1], [], []>, precision = #tpu.contract_precision<fp32>} : vector<32x128xf32>, vector<128x128xf32>, vector<32x128xf32> -> vector<32x128xf32>
    %c0_29 = arith.constant 0 : index
    %c0_30 = arith.constant 0 : index
    %50 = vector.load %arg10[%c0_29, %c0_30] : memref<1x128xf32, #tpu.memory_space<vmem>>, vector<1x128xf32>
    %51 = vector.broadcast %50 : vector<1x128xf32> to vector<32x128xf32>
    %52 = arith.addf %49, %51 : vector<32x128xf32>
    %cst_31 = arith.constant 0.000000e+00 : f32
    %53 = vector.broadcast %cst_31 : f32 to vector<32x128xf32>
    %54 = arith.cmpf ogt, %52, %53 : vector<32x128xf32>
    %cst_32 = arith.constant 0.000000e+00 : f32
    %55 = vector.broadcast %cst_32 : f32 to vector<32x128xf32>
    %56 = arith.minimumf %52, %55 : vector<32x128xf32>
    %57 = math.exp %56 : vector<32x128xf32>
    %cst_33 = arith.constant 1.000000e+00 : f32
    %58 = vector.broadcast %cst_33 : f32 to vector<32x128xf32>
    %59 = arith.subf %57, %58 : vector<32x128xf32>
    %60 = arith.select %54, %52, %59 : vector<32x128xi1>, vector<32x128xf32>
    %c0_34 = arith.constant 0 : index
    %c0_35 = arith.constant 0 : index
    %61 = vector.load %arg11[%c0_34, %c0_35] : memref<128x128xf32, #tpu.memory_space<vmem>>, vector<128x128xf32>
    %cst_36 = arith.constant dense<0.000000e+00> : vector<32x128xf32>
    %62 = tpu.matmul %60, %61, %cst_36 {dimension_numbers = #tpu.dot_dimension_numbers<[1], [0], [0], [1], [0, 0, 1, 1], [], []>, precision = #tpu.contract_precision<fp32>} : vector<32x128xf32>, vector<128x128xf32>, vector<32x128xf32> -> vector<32x128xf32>
    %c0_37 = arith.constant 0 : index
    %c0_38 = arith.constant 0 : index
    %63 = vector.load %arg12[%c0_37, %c0_38] : memref<128x128xf32, #tpu.memory_space<vmem>>, vector<128x128xf32>
    %cst_39 = arith.constant dense<0.000000e+00> : vector<32x128xf32>
    %64 = tpu.matmul %62, %63, %cst_39 {dimension_numbers = #tpu.dot_dimension_numbers<[1], [0], [0], [1], [0, 0, 1, 1], [], []>, precision = #tpu.contract_precision<fp32>} : vector<32x128xf32>, vector<128x128xf32>, vector<32x128xf32> -> vector<32x128xf32>
    %c0_40 = arith.constant 0 : index
    %c0_41 = arith.constant 0 : index
    %65 = vector.load %arg13[%c0_40, %c0_41] : memref<128x128xf32, #tpu.memory_space<vmem>>, vector<128x128xf32>
    %cst_42 = arith.constant dense<0.000000e+00> : vector<32x128xf32>
    %66 = tpu.matmul %62, %65, %cst_42 {dimension_numbers = #tpu.dot_dimension_numbers<[1], [0], [0], [1], [0, 0, 1, 1], [], []>, precision = #tpu.contract_precision<fp32>} : vector<32x128xf32>, vector<128x128xf32>, vector<32x128xf32> -> vector<32x128xf32>
    %67 = arith.mulf %66, %1 : vector<32x128xf32>
    %cst_43 = arith.constant dense<0.000000e+00> : vector<128xf32>
    %68 = vector.multi_reduction <add>, %67, %cst_43 [0] : vector<32x128xf32> to vector<128xf32>
    %69 = vector.shape_cast %68 : vector<128xf32> to vector<1x128xf32>
    %70 = vector.broadcast %69 : vector<1x128xf32> to vector<32x128xf32>
    %71 = arith.addf %64, %70 : vector<32x128xf32>
    %cst_44 = arith.constant 0.000000e+00 : f32
    %72 = vector.broadcast %cst_44 : f32 to vector<32x128xf32>
    %73 = arith.cmpf oge, %71, %72 : vector<32x128xf32>
    %cst_45 = arith.constant 2.000000e-01 : f32
    %74 = vector.broadcast %cst_45 : f32 to vector<32x128xf32>
    %75 = arith.mulf %74, %71 : vector<32x128xf32>
    %76 = arith.select %73, %71, %75 : vector<32x128xi1>, vector<32x128xf32>
    %cst_46 = arith.constant 0.000000e+00 : f32
    %77 = vector.broadcast %cst_46 : f32 to vector<32x128xf32>
    %78 = arith.cmpf ogt, %0, %77 : vector<32x128xf32>
    %cst_47 = arith.constant -1.000000e+30 : f32
    %79 = vector.broadcast %cst_47 : f32 to vector<32x128xf32>
    %80 = arith.select %78, %76, %79 : vector<32x128xi1>, vector<32x128xf32>
    %cst_48 = arith.constant dense<0xFF800000> : vector<32xf32>
    %81 = vector.multi_reduction <maximumf>, %80, %cst_48 [1] : vector<32x128xf32> to vector<32xf32>
    %82 = vector.shape_cast %81 : vector<32xf32> to vector<32x1xf32>
    %83 = vector.broadcast %82 : vector<32x1xf32> to vector<32x128xf32>
    %84 = arith.subf %80, %83 : vector<32x128xf32>
    %85 = math.exp %84 : vector<32x128xf32>
    %cst_49 = arith.constant dense<0.000000e+00> : vector<32x4xf32>
    %86 = tpu.matmul %85, %2, %cst_49 {dimension_numbers = #tpu.dot_dimension_numbers<[1], [0], [0], [1], [0, 0, 1, 1], [], []>, precision = #tpu.contract_precision<fp32>} : vector<32x128xf32>, vector<128x4xf32>, vector<32x4xf32> -> vector<32x4xf32>
    %cst_50 = arith.constant 1.000000e+00 : f32
    %87 = vector.broadcast %cst_50 : f32 to vector<32x4xf32>
    %88 = arith.divf %87, %86 : vector<32x4xf32>
    %cst_51 = arith.constant dense<0.000000e+00> : vector<32x128xf32>
    %89 = tpu.matmul %88, %3, %cst_51 {dimension_numbers = #tpu.dot_dimension_numbers<[1], [0], [0], [1], [0, 0, 1, 1], [], []>, precision = #tpu.contract_precision<fp32>} : vector<32x4xf32>, vector<4x128xf32>, vector<32x128xf32> -> vector<32x128xf32>
    %90 = arith.mulf %85, %89 : vector<32x128xf32>
    %91 = vector.extract_strided_slice %4 {offsets = [0, 0], sizes = [1, 128], strides = [1, 1]} : vector<4x128xf32> to vector<1x128xf32>
    %92 = vector.broadcast %91 : vector<1x128xf32> to vector<32x128xf32>
    %93 = arith.mulf %62, %92 : vector<32x128xf32>
    %94 = vector.extract_strided_slice %4 {offsets = [1, 0], sizes = [1, 128], strides = [1, 1]} : vector<4x128xf32> to vector<1x128xf32>
    %95 = vector.broadcast %94 : vector<1x128xf32> to vector<32x128xf32>
    %96 = arith.mulf %62, %95 : vector<32x128xf32>
    %97 = vector.extract_strided_slice %4 {offsets = [2, 0], sizes = [1, 128], strides = [1, 1]} : vector<4x128xf32> to vector<1x128xf32>
    %98 = vector.broadcast %97 : vector<1x128xf32> to vector<32x128xf32>
    %99 = arith.mulf %62, %98 : vector<32x128xf32>
    %100 = vector.extract_strided_slice %4 {offsets = [3, 0], sizes = [1, 128], strides = [1, 1]} : vector<4x128xf32> to vector<1x128xf32>
    %101 = vector.broadcast %100 : vector<1x128xf32> to vector<32x128xf32>
    %102 = arith.mulf %62, %101 : vector<32x128xf32>
    %103 = tpu.concatenate %93, %96, %99, %102 in 0 : vector<32x128xf32>, vector<32x128xf32>, vector<32x128xf32>, vector<32x128xf32> -> vector<128x128xf32>
    %cst_52 = arith.constant dense<0.000000e+00> : vector<32x128xf32>
    %104 = tpu.matmul %90, %103, %cst_52 {dimension_numbers = #tpu.dot_dimension_numbers<[1], [0], [0], [1], [0, 0, 1, 1], [], []>, precision = #tpu.contract_precision<fp32>} : vector<32x128xf32>, vector<128x128xf32>, vector<32x128xf32> -> vector<32x128xf32>
    %105 = arith.addf %104, %60 : vector<32x128xf32>
    %c0_53 = arith.constant 0 : index
    %c0_54 = arith.constant 0 : index
    %106 = vector.load %arg14[%c0_53, %c0_54] : memref<1x128xf32, #tpu.memory_space<vmem>>, vector<1x128xf32>
    %107 = vector.broadcast %106 : vector<1x128xf32> to vector<32x128xf32>
    %108 = arith.addf %105, %107 : vector<32x128xf32>
    %cst_55 = arith.constant 0.000000e+00 : f32
    %109 = vector.broadcast %cst_55 : f32 to vector<32x128xf32>
    %110 = arith.cmpf ogt, %108, %109 : vector<32x128xf32>
    %cst_56 = arith.constant 0.000000e+00 : f32
    %111 = vector.broadcast %cst_56 : f32 to vector<32x128xf32>
    %112 = arith.minimumf %108, %111 : vector<32x128xf32>
    %113 = math.exp %112 : vector<32x128xf32>
    %cst_57 = arith.constant 1.000000e+00 : f32
    %114 = vector.broadcast %cst_57 : f32 to vector<32x128xf32>
    %115 = arith.subf %113, %114 : vector<32x128xf32>
    %116 = arith.select %110, %108, %115 : vector<32x128xi1>, vector<32x128xf32>
    %c0_58 = arith.constant 0 : index
    %c0_59 = arith.constant 0 : index
    %117 = vector.load %arg6[%c0_58, %c0_59] : memref<128x32xf32, #tpu.memory_space<vmem>>, vector<128x32xf32>
    %cst_60 = arith.constant dense<0.000000e+00> : vector<32x32xf32>
    %118 = tpu.matmul %116, %117, %cst_60 {dimension_numbers = #tpu.dot_dimension_numbers<[1], [0], [0], [1], [0, 0, 1, 1], [], []>, precision = #tpu.contract_precision<fp32>} : vector<32x128xf32>, vector<128x32xf32>, vector<32x32xf32> -> vector<32x32xf32>
    %c0_61 = arith.constant 0 : index
    %c0_62 = arith.constant 0 : index
    %119 = vector.load %arg15[%c0_61, %c0_62] : memref<32x32xf32, #tpu.memory_space<vmem>>, vector<32x32xf32>
    tpu.vector_store %arg15[%c0_61, %c0_62], %118 {strides = array<i32>} : memref<32x32xf32, #tpu.memory_space<vmem>>, vector<32x32xf32>,
    return
  }
}

</mosaic_0001>

<bundles_post_ra>
// kernel: tpu_custom_call.1
= control target key start
LH: loop header
LB: loop body
LE: loop exit
PB: predicated region body
PF: predicated region fallthrough
CT: control target
= control target key end

     0   :  { %20 = vsyncpa [#allocation3], 0  ;;  %s20737_s0 = inlined_call_operand.vmem [shape: f32[32,16], index: 0, kind: input, shape index: {}]   ;;  %s20738_s1 = inlined_call_operand.hbm [shape: f32[32,128], index: 1, kind: input, shape index: {}]   ;;  %s20739_s2 = inlined_call_operand.hbm [shape: f32[32,128], index: 2, kind: input, shape index: {}]   ;;  %s20740_s3 = inlined_call_operand.vmem [shape: f32[128,4], index: 3, kind: input, shape index: {}]   ;;  %s20741_s4 = inlined_call_operand.hbm [shape: f32[4,128], index: 4, kind: input, shape index: {}]   ;;  %s20742_s5 = inlined_call_operand.hbm [shape: f32[4,128], index: 5, kind: input, shape index: {}]   ;;  %s20743_s6 = inlined_call_operand.vmem [shape: f32[128,32], index: 6, kind: input, shape index: {}]   ;;  %s20744_s7 = inlined_call_operand.hbm [shape: f32[16,128], index: 7, kind: input, shape index: {}]   ;;  %s20745_s8 = inlined_call_operand.vmem [shape: f32[128,128], index: 8, kind: input, shape index: {}]   ;;  %s20746_s9 = inlined_call_operand.vmem [shape: f32[128,128], index: 9, kind: input, shape index: {}]   ;;  %s20747_s10 = inlined_call_operand.vmem [shape: f32[1,128], index: 10, kind: input, shape index: {}]   ;;  %s20748_s11 = inlined_call_operand.hbm [shape: f32[128,128], index: 11, kind: input, shape index: {}]   ;;  %s20749_s12 = inlined_call_operand.vmem [shape: f32[128,128], index: 12, kind: input, shape index: {}]   ;;  %s20750_s13 = inlined_call_operand.hbm [shape: f32[128,128], index: 13, kind: input, shape index: {}]   ;;  %s20751_s14 = inlined_call_operand.vmem [shape: f32[1,128], index: 14, kind: input, shape index: {}]   ;;  %s20752_s15 = inlined_call_operand.hbm [shape: f32[32,32], index: 15, kind: output, shape index: {}]  }
   0x1   :  { %21 = vsyncpa [#allocation6], 0 }
   0x2   :  { %22 = vsyncpa [#allocation9], 0 }
   0x3   :  { %23 = vsyncpa [#allocation12], 0 }
   0x4   :  { %24 = vsyncpa [#allocation4], 0  ;;  %s16225_s18 = smov [#allocation5]   ;;  %s16226_s20 = smov [#allocation8]  }
   0x5   :  { %s44_s19 = sshll.u32 %s16225_s18, 4  ;;  %s69_s21 = sshll.u32 %s16226_s20, 4  ;;  %s45_s19 = int_to_ptr.vmem [resolvable:$true] %s44_s19  ;;  %s70_s21 = int_to_ptr.vmem [resolvable:$true] %s69_s21 }
   0x6   :  { %s16039_s24 = scalar_lea.hbm %s20739_s2, 512 }
   0x7   :  { %p16040_p0 = scmp.ne.s32.totalorder %s20739_s2, %s16039_s24  ;;  %p16043_p1 = scmp.lt.u32.totalorder %s16039_s24, %s20739_s2 }
   0x9   :  { %p16045_p2 = pnand %p16043_p1, %p16040_p0 }
   0xb   :  { %16048 = shalt.err (!%p16045_p2)
}
   0xc   :  { %s16049_s29 = scalar_lea.vmem %s45_s19, 512  ;;  %p16054_p4 = scmp.lt.s32.totalorder %s45_s19, %s45_s19 }
   0xd   :  { %p16050_p3 = scmp.ne.s32.totalorder %s45_s19, %s16049_s29  ;;  %p16055_p5 = scmp.lt.s32.totalorder %s16049_s29, %s16049_s29 }
   0xf   :  { %p16056_p6 = por %p16055_p5, %p16054_p4 }
  0x11   :  { %p16057_p7 = pnand %p16056_p6, %p16050_p3 }
  0x13   :  { %16060 = shalt.err (!%p16057_p7)
}
  0x14   :  { %s16227_s30 = smov 128   ;;  %s16228_s16 = smov 8  }
  0x15   :  { %50 = dma.hbm_to_vmem [thread:$0]  %s20739_s2, 512, %s45_s19, [#allocation6], %s16227_s30, %s16227_s30, %s16228_s16  }
  0x16   :  { %s16061_s23 = scalar_lea.hbm %s20742_s5, 64 }
  0x17   :  { %p16062_p8 = scmp.ne.s32.totalorder %s20742_s5, %s16061_s23  ;;  %p16065_p9 = scmp.lt.u32.totalorder %s16061_s23, %s20742_s5 }
  0x19   :  { %p16067_p10 = pnand %p16065_p9, %p16062_p8 }
  0x1b   :  { %16070 = shalt.err (!%p16067_p10)
}
  0x1c   :  { %s16071_s28 = scalar_lea.vmem %s70_s21, 64  ;;  %p16076_p12 = scmp.lt.s32.totalorder %s70_s21, %s70_s21 }
  0x1d   :  { %p16072_p11 = scmp.ne.s32.totalorder %s70_s21, %s16071_s28  ;;  %p16077_p13 = scmp.lt.s32.totalorder %s16071_s28, %s16071_s28 }
  0x1f   :  { %p16078_p0 = por %p16077_p13, %p16076_p12 }
  0x21   :  { %p16079_p1 = pnand %p16078_p0, %p16072_p11 }
  0x23   :  { %16082 = shalt.err (!%p16079_p1)
}
  0x24   :  { %72 = dma.hbm_to_vmem [thread:$0]  %s20742_s5, 64, %s70_s21, [#allocation9]  }
  0x25   :  { %s16229_s29 = smov [#allocation11]   ;;  %s16230_s18 = smov [#allocation2]  }
  0x26   :  { %s98_s17 = sshll.u32 %s16229_s29, 4  ;;  %s32_s20 = sshll.u32 %s16230_s18, 4  ;;  %s99_s17 = int_to_ptr.vmem [resolvable:$true] %s98_s17  ;;  %s16342_s20 = int_to_ptr.vmem [resolvable:$true] %s32_s20 }
  0x27   :  { %s16083_s24 = scalar_lea.hbm %s20748_s11, 2048 }
  0x28   :  { %p16084_p2 = scmp.ne.s32.totalorder %s20748_s11, %s16083_s24  ;;  %p16087_p3 = scmp.lt.u32.totalorder %s16083_s24, %s20748_s11 }
  0x2a   :  { %p16089_p4 = pnand %p16087_p3, %p16084_p2 }
  0x2c   :  { %16092 = shalt.err (!%p16089_p4)
}
  0x2d   :  { %s16093_s5 = scalar_lea.vmem %s99_s17, 2048  ;;  %p16098_p6 = scmp.lt.s32.totalorder %s99_s17, %s99_s17 }
  0x2e   :  { %p16094_p5 = scmp.ne.s32.totalorder %s99_s17, %s16093_s5  ;;  %p16099_p7 = scmp.lt.s32.totalorder %s16093_s5, %s16093_s5 }
  0x30   :  { %p16100_p8 = por %p16099_p7, %p16098_p6 }
  0x32   :  { %p16101_p9 = pnand %p16100_p8, %p16094_p5 }
  0x34   :  { %16104 = shalt.err (!%p16101_p9)
}
  0x35   :  { %104 = dma.hbm_to_vmem [thread:$0]  %s20748_s11, 2048, %s99_s17, [#allocation12], %s16227_s30, %s16227_s30, %s16228_s16  }
  0x36   :  { %s16105_s18 = scalar_lea.hbm %s20738_s1, 512 }
  0x37   :  { %p16106_p10 = scmp.ne.s32.totalorder %s20738_s1, %s16105_s18  ;;  %p16109_p11 = scmp.lt.u32.totalorder %s16105_s18, %s20738_s1 }
  0x39   :  { %p16111_p12 = pnand %p16109_p11, %p16106_p10 }
  0x3b   :  { %16114 = shalt.err (!%p16111_p12)
}
  0x3c   :  { %s16115_s26 = scalar_lea.vmem %s16342_s20, 512  ;;  %p16120_p0 = scmp.lt.s32.totalorder %s16342_s20, %s16342_s20 }
  0x3d   :  { %p16116_p13 = scmp.ne.s32.totalorder %s16342_s20, %s16115_s26  ;;  %p16121_p1 = scmp.lt.s32.totalorder %s16115_s26, %s16115_s26 }
  0x3f   :  { %p16122_p2 = por %p16121_p1, %p16120_p0 }
  0x41   :  { %p16123_p3 = pnand %p16122_p2, %p16116_p13 }
  0x43   :  { %16126 = shalt.err (!%p16123_p3)
}
  0x44   :  { %38 = dma.hbm_to_vmem [thread:$0]  %s20738_s1, 512, %s16342_s20, [#allocation3], %s16227_s30, %s16227_s30, %s16228_s16  }
  0x45   :  { %s16231_s27 = smov [#allocation7]   ;;  %s16232_s5 = smov [#allocation10]  }
  0x46   :  { %s59_s28 = sshll.u32 %s16231_s27, 4  ;;  %s80_s21 = sshll.u32 %s16232_s5, 4  ;;  %s60_s28 = int_to_ptr.vmem [resolvable:$true] %s59_s28  ;;  %s16379_s21 = int_to_ptr.vmem [resolvable:$true] %s80_s21 }
  0x47   :  { %s16127_s29 = scalar_lea.hbm %s20741_s4, 64 }
  0x48   :  { %p16128_p4 = scmp.ne.s32.totalorder %s20741_s4, %s16127_s29  ;;  %p16131_p5 = scmp.lt.u32.totalorder %s16127_s29, %s20741_s4 }
  0x4a   :  { %p16133_p6 = pnand %p16131_p5, %p16128_p4 }
  0x4c   :  { %16136 = shalt.err (!%p16133_p6)
}
  0x4d   :  { %s16137_s1 = scalar_lea.vmem %s60_s28, 64  ;;  %p16142_p8 = scmp.lt.s32.totalorder %s60_s28, %s60_s28 }
  0x4e   :  { %p16138_p7 = scmp.ne.s32.totalorder %s60_s28, %s16137_s1  ;;  %p16143_p9 = scmp.lt.s32.totalorder %s16137_s1, %s16137_s1 }
  0x50   :  { %p16144_p10 = por %p16143_p9, %p16142_p8 }
  0x52   :  { %p16145_p11 = pnand %p16144_p10, %p16138_p7 }
  0x54   :  { %16148 = shalt.err (!%p16145_p11)
}
  0x55   :  { %62 = dma.hbm_to_vmem [thread:$0]  %s20741_s4, 64, %s60_s28, [#allocation6]  }
  0x56   :  { %s16149_s17 = scalar_lea.hbm %s20744_s7, 256 }
  0x57   :  { %p16150_p12 = scmp.ne.s32.totalorder %s20744_s7, %s16149_s17  ;;  %p16153_p13 = scmp.lt.u32.totalorder %s16149_s17, %s20744_s7 }
  0x59   :  { %p16155_p0 = pnand %p16153_p13, %p16150_p12 }
  0x5b   :  { %16158 = shalt.err (!%p16155_p0)
}
  0x5c   :  { %s16159_s29 = scalar_lea.vmem %s16379_s21, 256  ;;  %p16164_p2 = scmp.lt.s32.totalorder %s16379_s21, %s16379_s21 }
  0x5d   :  { %p16160_p1 = scmp.ne.s32.totalorder %s16379_s21, %s16159_s29  ;;  %p16165_p3 = scmp.lt.s32.totalorder %s16159_s29, %s16159_s29 }
  0x5f   :  { %p16166_p4 = por %p16165_p3, %p16164_p2 }
  0x61   :  { %p16167_p5 = pnand %p16166_p4, %p16160_p1 }
  0x63   :  { %16170 = shalt.err (!%p16167_p5)
}
  0x64   :  { %86 = dma.hbm_to_vmem [thread:$0]  %s20744_s7, 256, %s16379_s21, [#allocation9], %s16227_s30, %s16227_s30, %s16228_s16  }
  0x65   :  { %s16233_s18 = smov [#allocation13]   ;;  %s16171_s1 = scalar_lea.hbm %s20750_s13, 2048 }
  0x66   :  { %s112_s22 = sshll.u32 %s16233_s18, 4  ;;  %p16172_p6 = scmp.ne.s32.totalorder %s20750_s13, %s16171_s1  ;;  %s113_s22 = int_to_ptr.vmem [resolvable:$true] %s112_s22 }
  0x67   :  { %p16175_p7 = scmp.lt.u32.totalorder %s16171_s1, %s20750_s13 }
  0x69   :  { %p16177_p8 = pnand %p16175_p7, %p16172_p6 }
  0x6b   :  { %16180 = shalt.err (!%p16177_p8)
}
  0x6c   :  { %s16181_s17 = scalar_lea.vmem %s113_s22, 2048  ;;  %p16186_p10 = scmp.lt.s32.totalorder %s113_s22, %s113_s22 }
  0x6d   :  { %p16182_p9 = scmp.ne.s32.totalorder %s113_s22, %s16181_s17  ;;  %p16187_p11 = scmp.lt.s32.totalorder %s16181_s17, %s16181_s17 }
  0x6f   :  { %p16188_p12 = por %p16187_p11, %p16186_p10 }
  0x71   :  { %p16189_p13 = pnand %p16188_p12, %p16182_p9 }
  0x73   :  { %16192 = shalt.err (!%p16189_p13)
}
  0x74   :  { %118 = dma.hbm_to_vmem [thread:$0]  %s20750_s13, 2048, %s113_s22, [#allocation12], %s16227_s30, %s16227_s30, %s16228_s16  }
  0x75   :  { %16215 = dma.done.wait [#allocation3], 512  }
  0x76   :  { %16216 = vsyncadd [#allocation3], 4294966784 }
  0x77   :  { %16217 = dma.done.wait [#allocation6], 576  }
  0x78   :  { %16218 = vsyncadd [#allocation6], 4294966720 }
  0x79   :  { %16219 = dma.done.wait [#allocation9], 320  }
  0x7a   :  { %16220 = vsyncadd [#allocation9], 4294966976 }
  0x7b   :  { %16221 = dma.done.wait [#allocation12], 4096  }
  0x7c   :  { %16222 = vsyncadd [#allocation12], 4294963200  ;;  %vm174_vm0 = vcmask 130048   ;;  %v172_v0 = vld [vmem:[#allocation10] sm:$0xff]  ;;  %v173_v1 = vld [vmem:[#allocation10 + $0x8] sm:$0xff]  ;;  %vm3191_vm9 = vcmask 1043456  }
  0x7d   :  { %v168_v2 = vld [vmem:[%s20737_s0] sm:$0xff]  ;;  %v188_v3 = vand.u32 4294901760, %v172_v0  ;;  %v191_v4 = vand.u32 4294901760, %v173_v1  ;;  %v169_v6 = vld [vmem:[%s20737_s0 + $0x8] sm:$0xff]  ;;  %v170_v7 = vld [vmem:[%s20737_s0 + $0x10] sm:$0xff]  ;;  %vm3178_vm10 = vcmask 31744  }
  0x7e   :  { %v176_v5 = vsel %vm174_vm0, %v168_v2, 0  ;;  %v171_v8 = vld [vmem:[%s20737_s0 + $0x18] sm:$0xff]  ;;  %v179_v10 = vsel %vm174_vm0, %v169_v6, 0  ;;  %v182_v11 = vsel %vm174_vm0, %v170_v7, 0  ;;  %v16445_v13 = vld [vmem:[%s20745_s8] sm:$0xff]  ;;  %v16458_v18 = vld [vmem:[%s20745_s8 + $0x8] sm:$0xff] }
  0x7f   :  { %v16440_v9 = vand.u32 4294901760, %v176_v5  ;;  %v185_v12 = vsel %vm174_vm0, %v171_v8, 0  ;;  %v16447_v14 = vpack.c.bf16 %v191_v4, %v188_v3  ;;  %v16449_v15 = vand.u32 4294901760, %v179_v10  ;;  %v16507_v40 = vld [vmem:[%s20745_s8 + $0x10] sm:$0xff]  ;;  %v16512_v41 = vld [vmem:[%s20745_s8 + $0x18] sm:$0xff]  ;;  %v16523_v45 = vld [vmem:[%s20746_s9] sm:$0xff] }
  0x80   :  { %v16451_v16 = vsub.f32 %v172_v0, %v188_v3  ;;  %v16453_v17 = vsub.f32 %v173_v1, %v191_v4  ;;  %v16463_v20 = vand.u32 4294901760, %v182_v11  ;;  %v16465_v21 = vand.u32 4294901760, %v185_v12  ;;  %v16528_v46 = vld [vmem:[%s20746_s9 + $0x8] sm:$0xff]  ;;  %v16537_v53 = vld [vmem:[%s20745_s8 + $0x20] sm:$0xff]  ;;  %v16549_v58 = vld [vmem:[%s20746_s9 + $0x10] sm:$0xff] }
  0x81   :  { %v16461_v19 = vsub.f32 %v176_v5, %v16440_v9  ;;  %13758 = vmatprep.subr.bf16.mxu0 %v16447_v14  ;;  %v16469_v22 = vsub.f32 %v179_v10, %v16449_v15  ;;  %v1591_v25 = vand.u32 4294901760, %v16445_v13  ;;  %v1594_v29 = vand.u32 4294901760, %v16458_v18  ;;  %v16542_v54 = vld [vmem:[%s20745_s8 + $0x28] sm:$0xff]  ;;  %v16560_v60 = vld [vmem:[%s20746_s9 + $0x18] sm:$0xff]  ;;  %v16574_v1 = vld [vmem:[%s20745_s8 + $0x30] sm:$0xff] }
  0x82   :  { %v297_v23 = vand.u32 4294901760, %v16451_v16  ;;  %v304_v24 = vand.u32 4294901760, %v16453_v17  ;;  %13760 = vmatpush3.bf16.msra.mxu0 %v16447_v14  ;;  %v16477_v27 = vsub.f32 %v182_v11, %v16463_v20  ;;  %v16480_v28 = vsub.f32 %v185_v12, %v16465_v21  ;;  %v16579_v2 = vld [vmem:[%s20745_s8 + $0x38] sm:$0xff]  ;;  %v16592_v5 = vld [vmem:[%s20746_s9 + $0x20] sm:$0xff]  ;;  %v16599_v6 = vld [vmem:[%s20746_s9 + $0x28] sm:$0xff] }
  0x83   :  { %v256_v26 = vand.u32 4294901760, %v16461_v19  ;;  %v266_v30 = vand.u32 4294901760, %v16469_v22  ;;  %v16499_v36 = vpack.c.bf16 %v1594_v29, %v1591_v25  ;;  %v13765_v49 = vpack.c.bf16 %v16453_v17, %v16451_v16  ;;  %v16613_v12 = vld [vmem:[%s20745_s8 + $0x40] sm:$0xff] }
  0x84   :  { %v298_v31 = vsub.f32 %v16451_v16, %v297_v23  ;;  %v305_v32 = vsub.f32 %v16453_v17, %v304_v24  ;;  %v276_v34 = vand.u32 4294901760, %v16477_v27  ;;  %v286_v35 = vand.u32 4294901760, %v16480_v28 }
  0x85   :  { %v257_v33 = vsub.f32 %v16461_v19, %v256_v26  ;;  %v267_v37 = vsub.f32 %v16469_v22, %v266_v30  ;;  %v1597_v51 = vand.u32 4294901760, %v16507_v40  ;;  %v1600_v52 = vand.u32 4294901760, %v16512_v41 }
  0x86   :  { %v299_v38 = vand.u32 4294901760, %v298_v31  ;;  %v306_v39 = vand.u32 4294901760, %v305_v32  ;;  %v277_v43 = vsub.f32 %v16477_v27, %v276_v34  ;;  %v287_v44 = vsub.f32 %v16480_v28, %v286_v35  ;;  %v16618_v31 = vld [vmem:[%s20745_s8 + $0x48] sm:$0xff] }
  0x87   :  { %v258_v42 = vand.u32 4294901760, %v257_v33  ;;  %v268_v47 = vand.u32 4294901760, %v267_v37  ;;  %v20760_v56 = vand.u32 4294901760, %v16523_v45  ;;  %v20757_v57 = vand.u32 4294901760, %v16528_v46  ;;  %v16632_v37 = vld [vmem:[%s20746_s9 + $0x30] sm:$0xff] }
  0x88   :  { %v13761_v48 = vpack.c.bf16 %v306_v39, %v299_v38  ;;  %v278_v50 = vand.u32 4294901760, %v277_v43  ;;  %v288_v55 = vand.u32 4294901760, %v287_v44  ;;  %v16555_v59 = vpack.c.bf16 %v1600_v52, %v1597_v51  ;;  %v16637_v38 = vld [vmem:[%s20746_s9 + $0x38] sm:$0xff] }
  0x89   :  { %11325 = vmatprep.mubr.f32.mxu0 %v258_v42  ;;  %v16566_v61 = vpack.c.bf16 %v20757_v57, %v20760_v56  ;;  %v1603_v62 = vand.u32 4294901760, %v16537_v53  ;;  %v1606_v63 = vand.u32 4294901760, %v16542_v54  ;;  %v20756_v0 = vand.u32 4294901760, %v16549_v58 }
  0x8a   :  { %11326 = vmatmul.mubr.f32.vlgmr.msra.gmra.mrb[0].mxu0 %v268_v47  ;;  %13762 = vmatprep.subr.bf16.mxu0 %v13761_v48  ;;  %v20755_v4 = vand.u32 4294901760, %v16560_v60  ;;  %v1609_v8 = vand.u32 4294901760, %v16574_v1  ;;  %v1612_v10 = vand.u32 4294901760, %v16579_v2  ;;  %v20754_v11 = vand.u32 4294901760, %v16592_v5 }
  0x8b   :  { %13764 = vmatpush3.bf16.msra.mxu0 %v13761_v48  ;;  %11328 = vmatprep.mubr.f32.mxu0 %v278_v50  ;;  %21209 = vst [vmem:[#allocation20_spill] sm:$0xff] %v16566_v61  ;;  %v16586_v3 = vpack.c.bf16 %v1606_v63, %v1603_v62  ;;  %v20753_v33 = vand.u32 4294901760, %v16599_v6  ;;  %v1615_v42 = vand.u32 4294901760, %v16613_v12  ;;  %v20765_v43 = vand.u32 4294901760, %v16618_v31  ;;  %v16655_v48 = vld [vmem:[%s20745_s8 + $0x50] sm:$0xff]  ;;  %v16665_v50 = vld [vmem:[%s20746_s9 + $0x40] sm:$0xff] }
  0x8c   :  { %13766 = vmatprep.subr.bf16.mxu0 %v13765_v49  ;;  %13782 = vmatprep.subr.bf16.mxu1 %v16566_v61  ;;  %v16605_v7 = vpack.c.bf16 %v20755_v4, %v20756_v0  ;;  %v16626_v32 = vpack.c.bf16 %v1612_v10, %v1609_v8  ;;  %v20759_v44 = vand.u32 4294901760, %v16632_v37  ;;  %v20758_v47 = vand.u32 4294901760, %v16637_v38 }
  0x8d   :  { %13784 = vmatpush3.bf16.msra.mxu1 %v16566_v61  ;;  %v16646_v39 = vpack.c.bf16 %v20753_v33, %v20754_v11  ;;  %v16678_v33 = vld [vmem:[%s20746_s9 + $0x48] sm:$0xff]  ;;  %v13773_v11 = vpack.c.bf16 %v304_v24, %v297_v23  ;;  %v16688_v4 = vsub.f32 %v16445_v13, %v1591_v25  ;;  %v16699_v57 = vsub.f32 %v16458_v18, %v1594_v29  ;;  %v16708_v23 = vld [vmem:[%s20745_s8 + $0x60] sm:$0xff] }
  0x8e   :  { %11329 = vmatmul.mubr.f32.gmra.mrb[2].mxu0 %v288_v55  ;;  %21210 = vst [vmem:[#allocation21_spill] sm:$0xff] %v16605_v7  ;;  %13786 = vmatprep.subr.bf16.mxu1 %v16605_v7  ;;  %v16673_v55 = vpack.c.bf16 %v20765_v43, %v1615_v42  ;;  %v16694_v0 = vpack.c.bf16 %v20758_v47, %v20759_v44  ;;  %v20762_v16 = vand.u32 4294901760, %v16655_v48  ;;  %v20764_v13 = vand.u32 4294901760, %v16665_v50  ;;  %v16713_v24 = vld [vmem:[%s20745_s8 + $0x68] sm:$0xff] }
  0x8f   :  { %11335 = vmatprep.mubr.f32.mxu0 %v16440_v9  ;;  %21211 = vst [vmem:[#allocation22_spill] sm:$0xff] %v16646_v39  ;;  %21213 = vst [vmem:[#allocation24_spill] sm:$0xff] %v16688_v4  ;;  %v20763_v18 = vand.u32 4294901760, %v16678_v33  ;;  %v1627_v47 = vand.u32 4294901760, %v16708_v23  ;;  %v20766_v44 = vand.u32 4294901760, %v16713_v24  ;;  %v20782_v56 = vand.u32 4294901760, %v16688_v4 }
  0x90   :  { %21212 = vst [vmem:[#allocation23_spill] sm:$0xff] %v16673_v55  ;;  %21214 = vst [vmem:[#allocation25_spill] sm:$0xff] %v16694_v0  ;;  %v16756_v43 = vsub.f32 %v16507_v40, %v1597_v51 }
  0x91   :  { %13788 = vmatpush3.bf16.msra.mxu1 %v16605_v7  ;;  %21215 = vst [vmem:[#allocation26_spill] sm:$0xff] %v16699_v57  ;;  %v16730_v29 = vpack.c.bf16 %v20763_v18, %v20764_v13  ;;  %v1715_v18 = vsub.f32 %v16688_v4, %v20782_v56 }
  0x92   :  { %11336 = vmatmul.mubr.f32.vlgmr.msra.gmra.mrb[0].mxu0 %v16449_v15  ;;  %13790 = vmatprep.subr.bf16.mxu1 %v16646_v39  ;;  %21219 = vst [vmem:[#allocation30_spill] sm:$0xff] %v16756_v43 }
  0x93   :  { %13768 = vmatpush3.bf16.msra.mxu0 %v13765_v49  ;;  %11338 = vmatprep.mubr.f32.mxu0 %v16463_v20  ;;  %v16660_v49 = vld [vmem:[%s20745_s8 + $0x58] sm:$0xff]  ;;  %21217 = vst [vmem:[#allocation28_spill] sm:$0xff] %v16730_v29  ;;  %v1716_v40 = vand.u32 4294901760, %v1715_v18 }
  0x94   :  { %13770 = vmatprep.subr.bf16.mxu0 %v16447_v14  ;;  %v20761_v17 = vand.u32 4294901760, %v16660_v49 }
  0x95   :  { %13792 = vmatpush3.bf16.msra.mxu1 %v16646_v39 }
  0x96   :  { %11339 = vmatmul.mubr.f32.gmra.mrb[2].mxu0 %v16465_v21  ;;  %13794 = vmatprep.subr.bf16.mxu1 %v16694_v0  ;;  %v16722_v25 = vpack.c.bf16 %v20761_v17, %v20762_v16  ;;  %v20781_v17 = vand.u32 4294901760, %v16699_v57  ;;  %v16742_v16 = vpack.c.bf16 %v20766_v44, %v1627_v47  ;;  %v16761_v44 = vsub.f32 %v16512_v41, %v1600_v52 }
  0x97   :  { %11345 = vmatprep.mubr.f32.mxu0 %v16461_v19  ;;  %v16769_v19 = vsub.f32 %v16537_v53, %v1603_v62 }
  0x98   :  { %21216 = vst [vmem:[#allocation27_spill] sm:$0xff] %v16722_v25  ;;  %21218 = vst [vmem:[#allocation29_spill] sm:$0xff] %v16742_v16  ;;  %v1722_v13 = vsub.f32 %v16699_v57, %v20781_v17 }
  0x99   :  { %13796 = vmatpush3.bf16.msra.mxu1 %v16694_v0  ;;  %21220 = vst [vmem:[#allocation31_spill] sm:$0xff] %v16761_v44  ;;  %21221 = vst [vmem:[#allocation32_spill] sm:$0xff] %v16769_v19  ;;  %v20778_v51 = vand.u32 4294901760, %v16769_v19 }
  0x9a   :  { %11346 = vmatmul.mubr.f32.vlgmr.msra.gmra.mrb[0].mxu0 %v16469_v22  ;;  %13798 = vmatprep.subr.bf16.mxu1 %v16730_v29  ;;  %v1723_v41 = vand.u32 4294901760, %v1722_v13  ;;  %v20780_v22 = vand.u32 4294901760, %v16756_v43 }
  0x9b   :  { %13772 = vmatpush3.bf16.msra.mxu0 %v16447_v14  ;;  %11348 = vmatprep.mubr.f32.mxu0 %v16477_v27  ;;  %v16789_v27 = vsub.f32 %v16574_v1, %v1609_v8 }
  0x9c   :  { %13774 = vmatprep.subr.bf16.mxu0 %v13773_v11  ;;  %v14005_v53 = vpack.c.bf16 %v1723_v41, %v1716_v40  ;;  %v21228_v41 = vand.u32 4294901760, %v16655_v48 }
  0x9d   :  { %13800 = vmatpush3.bf16.msra.mxu1 %v16730_v29  ;;  %21223 = vst [vmem:[#allocation34_spill] sm:$0xff] %v16789_v27 }
  0x9e   :  { %11349 = vmatmul.mubr.f32.gmra.mrb[2].mxu0 %v16480_v28  ;;  %v1729_v28 = vsub.f32 %v16756_v43, %v20780_v22 }
  0x9f   :  { %11355 = vmatprep.mubr.f32.mxu0 %v256_v26  ;;  %v16774_v26 = vsub.f32 %v16542_v54, %v1606_v63  ;;  %v1743_v54 = vsub.f32 %v16769_v19, %v20778_v51  ;;  %v20776_v63 = vand.u32 4294901760, %v16789_v27 }
  0xa0   :  { %v1730_v8 = vand.u32 4294901760, %v1729_v28 }
  0xa1   :  { %21222 = vst [vmem:[#allocation33_spill] sm:$0xff] %v16774_v26  ;;  %v20777_v52 = vand.u32 4294901760, %v16774_v26  ;;  %v1757_v40 = vsub.f32 %v16789_v27, %v20776_v63 }
  0xa2   :  { %11356 = vmatmul.mubr.f32.vlgmr.msra.gmra.mrb[0].mxu0 %v266_v30  ;;  %v20779_v30 = vand.u32 4294901760, %v16761_v44 }
  0xa3   :  { %13776 = vmatpush3.bf16.msra.mxu0 %v13773_v11  ;;  %11358 = vmatprep.mubr.f32.mxu0 %v276_v34  ;;  %v16794_v34 = vsub.f32 %v16579_v2, %v1612_v10  ;;  %v1750_v62 = vsub.f32 %v16774_v26, %v20777_v52  ;;  %v16816_v2 = vsub.f32 %v16613_v12, %v1615_v42  ;;  %v21226_v11 = vand.u32 4294901760, %v16618_v31 }
  0xa4   :  { %13778 = vmatprep.subr.bf16.mxu0 %v16447_v14 }
  0xa5   :  { %21224 = vst [vmem:[#allocation35_spill] sm:$0xff] %v16794_v34  ;;  %v20767_v1 = vand.u32 4294901760, %v16794_v34  ;;  %21225 = vst [vmem:[#allocation36_spill] sm:$0xff] %v16816_v2  ;;  %v16821_v13 = vsub.f32 %v16618_v31, %v21226_v11  ;;  %v1751_v18 = vand.u32 4294901760, %v1750_v62  ;;  %v20775_v42 = vand.u32 4294901760, %v16816_v2 }
  0xa6   :  { %11359 = vmatmul.mubr.f32.gmra.mrb[2].mxu0 %v286_v35  ;;  %v1736_v35 = vsub.f32 %v16761_v44, %v20779_v30  ;;  %v16835_v31 = vsub.f32 %v16655_v48, %v21228_v41  ;;  %v1758_v11 = vand.u32 4294901760, %v1757_v40 }
  0xa7   :  { %11365 = vmatprep.mubr.f32.mxu0 %v16440_v9  ;;  %21227 = vst [vmem:[#allocation37_spill] sm:$0xff] %v16821_v13  ;;  %v1764_v12 = vsub.f32 %v16794_v34, %v20767_v1  ;;  %v1771_v48 = vsub.f32 %v16816_v2, %v20775_v42  ;;  %v21240_v42 = vand.u32 4294901760, %v16528_v46 }
  0xa8   :  { %v1737_v10 = vand.u32 4294901760, %v1736_v35  ;;  %21229 = vst [vmem:[#allocation38_spill] sm:$0xff] %v16835_v31  ;;  %v20774_v35 = vand.u32 4294901760, %v16821_v13 }
  0xa9   :  { %v1765_v1 = vand.u32 4294901760, %v1764_v12  ;;  %v16937_v63 = vsub.f32 %v16528_v46, %v21240_v42 }
  0xaa   :  { %11366 = vmatmul.mubr.f32.vlgmr.msra.gmra.mrb[0].mxu0 %v16449_v15  ;;  %v14009_v28 = vpack.c.bf16 %v1737_v10, %v1730_v8  ;;  %v20773_v8 = vand.u32 4294901760, %v16835_v31 }
  0xab   :  { %13780 = vmatpush3.bf16.msra.mxu0 %v16447_v14  ;;  %11368 = vmatprep.mubr.f32.mxu0 %v16463_v20  ;;  %v1744_v14 = vand.u32 4294901760, %v1743_v54  ;;  %21241 = vst [vmem:[#allocation46_spill] sm:$0xff] %v16937_v63  ;;  %v20786_v30 = vand.u32 4294901760, %v16937_v63 }
  0xac   :  { %14006 = vmatprep.subr.bf16.mxu0 %v14005_v53  ;;  %v1785_v40 = vsub.f32 %v16835_v31, %v20773_v8  ;;  %v21238_v8 = vand.u32 4294901760, %v16523_v45 }
  0xad   :  { %v14013_v62 = vpack.c.bf16 %v1751_v18, %v1744_v14  ;;  %v14017_v14 = vpack.c.bf16 %v1765_v1, %v1758_v11  ;;  %v1772_v18 = vand.u32 4294901760, %v1771_v48 }
  0xae   :  { %11369 = vmatmul.mubr.f32.gmra.mrb[2].mxu0 %v16465_v21  ;;  %v1786_v41 = vand.u32 4294901760, %v1785_v40 }
  0xaf   :  { %11375 = vmatprep.mubr.f32.mxu0 %v16440_v9  ;;  %v21230_v9 = vand.u32 4294901760, %v16660_v49 }
  0xb1   :  { %v16841_v54 = vsub.f32 %v16660_v49, %v21230_v9  ;;  %v1778_v49 = vsub.f32 %v16821_v13, %v20774_v35  ;;  %v16932_v35 = vsub.f32 %v16523_v45, %v21238_v8  ;;  %v939_v45 = vsub.f32 %v16937_v63, %v20786_v30 }
  0xb2   :  { %11376 = vmatmul.mubr.f32.vlgmr.msra.gmra.mrb[0].mxu0 %v16449_v15  ;;  %v16856_v15 = vsub.f32 %v16708_v23, %v1627_v47 }
  0xb3   :  { %21231 = vst [vmem:[#allocation39_spill] sm:$0xff] %v16841_v54  ;;  %11378 = vmatprep.mubr.f32.mxu0 %v16463_v20  ;;  %14008 = vmatpush3.bf16.msra.mxu0 %v14005_v53  ;;  %v20772_v10 = vand.u32 4294901760, %v16841_v54  ;;  %v21232_v20 = vand.u32 4294901760, %v16713_v24  ;;  %v1779_v12 = vand.u32 4294901760, %v1778_v49  ;;  %21239 = vst [vmem:[#allocation45_spill] sm:$0xff] %v16932_v35  ;;  %v20785_v51 = vand.u32 4294901760, %v16932_v35 }
  0xb4   :  { %14010 = vmatprep.subr.bf16.mxu0 %v14009_v28  ;;  %v20771_v23 = vand.u32 4294901760, %v16856_v15  ;;  %v940_v42 = vand.u32 4294901760, %v939_v45  ;;  %v17126_v39 = vpack.c.bf16 %v16841_v54, %v16835_v31 }
  0xb5   :  { %v16861_v53 = vsub.f32 %v16713_v24, %v21232_v20  ;;  %v1792_v47 = vsub.f32 %v16841_v54, %v20772_v10  ;;  %v789_v20 = vld [vmem:[%s20745_s8 + $0x70] sm:$0xff]  ;;  %v932_v22 = vsub.f32 %v16932_v35, %v20785_v51 }
  0xb6   :  { %11379 = vmatmul.mubr.f32.gmra.mrb[2].mxu0 %v16465_v21  ;;  %v14021_v21 = vpack.c.bf16 %v1779_v12, %v1772_v18  ;;  %v790_v18 = vld [vmem:[%s20745_s8 + $0x78] sm:$0xff]  ;;  %v1633_v40 = vand.u32 4294901760, %v789_v20 }
  0xb7   :  { %14012 = vmatpush3.bf16.msra.mxu0 %v14009_v28  ;;  %v20768_v24 = vand.u32 4294901760, %v16861_v53  ;;  %v1793_v1 = vand.u32 4294901760, %v1792_v47  ;;  %v1799_v28 = vsub.f32 %v16856_v15, %v20771_v23  ;;  %v933_v46 = vand.u32 4294901760, %v932_v22 }
  0xb8   :  { %14014 = vmatprep.subr.bf16.mxu0 %v14013_v62  ;;  %v16884_v12 = vsub.f32 %v789_v20, %v1633_v40 }
  0xb9   :  { %v1806_v9 = vsub.f32 %v16861_v53, %v20768_v24  ;;  %v14025_v11 = vpack.c.bf16 %v1793_v1, %v1786_v41  ;;  %v1800_v48 = vand.u32 4294901760, %v1799_v28  ;;  %v16951_v8 = vpack.c.bf16 %v940_v42, %v933_v46 }
  0xba   :  { %21233 = vst [vmem:[#allocation40_spill] sm:$0xff] %v16884_v12  ;;  %v20769_v41 = vand.u32 4294901760, %v16884_v12 }
  0xbb   :  { %14016 = vmatpush3.bf16.msra.mxu0 %v14013_v62  ;;  %v1807_v49 = vand.u32 4294901760, %v1806_v9  ;;  %v801_v9 = vld [vmem:[%s20746_s9 + $0x50] sm:$0xff] }
  0xbc   :  { %14018 = vmatprep.subr.bf16.mxu0 %v14017_v14  ;;  %v1813_v1 = vsub.f32 %v16884_v12, %v20769_v41  ;;  %v803_v41 = vld [vmem:[%s20746_s9 + $0x60] sm:$0xff] }
  0xbd   :  { %v14029_v62 = vpack.c.bf16 %v1807_v49, %v1800_v48  ;;  %v838_v48 = vand.u32 4294901760, %v801_v9  ;;  %v844_v23 = vand.u32 4294901760, %v803_v41 }
  0xbf   :  { %14020 = vmatpush3.bf16.msra.mxu0 %v14017_v14  ;;  %v1636_v14 = vand.u32 4294901760, %v790_v18  ;;  %v16954_v17 = vsub.f32 %v801_v9, %v838_v48 }
  0xc0   :  { %14022 = vmatprep.subr.bf16.mxu0 %v14021_v21 }
  0xc1   :  { %v16886_v47 = vsub.f32 %v790_v18, %v1636_v14  ;;  %21243 = vst [vmem:[#allocation48_spill] sm:$0xff] %v16954_v17 }
  0xc3   :  { %14024 = vmatpush3.bf16.msra.mxu0 %v14021_v21  ;;  %21234 = vst [vmem:[#allocation41_spill] sm:$0xff] %v16886_v47  ;;  %v20770_v21 = vand.u32 4294901760, %v16886_v47  ;;  %v16974_v46 = vpack.c.bf16 %v16886_v47, %v16884_v12 }
  0xc4   :  { %14026 = vmatprep.subr.bf16.mxu0 %v14025_v11 }
  0xc5   :  { %v1820_v28 = vsub.f32 %v16886_v47, %v20770_v21  ;;  %v804_v21 = vld [vmem:[%s20746_s9 + $0x68] sm:$0xff] }
  0xc6   :  { %v847_v10 = vand.u32 4294901760, %v804_v21 }
  0xc7   :  { %14028 = vmatpush3.bf16.msra.mxu0 %v14025_v11  ;;  %v802_v11 = vld [vmem:[%s20746_s9 + $0x58] sm:$0xff]  ;;  %v1821_v20 = vand.u32 4294901760, %v1820_v28 }
  0xc8   :  { %14030 = vmatprep.subr.bf16.mxu0 %v14029_v62  ;;  %v841_v49 = vand.u32 4294901760, %v802_v11  ;;  %v16914_v28 = vpack.c.bf16 %v847_v10, %v844_v23  ;;  %v16968_v45 = vsub.f32 %v804_v21, %v847_v10 }
  0xca   :  { %v16902_v18 = vpack.c.bf16 %v841_v49, %v838_v48  ;;  %21237 = vst [vmem:[#allocation44_spill] sm:$0xff] %v16914_v28  ;;  %v16956_v56 = vsub.f32 %v802_v11, %v841_v49  ;;  %21246 = vst [vmem:[#allocation51_spill] sm:$0xff] %v16968_v45  ;;  %v20794_v49 = vand.u32 4294901760, %v16968_v45 }
  0xcb   :  { %14032 = vmatpush3.bf16.msra.mxu0 %v14029_v62  ;;  %v1814_v62 = vand.u32 4294901760, %v1813_v1  ;;  %v16912_v1 = vpack.c.bf16 %v1636_v14, %v1633_v40 }
  0xcc   :  { %21235 = vst [vmem:[#allocation42_spill] sm:$0xff] %v16902_v18  ;;  %13802 = vmatprep.subr.bf16.mxu1 %v16902_v18  ;;  %21244 = vst [vmem:[#allocation49_spill] sm:$0xff] %v16956_v56  ;;  %v20789_v51 = vand.u32 4294901760, %v16956_v56 }
  0xcd   :  { %v14033_v24 = vpack.c.bf16 %v1821_v20, %v1814_v62  ;;  %13804 = vmatpush3.bf16.msra.mxu1 %v16902_v18  ;;  %21236 = vst [vmem:[#allocation43_spill] sm:$0xff] %v16912_v1  ;;  %v16918_v62 = vpack.c.bf16 %v16699_v57, %v16688_v4  ;;  %v805_v20 = vld [vmem:[%s20746_s9 + $0x70] sm:$0xff]  ;;  %v16963_v18 = vsub.f32 %v803_v41, %v844_v23 }
  0xce   :  { %13806 = vmatprep.subr.bf16.mxu1 %v16914_v28  ;;  %v850_v40 = vand.u32 4294901760, %v805_v20  ;;  %v1009_v22 = vsub.f32 %v16956_v56, %v20789_v51 }
  0xcf   :  { %14034 = vmatprep.subr.bf16.mxu0 %v14033_v24  ;;  %21245 = vst [vmem:[#allocation50_spill] sm:$0xff] %v16963_v18  ;;  %v20791_v11 = vand.u32 4294901760, %v16963_v18 }
  0xd0   :  { %14036 = vmatpush3.bf16.msra.mxu0 %v14033_v24  ;;  %v806_v24 = vld [vmem:[%s20746_s9 + $0x78] sm:$0xff]  ;;  %v1010_v48 = vand.u32 4294901760, %v1009_v22  ;;  %v16979_v41 = vsub.f32 %v805_v20, %v850_v40 }
  0xd1   :  { %14038 = vmatprep.subr.bf16.mxu0 %v16918_v62  ;;  %13808 = vmatpush3.bf16.msra.mxu1 %v16914_v28  ;;  %v853_v14 = vand.u32 4294901760, %v806_v24  ;;  %v20790_v28 = vand.u32 4294901760, %v16954_v17  ;;  %v1016_v23 = vsub.f32 %v16963_v18, %v20791_v11 }
  0xd2   :  { %21247 = vst [vmem:[#allocation52_spill] sm:$0xff] %v16979_v41  ;;  %v20793_v22 = vand.u32 4294901760, %v16979_v41 }
  0xd3   :  { %v16939_v52 = vpack.c.bf16 %v853_v14, %v850_v40  ;;  %v1002_v30 = vsub.f32 %v16954_v17, %v20790_v28  ;;  %v16981_v42 = vsub.f32 %v806_v24, %v853_v14  ;;  %v1017_v21 = vand.u32 4294901760, %v1016_v23 }
  0xd4   :  { %v1030_v11 = vsub.f32 %v16979_v41, %v20793_v22  ;;  %v17006_v23 = vpack.c.bf16 %v16956_v56, %v16954_v17  ;;  %v21258_v22 = vand.u32 4294901760, %v16599_v6 }
  0xd5   :  { %21242 = vst [vmem:[#allocation47_spill] sm:$0xff] %v16939_v52  ;;  %13810 = vmatprep.subr.bf16.mxu1 %v16939_v52  ;;  %v1003_v9 = vand.u32 4294901760, %v1002_v30  ;;  %21248 = vst [vmem:[#allocation53_spill] sm:$0xff] %v16981_v42  ;;  %v1023_v30 = vsub.f32 %v16968_v45, %v20794_v49  ;;  %v20792_v51 = vand.u32 4294901760, %v16981_v42 }
  0xd6   :  { %13812 = vmatpush3.bf16.msra.mxu1 %v16939_v52  ;;  %v1031_v40 = vand.u32 4294901760, %v1030_v11  ;;  %21249 = vst [vmem:[#allocation54_spill] sm:$0xff] %v17006_v23  ;;  %v21252_v11 = vand.u32 4294901760, %v16549_v58  ;;  %v17034_v49 = vsub.f32 %v16599_v6, %v21258_v22  ;;  %v21264_v6 = vand.u32 4294901760, %v16665_v50 }
  0xd7   :  { %13814 = vmatprep.subr.bf16.mxu1 %v16951_v8  ;;  %v16983_v10 = vpack.c.bf16 %v1010_v48, %v1003_v9  ;;  %v1024_v28 = vand.u32 4294901760, %v1023_v30  ;;  %v1037_v20 = vsub.f32 %v16981_v42, %v20792_v51  ;;  %v17002_v48 = vpack.c.bf16 %v16937_v63, %v16932_v35 }
  0xd8   :  { %v17010_v30 = vpack.c.bf16 %v16968_v45, %v16963_v18  ;;  %21259 = vst [vmem:[#allocation60_spill] sm:$0xff] %v17034_v49  ;;  %v17053_v22 = vsub.f32 %v16665_v50, %v21264_v6  ;;  %v21270_v50 = vand.u32 4294901760, %v17034_v49 }
  0xd9   :  { %v16996_v24 = vpack.c.bf16 %v1024_v28, %v1017_v21  ;;  %v1038_v14 = vand.u32 4294901760, %v1037_v20  ;;  %v17014_v28 = vpack.c.bf16 %v16981_v42, %v16979_v41  ;;  %v17019_v21 = vsub.f32 %v16549_v58, %v21252_v11 }
  0xda   :  { %21250 = vst [vmem:[#allocation55_spill] sm:$0xff] %v17010_v30  ;;  %v21254_v20 = vand.u32 4294901760, %v16560_v60  ;;  %v3774_v42 = vlaneseq  ;;  %21265 = vst [vmem:[#allocation63_spill] sm:$0xff] %v17053_v22  ;;  %v21266_v58 = vand.u32 4294901760, %v16678_v33  ;;  %v967_v6 = vsub.f32 %v17034_v49, %v21270_v50 }
  0xdb   :  { %v16998_v9 = vpack.c.bf16 %v1038_v14, %v1031_v40  ;;  %21251 = vst [vmem:[#allocation56_spill] sm:$0xff] %v17014_v28  ;;  %21253 = vst [vmem:[#allocation57_spill] sm:$0xff] %v17019_v21  ;;  %v21256_v14 = vand.u32 4294901760, %v16592_v5  ;;  %v20799_v41 = vand.u32 4294901760, %v17019_v21 }
  0xdc   :  { %v17024_v40 = vsub.f32 %v16560_v60, %v21254_v20  ;;  %v21260_v20 = vand.u32 4294901760, %v16632_v37  ;;  %v17058_v11 = vsub.f32 %v16678_v33, %v21266_v58  ;;  %v3775_v60 = vshrl.u32 %v3774_v42, 7 }
  0xdd   :  { %v17029_v51 = vsub.f32 %v16592_v5, %v21256_v14  ;;  %v21262_v5 = vand.u32 4294901760, %v16637_v38  ;;  %v968_v0 = vand.u32 4294901760, %v967_v6 }
  0xde   :  { %21255 = vst [vmem:[#allocation58_spill] sm:$0xff] %v17024_v40  ;;  %v17043_v45 = vsub.f32 %v16632_v37, %v21260_v20  ;;  %21267 = vst [vmem:[#allocation64_spill] sm:$0xff] %v17058_v11  ;;  %v946_v37 = vsub.f32 %v17019_v21, %v20799_v41  ;;  %v21268_v20 = vand.u32 4294901760, %v17024_v40  ;;  %v3776_v56 = vsub.s32 0, %v3775_v60 }
  0xdf   :  { %21257 = vst [vmem:[#allocation59_spill] sm:$0xff] %v17029_v51  ;;  %v17048_v14 = vsub.f32 %v16637_v38, %v21262_v5  ;;  %v21269_v5 = vand.u32 4294901760, %v17029_v51  ;;  %v3784_v17 = vsub.s32 1, %v3775_v60  ;;  %v3792_v63 = vsub.s32 2, %v3775_v60 }
  0xe0   :  { %21261 = vst [vmem:[#allocation61_spill] sm:$0xff] %v17043_v45  ;;  %v953_v38 = vsub.f32 %v17024_v40, %v21268_v20  ;;  %v20811_v33 = vand.u32 4294901760, %v17043_v45  ;;  %v167_v20 = vld [vmem:[#allocation8] sm:$0xf]  ;;  %v3800_v35 = vsub.s32 3, %v3775_v60  ;;  %v947_v52 = vand.u32 4294901760, %v946_v37 }
  0xe1   :  { %21263 = vst [vmem:[#allocation62_spill] sm:$0xff] %v17048_v14  ;;  %v960_v18 = vsub.f32 %v17029_v51, %v21269_v5  ;;  %v20812_v42 = vand.u32 4294901760, %v17048_v14  ;;  %v21271_v41 = vand.u32 4294901760, %v17053_v22  ;;  %v21272_v60 = vand.u32 4294901760, %v17058_v11 }
  0xe2   :  { %v954_v29 = vand.u32 4294901760, %v953_v38  ;;  %v17079_v50 = vsub.f32 %v17043_v45, %v20811_v33  ;;  %v17096_v37 = vrot.slane %v167_v20, %v3776_v56  ;;  %v17098_v38 = vrot.slane %v167_v20, %v3784_v17 }
  0xe3   :  { %v961_v5 = vand.u32 4294901760, %v960_v18  ;;  %v17084_v58 = vsub.f32 %v17048_v14, %v20812_v42  ;;  %v17089_v47 = vsub.f32 %v17053_v22, %v21271_v41  ;;  %v17094_v18 = vsub.f32 %v17058_v11, %v21272_v60 }
  0xe4   :  { %21273 = vst [vmem:[#allocation65_spill] sm:$0xff] %v17096_v37  ;;  %21274 = vst [vmem:[#allocation66_spill] sm:$0xff] %v17098_v38  ;;  %v17100_v6 = vrot.slane %v167_v20, %v3792_v63  ;;  %v17102_v33 = vrot.slane %v167_v20, %v3800_v35  ;;  %v14041_v42 = vpack.c.bf16 %v16761_v44, %v16756_v43 }
  0xe5   :  { %v17108_v41 = vpack.c.bf16 %v16774_v26, %v16769_v19  ;;  %v17110_v12 = vpack.c.bf16 %v954_v29, %v947_v52  ;;  %v17114_v60 = vpack.c.bf16 %v16794_v34, %v16789_v27  ;;  %v17116_v56 = vpack.c.bf16 %v968_v0, %v961_v5 }
  0xe6   :  { %21275 = vst [vmem:[#allocation67_spill] sm:$0xff] %v17100_v6  ;;  %21276 = vst [vmem:[#allocation68_spill] sm:$0xff] %v17102_v33  ;;  %v17120_v17 = vpack.c.bf16 %v16821_v13, %v16816_v2 }
 0x185   :  { %v11377_v35 = vpop.f32.mrb[0].mxu0 }
 0x186   :  { %v17130_v7 = vand.u32 4294901760, %v11377_v35  ;;  %v17133_v0 = vmul.f32 %v11377_v35, %v17096_v37  ;;  %v17136_v5 = vmul.f32 %v11377_v35, %v17098_v38  ;;  %v17139_v63 = vmul.f32 %v11377_v35, %v17100_v6  ;;  %v753_v20 = vpop.f32.mrb[1].mxu0 }
 0x187   :  { %v17142_v61 = vmul.f32 %v11377_v35, %v17102_v33  ;;  %v17144_v54 = vand.u32 4294901760, %v753_v20  ;;  %v17147_v29 = vmul.f32 %v17096_v37, %v753_v20  ;;  %v17150_v52 = vmul.f32 %v17098_v38, %v753_v20 }
 0x188   :  { %21277 = vst [vmem:[#allocation69_spill] sm:$0xff] %v17130_v7  ;;  %v17153_v31 = vsub.f32 %v11377_v35, %v17130_v7  ;;  %v17160_v27 = vmul.f32 %v17100_v6, %v753_v20  ;;  %v17163_v30 = vmul.f32 %v17102_v33, %v753_v20  ;;  %v21279_v23 = vand.u32 4294901760, %v17133_v0 }
 0x189   :  { %v3814_v26 = vand.u32 4294901760, %v17147_v29  ;;  %v11380_v19 = vpop.f32.mrb[2].mxu0  ;;  %11679 = vmatprep.mubr.f32.mxu0 %v17144_v54  ;;  %v3826_v35 = vand.u32 4294901760, %v17150_v52  ;;  %v21281_v1 = vand.u32 4294901760, %v17136_v5  ;;  %v21283_v57 = vand.u32 4294901760, %v17139_v63 }
 0x18a   :  { %v17168_v13 = vand.u32 4294901760, %v11380_v19  ;;  %v3781_v2 = vmul.f32 %v11380_v19, %v17096_v37  ;;  %v17172_v28 = vmul.f32 %v11380_v19, %v17098_v38  ;;  %v765_v34 = vpop.f32.mrb[3].mxu0  ;;  %11680 = vmatmul.mubr.f32.vlgmr.msra.gmra.mrb[4].mxu0 %v17130_v7  ;;  %v20852_v43 = vand.u32 4294901760, %v17160_v27 }
 0x18b   :  { %v17177_v44 = vpack.c.bf16 %v21279_v23, %v3814_v26  ;;  %v17182_v4 = vmul.f32 %v11380_v19, %v17100_v6  ;;  %14040 = vmatpush3.bf16.msra.mxu0 %v16918_v62  ;;  %v17187_v11 = vpack.c.bf16 %v21281_v1, %v3826_v35  ;;  %v17193_v16 = vmul.f32 %v11380_v19, %v17102_v33 }
 0x18c   :  { %21278 = vst [vmem:[#allocation70_spill] sm:$0xff] %v17168_v13  ;;  %v17190_v22 = vsub.f32 %v11380_v19, %v17168_v13  ;;  %v3823_v23 = vand.u32 4294901760, %v3781_v2  ;;  %14042 = vmatprep.subr.bf16.mxu0 %v14041_v42  ;;  %v21285_v62 = vand.u32 4294901760, %v17163_v30  ;;  %v21286_v14 = vand.u32 4294901760, %v17142_v61 }
 0x18d   :  { %21280 = vst [vmem:[#allocation71_spill] sm:$0xff] %v17177_v44  ;;  %21282 = vst [vmem:[#allocation72_spill] sm:$0xff] %v17187_v11  ;;  %v17199_v44 = vpack.c.bf16 %v21283_v57, %v20852_v43  ;;  %v3835_v11 = vand.u32 4294901760, %v17172_v28  ;;  %v17210_v25 = vand.u32 4294901760, %v765_v34  ;;  %v3780_v49 = vmul.f32 %v17096_v37, %v765_v34 }
 0x18e   :  { %v17205_v1 = vpack.c.bf16 %v21286_v14, %v21285_v62  ;;  %v3788_v51 = vmul.f32 %v17098_v38, %v765_v34  ;;  %v17215_v57 = vmul.f32 %v17100_v6, %v765_v34  ;;  %v17218_v43 = vmul.f32 %v17102_v33, %v765_v34 }
 0x18f   :  { %21284 = vst [vmem:[#allocation73_spill] sm:$0xff] %v17199_v44  ;;  %21288 = vst [vmem:[#allocation75_spill] sm:$0xff] %v17210_v25  ;;  %14044 = vmatpush3.bf16.msra.mxu0 %v14041_v42  ;;  %v17221_v14 = vsub.f32 %v753_v20, %v17144_v54  ;;  %v17224_v62 = vand.u32 4294901760, %v17153_v31  ;;  %v17227_v19 = vsub.f32 %v765_v34, %v17210_v25  ;;  %v3820_v45 = vand.u32 4294901760, %v3780_v49 }
 0x190   :  { %21287 = vst [vmem:[#allocation74_spill] sm:$0xff] %v17205_v1  ;;  %v3832_v37 = vand.u32 4294901760, %v3788_v51  ;;  %11682 = vmatprep.mubr.f32.mxu0 %v17210_v25  ;;  %14046 = vmatprep.subr.bf16.mxu0 %v17108_v41  ;;  %v17232_v6 = vand.u32 4294901760, %v17190_v22  ;;  %v20880_v42 = vand.u32 4294901760, %v17215_v57  ;;  %v21297_v7 = vand.u32 4294901760, %v17079_v50 }
 0x191   :  { %21289 = vst [vmem:[#allocation76_spill] sm:$0xff] %v17224_v62  ;;  %11683 = vmatmul.mubr.f32.gmra.mrb[6].mxu0 %v17168_v13  ;;  %v17238_v33 = vand.u32 4294901760, %v17221_v14  ;;  %v901_v34 = vsub.f32 %v17153_v31, %v17224_v62  ;;  %v17242_v38 = vpack.c.bf16 %v3823_v23, %v3820_v45  ;;  %v17248_v44 = vand.u32 4294901760, %v17227_v19 }
 0x192   :  { %21290 = vst [vmem:[#allocation77_spill] sm:$0xff] %v17232_v6  ;;  %v17244_v1 = vpack.c.bf16 %v3835_v11, %v3832_v37  ;;  %11717 = vmatprep.mubr.f32.mxu0 %v17221_v14  ;;  %v921_v20 = vsub.f32 %v17190_v22, %v17232_v6  ;;  %v21293_v13 = vand.u32 4294901760, %v17182_v4  ;;  %v21294_v62 = vand.u32 4294901760, %v17218_v43 }
 0x193   :  { %21291 = vst [vmem:[#allocation78_spill] sm:$0xff] %v17242_v38  ;;  %v21295_v38 = vand.u32 4294901760, %v17193_v16  ;;  %14048 = vmatpush3.bf16.msra.mxu0 %v17108_v41  ;;  %v21298_v6 = vand.u32 4294901760, %v17084_v58  ;;  %v17273_v21 = vand.u32 4294901760, %v901_v34  ;;  %v17286_v50 = vpack.c.bf16 %v16861_v53, %v16856_v15 }
 0x194   :  { %21292 = vst [vmem:[#allocation79_spill] sm:$0xff] %v17244_v1  ;;  %v17256_v25 = vpack.c.bf16 %v21293_v13, %v20880_v42  ;;  %v891_v1 = vsub.f32 %v17221_v14, %v17238_v33  ;;  %v911_v13 = vsub.f32 %v17227_v19, %v17248_v44  ;;  %14050 = vmatprep.subr.bf16.mxu0 %v17114_v60  ;;  %v21301_v41 = vand.u32 4294901760, %v17133_v0 }
 0x195   :  { %v17262_v55 = vpack.c.bf16 %v21295_v38, %v21294_v62  ;;  %v17271_v40 = vpack.c.bf16 %v21298_v6, %v21297_v7  ;;  %v21299_v38 = vand.u32 4294901760, %v17089_v47  ;;  %v21300_v62 = vand.u32 4294901760, %v17094_v18 }
 0x196   :  { %v17288_v58 = vand.u32 4294901760, %v891_v1  ;;  %v17290_v7 = vand.u32 4294901760, %v921_v20  ;;  %v17293_v6 = vsub.f32 %v17147_v29, %v3814_v26  ;;  %v17298_v34 = vsub.f32 %v17133_v0, %v21301_v41 }
 0x197   :  { %21296 = vst [vmem:[#allocation80_spill] sm:$0xff] %v17262_v55  ;;  %v17282_v42 = vpack.c.bf16 %v21300_v62, %v21299_v38  ;;  %v17300_v47 = vand.u32 4294901760, %v911_v13  ;;  %v17302_v18 = vsub.f32 %v3780_v49, %v3820_v45  ;;  %v17304_v38 = vsub.f32 %v3781_v2, %v3823_v23  ;;  %14052 = vmatpush3.bf16.msra.mxu0 %v17114_v60 }
 0x198   :  { %v17307_v62 = vsub.f32 %v17150_v52, %v3826_v35  ;;  %11413 = vmatprep.mubr.f32.mxu1 %v17288_v58  ;;  %v20888_v26 = vand.u32 4294901760, %v17293_v6  ;;  %v20886_v29 = vand.u32 4294901760, %v17298_v34  ;;  %v21302_v0 = vand.u32 4294901760, %v17136_v5  ;;  %14054 = vmatprep.subr.bf16.mxu0 %v17120_v17 }
 0x199   :  { %v17318_v45 = vsub.f32 %v3788_v51, %v3832_v37  ;;  %11414 = vmatmul.mubr.f32.vlgmr.msra.gmra.mrb[0].mxu1 %v17273_v21  ;;  %v20883_v2 = vand.u32 4294901760, %v17302_v18  ;;  %v20881_v49 = vand.u32 4294901760, %v17304_v38  ;;  %v17326_v52 = vsub.f32 %v17172_v28, %v3835_v11 }
 0x19a   :  { %v17316_v1 = vsub.f32 %v17136_v5, %v21302_v0  ;;  %v20882_v60 = vand.u32 4294901760, %v17307_v62  ;;  %13816 = vmatpush3.bf16.msra.mxu1 %v16951_v8  ;;  %11416 = vmatprep.mubr.f32.mxu1 %v17300_v47  ;;  %v3938_v51 = vsub.f32 %v17293_v6, %v20888_v26  ;;  %v3945_v37 = vsub.f32 %v17298_v34, %v20886_v29 }
 0x19b   :  { %v20885_v35 = vand.u32 4294901760, %v17318_v45  ;;  %13818 = vmatprep.subr.bf16.mxu1 %v17110_v12  ;;  %v3952_v8 = vsub.f32 %v17302_v18, %v20883_v2  ;;  %v3959_v28 = vsub.f32 %v17304_v38, %v20881_v49  ;;  %v20887_v23 = vand.u32 4294901760, %v17326_v52  ;;  %14056 = vmatpush3.bf16.msra.mxu0 %v17120_v17 }
 0x19c   :  { %v20884_v5 = vand.u32 4294901760, %v17316_v1  ;;  %v3966_v11 = vsub.f32 %v17307_v62, %v20882_v60  ;;  %v3939_v20 = vand.u32 4294901760, %v3938_v51  ;;  %v3946_v13 = vand.u32 4294901760, %v3945_v37  ;;  %14058 = vmatprep.subr.bf16.mxu0 %v17126_v39 }
 0x19d   :  { %v3980_v0 = vsub.f32 %v17318_v45, %v20885_v35  ;;  %11417 = vmatmul.mubr.f32.gmra.mrb[2].mxu1 %v17290_v7  ;;  %v3953_v49 = vand.u32 4294901760, %v3952_v8  ;;  %v3960_v60 = vand.u32 4294901760, %v3959_v28  ;;  %v3987_v17 = vsub.f32 %v17326_v52, %v20887_v23 }
 0x19e   :  { %v3973_v41 = vsub.f32 %v17316_v1, %v20884_v5  ;;  %v3967_v2 = vand.u32 4294901760, %v3966_v11  ;;  %13820 = vmatpush3.bf16.msra.mxu1 %v17110_v12  ;;  %11451 = vmatprep.mubr.f32.mxu1 %v17144_v54  ;;  %v17363_v51 = vpack.c.bf16 %v3946_v13, %v3939_v20  ;;  %v21304_v35 = vand.u32 4294901760, %v17160_v27 }
 0x19f   :  { %v3981_v5 = vand.u32 4294901760, %v3980_v0  ;;  %13822 = vmatprep.subr.bf16.mxu1 %v17116_v56  ;;  %v17371_v8 = vpack.c.bf16 %v3960_v60, %v3953_v49  ;;  %v3988_v28 = vand.u32 4294901760, %v3987_v17  ;;  %v21306_v11 = vand.u32 4294901760, %v17139_v63  ;;  %14060 = vmatpush3.bf16.msra.mxu0 %v17126_v39 }
 0x1a0   :  { %21303 = vst [vmem:[#allocation81_spill] sm:$0xff] %v17363_v51  ;;  %v3974_v37 = vand.u32 4294901760, %v3973_v41  ;;  %v17368_v29 = vsub.f32 %v17160_v27, %v21304_v35  ;;  %v21307_v20 = vand.u32 4294901760, %v17215_v57  ;;  %v21309_v49 = vand.u32 4294901760, %v17182_v4  ;;  %14062 = vmatprep.subr.bf16.mxu0 %v17286_v50 }
 0x1a1   :  { %21305 = vst [vmem:[#allocation82_spill] sm:$0xff] %v17371_v8  ;;  %v17376_v12 = vsub.f32 %v17139_v63, %v21306_v11  ;;  %v21310_v35 = vand.u32 4294901760, %v17163_v30  ;;  %v17394_v0 = vpack.c.bf16 %v3988_v28, %v3981_v5 }
 0x1a2   :  { %v17381_v13 = vsub.f32 %v17215_v57, %v21307_v20  ;;  %v17384_v41 = vpack.c.bf16 %v3974_v37, %v3967_v2  ;;  %v3993_v27 = vand.u32 4294901760, %v17368_v29  ;;  %v4013_v60 = vsub.f32 %v17182_v4, %v21309_v49  ;;  %13824 = vmatpush3.bf16.msra.mxu1 %v17116_v56 }
 0x1a3   :  { %v4020_v63 = vsub.f32 %v17163_v30, %v21310_v35  ;;  %21311 = vst [vmem:[#allocation84_spill] sm:$0xff] %v17394_v0  ;;  %v4000_v57 = vand.u32 4294901760, %v17376_v12  ;;  %v21312_v2 = vand.u32 4294901760, %v17142_v61  ;;  %v21313_v30 = vand.u32 4294901760, %v17218_v43  ;;  %13826 = vmatprep.subr.bf16.mxu1 %v17271_v40  ;;  %14064 = vmatpush3.bf16.msra.mxu0 %v17286_v50 }
 0x1a4   :  { %21308 = vst [vmem:[#allocation83_spill] sm:$0xff] %v17384_v41  ;;  %v4007_v39 = vand.u32 4294901760, %v17381_v13  ;;  %v3994_v4 = vsub.f32 %v17368_v29, %v3993_v27  ;;  %v4014_v37 = vand.u32 4294901760, %v4013_v60  ;;  %v21314_v35 = vand.u32 4294901760, %v17193_v16  ;;  %14066 = vmatprep.subr.bf16.mxu0 %v16974_v46 }
 0x1a5   :  { %v4027_v17 = vsub.f32 %v17142_v61, %v21312_v2  ;;  %v4021_v11 = vand.u32 4294901760, %v4020_v63  ;;  %v4034_v20 = vsub.f32 %v17218_v43, %v21313_v30  ;;  %v4001_v5 = vsub.f32 %v17376_v12, %v4000_v57 }
 0x1a6   :  { %v4008_v28 = vsub.f32 %v17381_v13, %v4007_v39  ;;  %v4041_v61 = vsub.f32 %v17193_v16, %v21314_v35  ;;  %v3995_v56 = vand.u32 4294901760, %v3994_v4  ;;  %v4015_v2 = vsub.f32 %v4013_v60, %v4014_v37  ;;  %13828 = vmatpush3.bf16.msra.mxu1 %v17271_v40 }
 0x1a7   :  { %v4028_v49 = vand.u32 4294901760, %v4027_v17  ;;  %v4022_v23 = vsub.f32 %v4020_v63, %v4021_v11  ;;  %v4035_v26 = vand.u32 4294901760, %v4034_v20  ;;  %v4002_v43 = vand.u32 4294901760, %v4001_v5  ;;  %13830 = vmatprep.subr.bf16.mxu1 %v17282_v42  ;;  %14068 = vmatpush3.bf16.msra.mxu0 %v16974_v46 }
 0x1a8   :  { %v4009_v30 = vand.u32 4294901760, %v4008_v28  ;;  %v4042_v41 = vand.u32 4294901760, %v4041_v61  ;;  %v4016_v8 = vand.u32 4294901760, %v4015_v2  ;;  %v17417_v16 = vpack.c.bf16 %v17298_v34, %v17293_v6  ;;  %14070 = vmatprep.subr.bf16.mxu0 %v16499_v36 }
 0x1a9   :  { %v4029_v0 = vsub.f32 %v4027_v17, %v4028_v49  ;;  %v4023_v51 = vand.u32 4294901760, %v4022_v23  ;;  %v4036_v55 = vsub.f32 %v4034_v20, %v4035_v26  ;;  %v17420_v50 = vpack.c.bf16 %v4002_v43, %v3995_v56 }
 0x1aa   :  { %21315 = vst [vmem:[#allocation85_spill] sm:$0xff] %v17417_v16  ;;  %v4043_v35 = vsub.f32 %v4041_v61, %v4042_v41  ;;  %v17424_v5 = vpack.c.bf16 %v17304_v38, %v17302_v18  ;;  %v17427_v40 = vpack.c.bf16 %v4016_v8, %v4009_v30  ;;  %v17431_v28 = vpack.c.bf16 %v17316_v1, %v17307_v62 }
 0x1ab   :  { %v4030_v4 = vand.u32 4294901760, %v4029_v0  ;;  %v4037_v23 = vand.u32 4294901760, %v4036_v55  ;;  %v17435_v2 = vpack.c.bf16 %v17326_v52, %v17318_v45  ;;  %v17442_v43 = vpack.c.bf16 %v17376_v12, %v17368_v29  ;;  %13832 = vmatpush3.bf16.msra.mxu1 %v17282_v42  ;;  %11718 = vmatmul.mubr.f32.vlgmr.msra.gmra.mrb[4].mxu0 %v17153_v31 }
 0x1ac   :  { %21316 = vst [vmem:[#allocation86_spill] sm:$0xff] %v17424_v5  ;;  %21317 = vst [vmem:[#allocation87_spill] sm:$0xff] %v17431_v28  ;;  %v4044_v56 = vand.u32 4294901760, %v4043_v35  ;;  %v17445_v46 = vpack.c.bf16 %v4013_v60, %v17381_v13  ;;  %v17448_v55 = vpack.c.bf16 %v4027_v17, %v4020_v63  ;;  %v17450_v8 = vpack.c.bf16 %v4041_v61, %v4034_v20  ;;  %v21352_v61 = vld [vmem:[#allocation63_spill] sm:$0xff]  ;;  %v21353_v35 = vld [vmem:[#allocation64_spill] sm:$0xff] }
 0x1ad   :  { %21318 = vst [vmem:[#allocation88_spill] sm:$0xff] %v17435_v2  ;;  %v17438_v0 = vpack.c.bf16 %v4030_v4, %v4023_v51  ;;  %21319 = vst [vmem:[#allocation89_spill] sm:$0xff] %v17442_v43  ;;  %v21323_v30 = vand.u32 4294901760, %v17293_v6  ;;  %v21324_v2 = vand.u32 4294901760, %v17298_v34  ;;  %v21326_v4 = vand.u32 4294901760, %v17302_v18  ;;  %13834 = vmatprep.subr.bf16.mxu1 %v16983_v10  ;;  %11720 = vmatprep.mubr.f32.mxu0 %v17227_v19 }
 0x1ae   :  { %21320 = vst [vmem:[#allocation90_spill] sm:$0xff] %v17445_v46  ;;  %21321 = vst [vmem:[#allocation91_spill] sm:$0xff] %v17448_v55  ;;  %v21327_v29 = vand.u32 4294901760, %v17304_v38  ;;  %v17466_v42 = vpack.c.bf16 %v4044_v56, %v4037_v23  ;;  %v21330_v13 = vand.u32 4294901760, %v17307_v62  ;;  %v21331_v6 = vand.u32 4294901760, %v17316_v1  ;;  %14072 = vmatpush3.bf16.msra.mxu0 %v16499_v36  ;;  %v21355_v56 = vld [vmem:[#allocation24_spill] sm:$0xff] }
 0x1af   :  { %21322 = vst [vmem:[#allocation92_spill] sm:$0xff] %v17450_v8  ;;  %v17456_v51 = vpack.c.bf16 %v21324_v2, %v21323_v30  ;;  %v21333_v34 = vand.u32 4294901760, %v17318_v45  ;;  %v21334_v18 = vand.u32 4294901760, %v17326_v52  ;;  %v17482_v38 = vpack.c.bf16 %v4000_v57, %v3993_v27  ;;  %14074 = vmatprep.subr.bf16.mxu0 %v16555_v59  ;;  %13836 = vmatpush3.bf16.msra.mxu1 %v16983_v10  ;;  %v21340_v10 = vld [vmem:[#allocation57_spill] sm:$0xff]  ;;  %v21343_v52 = vld [vmem:[#allocation23_spill] sm:$0xff]  ;;  %v21346_v27 = vld [vmem:[#allocation60_spill] sm:$0xff] }
 0x1b0   :  { %v17462_v12 = vpack.c.bf16 %v21327_v29, %v21326_v4  ;;  %21329 = vst [vmem:[#allocation95_spill] sm:$0xff] %v17466_v42  ;;  %v17472_v60 = vpack.c.bf16 %v21331_v6, %v21330_v13  ;;  %v17484_v17 = vpack.c.bf16 %v4014_v37, %v4007_v39  ;;  %v17486_v20 = vpack.c.bf16 %v4028_v49, %v4021_v11  ;;  %v21342_v45 = vld [vmem:[#allocation69_spill] sm:$0xff]  ;;  %v21348_v39 = vld [vmem:[#allocation27_spill] sm:$0xff]  ;;  %v21350_v11 = vld [vmem:[#allocation62_spill] sm:$0xff] }
 0x1b1   :  { %21325 = vst [vmem:[#allocation93_spill] sm:$0xff] %v17456_v51  ;;  %v17478_v63 = vpack.c.bf16 %v21334_v18, %v21333_v34  ;;  %21336 = vst [vmem:[#allocation98_spill] sm:$0xff] %v17482_v38  ;;  %v17489_v62 = vpack.c.bf16 %v4042_v41, %v4035_v26  ;;  %13838 = vmatprep.subr.bf16.mxu1 %v16996_v24  ;;  %11721 = vmatmul.mubr.f32.gmra.mrb[6].mxu0 %v17190_v22  ;;  %v21341_v26 = vld [vmem:[#allocation58_spill] sm:$0xff]  ;;  %v21345_v41 = vld [vmem:[#allocation59_spill] sm:$0xff]  ;;  %v21356_v30 = vand.u32 4294901760, %v21355_v56 }
 0x1b2   :  { %21328 = vst [vmem:[#allocation94_spill] sm:$0xff] %v17462_v12  ;;  %21332 = vst [vmem:[#allocation96_spill] sm:$0xff] %v17472_v60  ;;  %14076 = vmatpush3.bf16.msra.mxu0 %v16555_v59  ;;  %11755 = vmatprep.mubr.f32.mxu0 %v17238_v33  ;;  %v13849_v1 = vpack.c.bf16 %v21341_v26, %v21340_v10  ;;  %v13853_v57 = vpack.c.bf16 %v21346_v27, %v21345_v41  ;;  %v21349_v37 = vld [vmem:[#allocation61_spill] sm:$0xff]  ;;  %v21354_v2 = vld [vmem:[#allocation43_spill] sm:$0xff] }
 0x1b3   :  { %21335 = vst [vmem:[#allocation97_spill] sm:$0xff] %v17478_v63  ;;  %21337 = vst [vmem:[#allocation99_spill] sm:$0xff] %v17484_v17  ;;  %14078 = vmatprep.subr.bf16.mxu0 %v16586_v3  ;;  %13840 = vmatpush3.bf16.msra.mxu1 %v16996_v24  ;;  %v21344_v24 = vld [vmem:[#allocation75_spill] sm:$0xff]  ;;  %v13857_v49 = vpack.c.bf16 %v21350_v11, %v21349_v37  ;;  %v13861_v23 = vpack.c.bf16 %v21353_v35, %v21352_v61  ;;  %v21359_v13 = vld [vmem:[#allocation30_spill] sm:$0xff] }
 0x1b4   :  { %21338 = vst [vmem:[#allocation100_spill] sm:$0xff] %v17486_v20  ;;  %21339 = vst [vmem:[#allocation101_spill] sm:$0xff] %v17489_v62  ;;  %13842 = vmatprep.subr.bf16.mxu1 %v16998_v9  ;;  %v21360_v6 = vand.u32 4294901760, %v21359_v13  ;;  %v21361_v34 = vld [vmem:[#allocation31_spill] sm:$0xff]  ;;  %v21364_v62 = vld [vmem:[#allocation76_spill] sm:$0xff] }
 0x1b5   :  { %v21362_v18 = vand.u32 4294901760, %v21361_v34  ;;  %v21365_v56 = vld [vmem:[#allocation32_spill] sm:$0xff]  ;;  %v21369_v13 = vld [vmem:[#allocation55_spill] sm:$0xff]  ;;  %v21370_v34 = vld [vmem:[#allocation77_spill] sm:$0xff] }
 0x1b6   :  { %14080 = vmatpush3.bf16.msra.mxu0 %v16586_v3 }
 0x1b7   :  { %14082 = vmatprep.subr.bf16.mxu0 %v16626_v32  ;;  %13844 = vmatpush3.bf16.msra.mxu1 %v16998_v9  ;;  %v21347_v9 = vld [vmem:[#allocation70_spill] sm:$0xff] }
 0x1b8   :  { %13846 = vmatprep.subr.bf16.mxu1 %v17002_v48 }
 0x1ba   :  { %14084 = vmatpush3.bf16.msra.mxu0 %v16626_v32  ;;  %11452 = vmatmul.mubr.f32.vlgmr.msra.gmra.mrb[0].mxu1 %v21342_v45 }
 0x1bb   :  { %14086 = vmatprep.subr.bf16.mxu0 %v21343_v52  ;;  %11454 = vmatprep.mubr.f32.mxu1 %v21344_v24 }
 0x1bc   :  { %13848 = vmatpush3.bf16.msra.mxu1 %v17002_v48  ;;  %v21351_v48 = vld [vmem:[#allocation29_spill] sm:$0xff] }
 0x1bd   :  { %13850 = vmatprep.subr.bf16.mxu1 %v13849_v1 }
 0x1be   :  { %14088 = vmatpush3.bf16.msra.mxu0 %v21343_v52  ;;  %11455 = vmatmul.mubr.f32.gmra.mrb[2].mxu1 %v21347_v9 }
 0x1bf   :  { %14090 = vmatprep.subr.bf16.mxu0 %v21348_v39  ;;  %11489 = vmatprep.mubr.f32.mxu1 %v17221_v14  ;;  %v21357_v14 = vld [vmem:[#allocation26_spill] sm:$0xff] }
 0x1c0   :  { %13852 = vmatpush3.bf16.msra.mxu1 %v13849_v1  ;;  %v21358_v4 = vand.u32 4294901760, %v21357_v14  ;;  %v14105_v1 = vpack.c.bf16 %v21362_v18, %v21360_v6  ;;  %v21373_v18 = vld [vmem:[#allocation35_spill] sm:$0xff] }
 0x1c1   :  { %13854 = vmatprep.subr.bf16.mxu1 %v13853_v57 }
 0x1c2   :  { %14092 = vmatpush3.bf16.msra.mxu0 %v21348_v39  ;;  %v14101_v29 = vpack.c.bf16 %v21358_v4, %v21356_v30  ;;  %v21367_v30 = vld [vmem:[#allocation33_spill] sm:$0xff] }
 0x1c3   :  { %14094 = vmatprep.subr.bf16.mxu0 %v21351_v48  ;;  %v21368_v14 = vand.u32 4294901760, %v21367_v30  ;;  %v21378_v30 = vld [vmem:[#allocation37_spill] sm:$0xff] }
 0x1c4   :  { %13856 = vmatpush3.bf16.msra.mxu1 %v13853_v57  ;;  %v21363_v57 = vld [vmem:[#allocation54_spill] sm:$0xff] }
 0x1c5   :  { %13858 = vmatprep.subr.bf16.mxu1 %v13857_v49 }
 0x1c6   :  { %14096 = vmatpush3.bf16.msra.mxu0 %v21351_v48 }
 0x1c7   :  { %14098 = vmatprep.subr.bf16.mxu0 %v21354_v2 }
 0x1c8   :  { %13860 = vmatpush3.bf16.msra.mxu1 %v13857_v49  ;;  %v21366_v49 = vand.u32 4294901760, %v21365_v56  ;;  %v21375_v56 = vld [vmem:[#allocation56_spill] sm:$0xff] }
 0x1c9   :  { %13862 = vmatprep.subr.bf16.mxu1 %v13861_v23 }
 0x1ca   :  { %14100 = vmatpush3.bf16.msra.mxu0 %v21354_v2  ;;  %v14109_v4 = vpack.c.bf16 %v21368_v14, %v21366_v49  ;;  %v21379_v14 = vand.u32 4294901760, %v21378_v30  ;;  %v21391_v30 = vld [vmem:[#allocation41_spill] sm:$0xff] }
 0x1cb   :  { %14102 = vmatprep.subr.bf16.mxu0 %v14101_v29 }
 0x1cc   :  { %13864 = vmatpush3.bf16.msra.mxu1 %v13861_v23  ;;  %v21371_v23 = vld [vmem:[#allocation34_spill] sm:$0xff] }
 0x1cd   :  { %13866 = vmatprep.subr.bf16.mxu1 %v21363_v57  ;;  %11756 = vmatmul.mubr.f32.vlgmr.msra.gmra.mrb[4].mxu0 %v21364_v62  ;;  %v21372_v6 = vand.u32 4294901760, %v21371_v23  ;;  %v21381_v23 = vld [vmem:[#allocation38_spill] sm:$0xff] }
 0x1ce   :  { %11758 = vmatprep.mubr.f32.mxu0 %v17248_v44  ;;  %14104 = vmatpush3.bf16.msra.mxu0 %v14101_v29  ;;  %v21374_v29 = vand.u32 4294901760, %v21373_v18 }
 0x1cf   :  { %14106 = vmatprep.subr.bf16.mxu0 %v14105_v1 }
 0x1d0   :  { %13868 = vmatpush3.bf16.msra.mxu1 %v21363_v57  ;;  %v14113_v20 = vpack.c.bf16 %v21374_v29, %v21372_v6  ;;  %v21376_v57 = vld [vmem:[#allocation36_spill] sm:$0xff]  ;;  %v21382_v6 = vand.u32 4294901760, %v21381_v23  ;;  %v21397_v23 = vld [vmem:[#allocation47_spill] sm:$0xff] }
 0x1d1   :  { %13870 = vmatprep.subr.bf16.mxu1 %v21369_v13  ;;  %11759 = vmatmul.mubr.f32.gmra.mrb[6].mxu0 %v21370_v34  ;;  %v21377_v49 = vand.u32 4294901760, %v21376_v57  ;;  %v21388_v57 = vld [vmem:[#allocation22_spill] sm:$0xff] }
 0x1d2   :  { %14108 = vmatpush3.bf16.msra.mxu0 %v14105_v1  ;;  %11793 = vmatprep.mubr.f32.mxu0 %v17144_v54  ;;  %v21380_v1 = vld [vmem:[#allocation20_spill] sm:$0xff] }
 0x1d3   :  { %14110 = vmatprep.subr.bf16.mxu0 %v14109_v4  ;;  %v14117_v17 = vpack.c.bf16 %v21379_v14, %v21377_v49 }
 0x1d4   :  { %13872 = vmatpush3.bf16.msra.mxu1 %v21369_v13  ;;  %v21383_v13 = vld [vmem:[#allocation39_spill] sm:$0xff] }
 0x1d5   :  { %13874 = vmatprep.subr.bf16.mxu1 %v21375_v56  ;;  %v21384_v18 = vand.u32 4294901760, %v21383_v13 }
 0x1d6   :  { %14112 = vmatpush3.bf16.msra.mxu0 %v14109_v4  ;;  %v21385_v4 = vld [vmem:[#allocation21_spill] sm:$0xff] }
 0x1d7   :  { %14114 = vmatprep.subr.bf16.mxu0 %v14113_v20  ;;  %v14121_v29 = vpack.c.bf16 %v21384_v18, %v21382_v6  ;;  %v21398_v6 = vld [vmem:[#allocation45_spill] sm:$0xff]  ;;  %v21400_v18 = vld [vmem:[#allocation46_spill] sm:$0xff] }
 0x1d8   :  { %13876 = vmatpush3.bf16.msra.mxu1 %v21375_v56  ;;  %v21399_v13 = vand.u32 4294901760, %v21398_v6 }
 0x1d9   :  { %13878 = vmatprep.subr.bf16.mxu1 %v21380_v1 }
 0x1da   :  { %14116 = vmatpush3.bf16.msra.mxu0 %v14113_v20  ;;  %v21386_v20 = vand.u32 4294901760, %v16856_v15  ;;  %v21394_v15 = vld [vmem:[#allocation28_spill] sm:$0xff] }
 0x1db   :  { %11490 = vmatmul.mubr.f32.vlgmr.msra.gmra.mrb[0].mxu1 %v17153_v31  ;;  %14118 = vmatprep.subr.bf16.mxu0 %v14117_v17  ;;  %v21387_v31 = vand.u32 4294901760, %v16861_v53  ;;  %v21395_v53 = vld [vmem:[#allocation42_spill] sm:$0xff] }
 0x1dc   :  { %11492 = vmatprep.mubr.f32.mxu1 %v17227_v19  ;;  %13880 = vmatpush3.bf16.msra.mxu1 %v21380_v1  ;;  %v21389_v19 = vld [vmem:[#allocation40_spill] sm:$0xff] }
 0x1dd   :  { %13882 = vmatprep.subr.bf16.mxu1 %v21385_v4  ;;  %v14125_v56 = vpack.c.bf16 %v21387_v31, %v21386_v20  ;;  %v21390_v49 = vand.u32 4294901760, %v21389_v19  ;;  %v21402_v31 = vand.u32 4294901760, %v21340_v10 }
 0x1de   :  { %14120 = vmatpush3.bf16.msra.mxu0 %v14117_v17  ;;  %v21392_v17 = vand.u32 4294901760, %v21391_v30  ;;  %v21405_v30 = vand.u32 4294901760, %v21346_v27 }
 0x1df   :  { %11493 = vmatmul.mubr.f32.gmra.mrb[2].mxu1 %v17190_v22  ;;  %14122 = vmatprep.subr.bf16.mxu0 %v14121_v29  ;;  %v21393_v22 = vld [vmem:[#allocation25_spill] sm:$0xff] }
 0x1e0   :  { %13884 = vmatpush3.bf16.msra.mxu1 %v21385_v4  ;;  %11527 = vmatprep.mubr.f32.mxu1 %v17238_v33  ;;  %v14129_v14 = vpack.c.bf16 %v21392_v17, %v21390_v49  ;;  %v21396_v33 = vld [vmem:[#allocation44_spill] sm:$0xff]  ;;  %v21404_v49 = vand.u32 4294901760, %v21345_v41  ;;  %v21409_v41 = vand.u32 4294901760, %v21353_v35 }
 0x1e1   :  { %13886 = vmatprep.subr.bf16.mxu1 %v21388_v57 }
 0x1e2   :  { %14124 = vmatpush3.bf16.msra.mxu0 %v14121_v29  ;;  %v21401_v29 = vand.u32 4294901760, %v21400_v18  ;;  %v13917_v17 = vpack.c.bf16 %v21405_v30, %v21404_v49  ;;  %v21416_v18 = vld [vmem:[#allocation51_spill] sm:$0xff] }
 0x1e3   :  { %14126 = vmatprep.subr.bf16.mxu0 %v14125_v56  ;;  %v21417_v35 = vand.u32 4294901760, %v21416_v18 }
 0x1e4   :  { %13888 = vmatpush3.bf16.msra.mxu1 %v21388_v57  ;;  %v13909_v20 = vpack.c.bf16 %v21401_v29, %v21399_v13  ;;  %v21414_v13 = vld [vmem:[#allocation50_spill] sm:$0xff] }
 0x1e5   :  { %13890 = vmatprep.subr.bf16.mxu1 %v21393_v22 }
 0x1e6   :  { %14128 = vmatpush3.bf16.msra.mxu0 %v14125_v56  ;;  %v21403_v56 = vand.u32 4294901760, %v21341_v26  ;;  %v21408_v26 = vand.u32 4294901760, %v21352_v61  ;;  %v21415_v61 = vand.u32 4294901760, %v21414_v13 }
 0x1e7   :  { %14130 = vmatprep.subr.bf16.mxu0 %v14129_v14 }
 0x1e8   :  { %13892 = vmatpush3.bf16.msra.mxu1 %v21393_v22  ;;  %v13913_v19 = vpack.c.bf16 %v21403_v56, %v21402_v31  ;;  %v13925_v27 = vpack.c.bf16 %v21409_v41, %v21408_v26  ;;  %v13933_v29 = vpack.c.bf16 %v21417_v35, %v21415_v61  ;;  %v21420_v56 = vld [vmem:[#allocation53_spill] sm:$0xff]  ;;  %v17712_v35 = vld [vmem:[#allocation2 + $0x8] sm:$0xff] }
 0x1e9   :  { %13894 = vmatprep.subr.bf16.mxu1 %v21394_v15  ;;  %21424 = vst [vmem:[#allocation69_spill] sm:$0xff] %v17712_v35  ;;  %vm2373_vm5 = vcmp.gt.f32.partialorder %v17712_v35, 0.0 }
 0x1ea   :  { %14132 = vmatpush3.bf16.msra.mxu0 %v14129_v14 }
 0x1eb   :  { %14134 = vmatprep.subr.bf16.mxu0 %v16499_v36 }
 0x1ec   :  { %13896 = vmatpush3.bf16.msra.mxu1 %v21394_v15 }
 0x1ed   :  { %13898 = vmatprep.subr.bf16.mxu1 %v21395_v53  ;;  %11794 = vmatmul.mubr.f32.vlgmr.msra.gmra.mrb[4].mxu0 %v21342_v45 }
 0x1ee   :  { %11796 = vmatprep.mubr.f32.mxu0 %v21344_v24  ;;  %14136 = vmatpush3.bf16.msra.mxu0 %v16499_v36 }
 0x1ef   :  { %14138 = vmatprep.subr.bf16.mxu0 %v16555_v59 }
 0x1f0   :  { %13900 = vmatpush3.bf16.msra.mxu1 %v21395_v53 }
 0x1f1   :  { %13902 = vmatprep.subr.bf16.mxu1 %v21396_v33  ;;  %11797 = vmatmul.mubr.f32.gmra.mrb[6].mxu0 %v21347_v9 }
 0x1f2   :  { %14140 = vmatpush3.bf16.msra.mxu0 %v16555_v59  ;;  %11831 = vmatprep.mubr.f32.mxu0 %v17144_v54 }
 0x1f3   :  { %14142 = vmatprep.subr.bf16.mxu0 %v16586_v3 }
 0x1f4   :  { %13904 = vmatpush3.bf16.msra.mxu1 %v21396_v33 }
 0x1f5   :  { %13906 = vmatprep.subr.bf16.mxu1 %v21397_v23 }
 0x1f6   :  { %14144 = vmatpush3.bf16.msra.mxu0 %v16586_v3 }
 0x1f7   :  { %14146 = vmatprep.subr.bf16.mxu0 %v16626_v32 }
 0x1f8   :  { %13908 = vmatpush3.bf16.msra.mxu1 %v21397_v23 }
 0x1f9   :  { %13910 = vmatprep.subr.bf16.mxu1 %v13909_v20 }
 0x1fa   :  { %14148 = vmatpush3.bf16.msra.mxu0 %v16626_v32 }
 0x1fb   :  { %11528 = vmatmul.mubr.f32.vlgmr.msra.gmra.mrb[0].mxu1 %v21364_v62  ;;  %14150 = vmatprep.subr.bf16.mxu0 %v21343_v52  ;;  %v21406_v62 = vand.u32 4294901760, %v21349_v37  ;;  %v21410_v37 = vld [vmem:[#allocation48_spill] sm:$0xff] }
 0x1fc   :  { %11530 = vmatprep.mubr.f32.mxu1 %v17248_v44  ;;  %13912 = vmatpush3.bf16.msra.mxu1 %v13909_v20  ;;  %v21407_v44 = vand.u32 4294901760, %v21350_v11  ;;  %v21411_v11 = vand.u32 4294901760, %v21410_v37  ;;  %v21418_v20 = vld [vmem:[#allocation52_spill] sm:$0xff] }
 0x1fd   :  { %13914 = vmatprep.subr.bf16.mxu1 %v13913_v19  ;;  %v21419_v31 = vand.u32 4294901760, %v21418_v20 }
 0x1fe   :  { %14152 = vmatpush3.bf16.msra.mxu0 %v21343_v52  ;;  %v13921_v10 = vpack.c.bf16 %v21407_v44, %v21406_v62 }
 0x1ff   :  { %11531 = vmatmul.mubr.f32.gmra.mrb[2].mxu1 %v21370_v34  ;;  %14154 = vmatprep.subr.bf16.mxu0 %v21348_v39  ;;  %v21412_v34 = vld [vmem:[#allocation49_spill] sm:$0xff] }
 0x200   :  { %13916 = vmatpush3.bf16.msra.mxu1 %v13913_v19  ;;  %11565 = vmatprep.mubr.f32.mxu1 %v17144_v54  ;;  %v21413_v14 = vand.u32 4294901760, %v21412_v34  ;;  %v21421_v19 = vand.u32 4294901760, %v21420_v56  ;;  %v17709_v34 = vld [vmem:[#allocation2] sm:$0xff] }
 0x201   :  { %13918 = vmatprep.subr.bf16.mxu1 %v13917_v17  ;;  %21423 = vst [vmem:[#allocation58_spill] sm:$0xff] %v17709_v34  ;;  %vm2372_vm1 = vcmp.gt.f32.partialorder %v17709_v34, 0.0 }
 0x202   :  { %14156 = vmatpush3.bf16.msra.mxu0 %v21348_v39  ;;  %v13929_v6 = vpack.c.bf16 %v21413_v14, %v21411_v11  ;;  %v13937_v49 = vpack.c.bf16 %v21421_v19, %v21419_v31  ;;  %v17714_v31 = vld [vmem:[#allocation2 + $0x10] sm:$0xff] }
 0x203   :  { %14158 = vmatprep.subr.bf16.mxu0 %v21351_v48  ;;  %21425 = vst [vmem:[#allocation23_spill] sm:$0xff] %v17714_v31  ;;  %vm2374_vm4 = vcmp.gt.f32.partialorder %v17714_v31, 0.0 }
 0x204   :  { %13920 = vmatpush3.bf16.msra.mxu1 %v13917_v17 }
 0x205   :  { %13922 = vmatprep.subr.bf16.mxu1 %v13921_v10 }
 0x206   :  { %14160 = vmatpush3.bf16.msra.mxu0 %v21351_v48 }
 0x207   :  { %14162 = vmatprep.subr.bf16.mxu0 %v21354_v2 }
 0x208   :  { %13924 = vmatpush3.bf16.msra.mxu1 %v13921_v10 }
 0x209   :  { %13926 = vmatprep.subr.bf16.mxu1 %v13925_v27 }
 0x20a   :  { %14164 = vmatpush3.bf16.msra.mxu0 %v21354_v2 }
 0x20c   :  { %13928 = vmatpush3.bf16.msra.mxu1 %v13925_v27 }
 0x20d   :  { %13930 = vmatprep.subr.bf16.mxu1 %v13929_v6  ;;  %11832 = vmatmul.mubr.f32.vlgmr.msra.gmra.mrb[4].mxu0 %v21342_v45 }
 0x20e   :  { %11834 = vmatprep.mubr.f32.mxu0 %v21344_v24 }
 0x210   :  { %13932 = vmatpush3.bf16.msra.mxu1 %v13929_v6 }
 0x211   :  { %13934 = vmatprep.subr.bf16.mxu1 %v13933_v29  ;;  %11835 = vmatmul.mubr.f32.gmra.mrb[6].mxu0 %v21347_v9 }
 0x214   :  { %13936 = vmatpush3.bf16.msra.mxu1 %v13933_v29 }
 0x215   :  { %13938 = vmatprep.subr.bf16.mxu1 %v13937_v49 }
 0x218   :  { %13940 = vmatpush3.bf16.msra.mxu1 %v13937_v49 }
 0x219   :  { %13942 = vmatprep.subr.bf16.mxu1 %v21380_v1 }
 0x21b   :  { %11566 = vmatmul.mubr.f32.vlgmr.msra.gmra.mrb[0].mxu1 %v21342_v45 }
 0x21c   :  { %11568 = vmatprep.mubr.f32.mxu1 %v21344_v24  ;;  %13944 = vmatpush3.bf16.msra.mxu1 %v21380_v1 }
 0x21d   :  { %13946 = vmatprep.subr.bf16.mxu1 %v21385_v4 }
 0x21f   :  { %11569 = vmatmul.mubr.f32.gmra.mrb[2].mxu1 %v21347_v9 }
 0x220   :  { %13948 = vmatpush3.bf16.msra.mxu1 %v21385_v4  ;;  %11603 = vmatprep.mubr.f32.mxu1 %v17144_v54 }
 0x221   :  { %13950 = vmatprep.subr.bf16.mxu1 %v21388_v57 }
 0x224   :  { %13952 = vmatpush3.bf16.msra.mxu1 %v21388_v57  ;;  %v149_v57 = vld [vmem:[#allocation5 + $0x18] sm:$0xff] }
 0x225   :  { %13954 = vmatprep.subr.bf16.mxu1 %v21393_v22 }
 0x228   :  { %13956 = vmatpush3.bf16.msra.mxu1 %v21393_v22 }
 0x229   :  { %13958 = vmatprep.subr.bf16.mxu1 %v21394_v15 }
 0x22c   :  { %13960 = vmatpush3.bf16.msra.mxu1 %v21394_v15 }
 0x22d   :  { %13962 = vmatprep.subr.bf16.mxu1 %v21395_v53 }
 0x230   :  { %13964 = vmatpush3.bf16.msra.mxu1 %v21395_v53 }
 0x231   :  { %13966 = vmatprep.subr.bf16.mxu1 %v21396_v33 }
 0x234   :  { %13968 = vmatpush3.bf16.msra.mxu1 %v21396_v33 }
 0x235   :  { %13970 = vmatprep.subr.bf16.mxu1 %v21397_v23 }
 0x238   :  { %13972 = vmatpush3.bf16.msra.mxu1 %v21397_v23 }
 0x239   :  { %13974 = vmatprep.subr.bf16.mxu1 %v16499_v36 }
 0x23b   :  { %11604 = vmatmul.mubr.f32.vlgmr.msra.gmra.mrb[0].mxu1 %v21342_v45  ;;  %v147_v45 = vld [vmem:[#allocation5 + $0x8] sm:$0xff] }
 0x23c   :  { %11606 = vmatprep.mubr.f32.mxu1 %v21344_v24  ;;  %13976 = vmatpush3.bf16.msra.mxu1 %v16499_v36  ;;  %v17692_v36 = vld [vmem:[%s20740_s3] sm:$0xff] }
 0x23d   :  { %13978 = vmatprep.subr.bf16.mxu1 %v16555_v59 }
 0x23f   :  { %11607 = vmatmul.mubr.f32.gmra.mrb[2].mxu1 %v21347_v9 }
 0x240   :  { %13980 = vmatpush3.bf16.msra.mxu1 %v16555_v59  ;;  %11641 = vmatprep.mubr.f32.mxu1 %v17288_v58  ;;  %v17697_v59 = vld [vmem:[%s20740_s3 + $0x8] sm:$0xff] }
 0x241   :  { %13982 = vmatprep.subr.bf16.mxu1 %v16586_v3 }
 0x244   :  { %13984 = vmatpush3.bf16.msra.mxu1 %v16586_v3  ;;  %v2401_v3 = vand.u32 4294901760, %v17692_v36 }
 0x245   :  { %13986 = vmatprep.subr.bf16.mxu1 %v16626_v32 }
 0x246   :  { %v17843_v31 = vsub.f32 %v17692_v36, %v2401_v3 }
 0x248   :  { %13988 = vmatpush3.bf16.msra.mxu1 %v16626_v32  ;;  %v20898_v32 = vand.u32 4294901760, %v17697_v59 }
 0x249   :  { %13990 = vmatprep.subr.bf16.mxu1 %v21343_v52 }
 0x24a   :  { %v17705_v54 = vpack.c.bf16 %v20898_v32, %v2401_v3 }
 0x24c   :  { %13992 = vmatpush3.bf16.msra.mxu1 %v21343_v52  ;;  %21422 = vst [vmem:[#allocation57_spill] sm:$0xff] %v17705_v54  ;;  %v146_v52 = vld [vmem:[#allocation5] sm:$0xff] }
 0x24d   :  { %13994 = vmatprep.subr.bf16.mxu1 %v21348_v39 }
 0x250   :  { %13996 = vmatpush3.bf16.msra.mxu1 %v21348_v39 }
 0x251   :  { %13998 = vmatprep.subr.bf16.mxu1 %v21351_v48 }
 0x254   :  { %14000 = vmatpush3.bf16.msra.mxu1 %v21351_v48 }
 0x255   :  { %14002 = vmatprep.subr.bf16.mxu1 %v21354_v2 }
 0x258   :  { %14004 = vmatpush3.bf16.msra.mxu1 %v21354_v2  ;;  %v148_v2 = vld [vmem:[#allocation5 + $0x10] sm:$0xff] }
 0x259   :  { %14166 = vmatprep.subr.bf16.mxu1 %v17705_v54 }
 0x25b   :  { %11642 = vmatmul.mubr.f32.vlgmr.msra.gmra.mrb[4].mxu1 %v17273_v21 }
 0x25c   :  { %11644 = vmatprep.mubr.f32.mxu1 %v17300_v47  ;;  %14168 = vmatpush3.bf16.msra.mxu1 %v17705_v54 }
 0x25f   :  { %11645 = vmatmul.mubr.f32.gmra.mrb[6].mxu1 %v17290_v7 }
 0x2e0   :  { %v11833_v21 = vpop.f32.mrb[4].mxu0 }
 0x2e1   :  { %v2338_v58 = vpop.f32.mrb[5].mxu0 }
 0x2e4   :  { %v11836_v7 = vpop.f32.mrb[6].mxu0 }
 0x2e5   :  { %v2350_v47 = vpop.f32.mrb[7].mxu0 }
 0x30e   :  { %v11605_v24 = vpop.f32.mrb[0].mxu1 }
 0x30f   :  { %v1578_v9 = vmul.f32 %v11605_v24, %v147_v45  ;;  %v1555_v39 = vpop.f32.mrb[1].mxu1 }
 0x310   :  { %v1577_v48 = vmul.f32 %v1555_v39, %v146_v52 }
 0x312   :  { %v1581_v1 = vadd.f32 %v1578_v9, %v1577_v48  ;;  %v11608_v4 = vpop.f32.mrb[2].mxu1  ;;  %v17723_v9 = vld [vmem:[#allocation2 + $0x18] sm:$0xff] }
 0x313   :  { %v1567_v22 = vpop.f32.mrb[3].mxu1  ;;  %v1580_v53 = vmul.f32 %v11608_v4, %v149_v57  ;;  %21426 = vst [vmem:[#allocation75_spill] sm:$0xff] %v17723_v9  ;;  %vm2375_vm8 = vcmp.gt.f32.partialorder %v17723_v9, 0.0  ;;  %v153_v4 = vld [vmem:[%s20740_s3 + $0x18] sm:$0xff]  ;;  %v20909_v9 = vand.u32 4294901760, %v17843_v31 }
 0x314   :  { %v1579_v15 = vmul.f32 %v1567_v22, %v148_v2  ;;  %v2410_v22 = vand.u32 4294901760, %v153_v4 }
 0x316   :  { %v1582_v33 = vadd.f32 %v1581_v1, %v1579_v15  ;;  %v152_v1 = vld [vmem:[%s20740_s3 + $0x10] sm:$0xff] }
 0x317   :  { %v2407_v57 = vand.u32 4294901760, %v152_v1 }
 0x318   :  { %v1583_v23 = vadd.f32 %v1582_v33, %v1580_v53  ;;  %v154_v53 = vld [vmem:[%s20740_s3 + $0x20] sm:$0xff]  ;;  %v155_v33 = vld [vmem:[%s20740_s3 + $0x28] sm:$0xff] }
 0x319   :  { %v17747_v15 = vpack.c.bf16 %v2410_v22, %v2407_v57  ;;  %v17860_v3 = vsub.f32 %v152_v1, %v2407_v57 }
 0x31a   :  { %v1584_v30 = vrot.slane %v1583_v23, 4 }
 0x31b   :  { %21427 = vst [vmem:[#allocation59_spill] sm:$0xff] %v17747_v15  ;;  %14170 = vmatprep.subr.bf16.mxu1 %v17747_v15  ;;  %v20910_v35 = vand.u32 4294901760, %v17860_v3 }
 0x31c   :  { %v1585_v17 = vadd.f32 %v1584_v30, %v1583_v23  ;;  %14172 = vmatpush3.bf16.msra.mxu1 %v17747_v15  ;;  %v2413_v23 = vand.u32 4294901760, %v154_v53  ;;  %v2416_v30 = vand.u32 4294901760, %v155_v33 }
 0x31e   :  { %v1586_v62 = vrot.slane %v1585_v17, 2  ;;  %v17877_v57 = vsub.f32 %v155_v33, %v2416_v30 }
 0x320   :  { %v1587_v44 = vadd.f32 %v1586_v62, %v1585_v17  ;;  %v17757_v17 = vpack.c.bf16 %v2416_v30, %v2413_v23  ;;  %v156_v62 = vld [vmem:[%s20740_s3 + $0x30] sm:$0xff] }
 0x322   :  { %v1588_v10 = vrot.slane %v1587_v44, 1  ;;  %21428 = vst [vmem:[#allocation60_spill] sm:$0xff] %v17757_v17  ;;  %14174 = vmatprep.subr.bf16.mxu1 %v17757_v17 }
 0x323   :  { %14176 = vmatpush3.bf16.msra.mxu1 %v17757_v17 }
 0x324   :  { %v1589_v26 = vadd.f32 %v1588_v10, %v1587_v44  ;;  %v157_v44 = vld [vmem:[%s20740_s3 + $0x38] sm:$0xff]  ;;  %v2419_v10 = vand.u32 4294901760, %v156_v62 }
 0x326   :  { %v17890_v33 = vsub.f32 %v156_v62, %v2419_v10 }
 0x32e   :  { %v11643_v41 = vpop.f32.mrb[4].mxu1 }
 0x32f   :  { %v1688_v27 = vadd.f32 %v11643_v41, %v1589_v26  ;;  %v1677_v37 = vpop.f32.mrb[5].mxu1 }
 0x330   :  { %v1678_v11 = vadd.f32 %v1677_v37, %v1589_v26  ;;  %v17777_v37 = vld [vmem:[%s20740_s3 + $0x48] sm:$0xff] }
 0x331   :  { %v15702_v14 = vadd.f32 %v11833_v21, %v1688_v27  ;;  %v17772_v27 = vld [vmem:[%s20740_s3 + $0x40] sm:$0xff] }
 0x332   :  { %v15704_v6 = vadd.f32 %v2338_v58, %v1678_v11  ;;  %v11646_v13 = vpop.f32.mrb[6].mxu1  ;;  %v2425_v11 = vand.u32 4294901760, %v17772_v27 }
 0x333   :  { %v1708_v61 = vadd.f32 %v11646_v13, %v1589_v26  ;;  %v1697_v18 = vpop.f32.mrb[7].mxu1  ;;  %v2365_v56 = vmul.f32 0.2, %v15702_v14  ;;  %vm2361_vm3 = vcmp.ge.f32.partialorder %v15702_v14, 0.0  ;;  %v17788_v13 = vld [vmem:[%s20740_s3 + $0x50] sm:$0xff] }
 0x334   :  { %v1698_v29 = vadd.f32 %v1697_v18, %v1589_v26  ;;  %vm2360_vm2 = vcmp.ge.f32.partialorder %v15704_v6, 0.0  ;;  %v2364_v20 = vmul.f32 0.2, %v15704_v6  ;;  %v2422_v26 = vand.u32 4294901760, %v157_v44  ;;  %v17798_v18 = vld [vmem:[%s20740_s3 + $0x60] sm:$0xff] }
 0x335   :  { %v15706_v19 = vadd.f32 %v11836_v7, %v1708_v61  ;;  %v2369_v52 = vsel %vm2361_vm3, %v15702_v14, %v2365_v56  ;;  %v2428_v14 = vand.u32 4294901760, %v17777_v37  ;;  %v17793_v61 = vld [vmem:[%s20740_s3 + $0x58] sm:$0xff]  ;;  %v17806_v56 = vld [vmem:[%s20740_s3 + $0x68] sm:$0xff] }
 0x336   :  { %v15708_v49 = vadd.f32 %v2350_v47, %v1698_v29  ;;  %v2368_v45 = vsel %vm2360_vm2, %v15704_v6, %v2364_v20  ;;  %v17731_v39 = vsel %vm2373_vm5, %v2369_v52, -1e+30  ;;  %v17767_v41 = vpack.c.bf16 %v2422_v26, %v2419_v10 }
 0x337   :  { %v17718_v21 = vsel %vm2372_vm1, %v2368_v45, -1e+30  ;;  %v2367_v24 = vmul.f32 0.2, %v15706_v19  ;;  %vm2363_vm7 = vcmp.ge.f32.partialorder %v15706_v19, 0.0  ;;  %v17783_v6 = vpack.c.bf16 %v2428_v14, %v2425_v11  ;;  %v17817_v45 = vld [vmem:[%s20740_s3 + $0x78] sm:$0xff] }
 0x338   :  { %2380 = vmax.xlane.f32.xlu0 %v17718_v21  ;;  %vm2362_vm6 = vcmp.ge.f32.partialorder %v15708_v49, 0.0  ;;  %v2366_v58 = vmul.f32 0.2, %v15708_v49  ;;  %21429 = vst [vmem:[#allocation70_spill] sm:$0xff] %v17767_v41  ;;  %14178 = vmatprep.subr.bf16.mxu1 %v17767_v41  ;;  %v2431_v29 = vand.u32 4294901760, %v17788_v13  ;;  %v2434_v20 = vand.u32 4294901760, %v17793_v61 }
 0x339   :  { %v2371_v48 = vsel %vm2363_vm7, %v15706_v19, %v2367_v24  ;;  %14180 = vmatpush3.bf16.msra.mxu1 %v17767_v41  ;;  %21430 = vst [vmem:[#allocation27_spill] sm:$0xff] %v17783_v6  ;;  %v20901_v19 = vand.u32 4294901760, %v17798_v18  ;;  %v17905_v62 = vsub.f32 %v17777_v37, %v2428_v14  ;;  %vm9990_vm7 = vcmask 261120  }
 0x33a   :  { %v2370_v7 = vsel %vm2362_vm6, %v15708_v49, %v2366_v58  ;;  %v17738_v2 = vsel %vm2375_vm8, %v2371_v48, -1e+30  ;;  %14182 = vmatprep.subr.bf16.mxu1 %v17783_v6  ;;  %v17812_v49 = vld [vmem:[%s20740_s3 + $0x70] sm:$0xff]  ;;  %v20900_v58 = vand.u32 4294901760, %v17806_v56  ;;  %v17821_v52 = vpack.c.bf16 %v2434_v20, %v2431_v29 }
 0x33b   :  { %v17727_v47 = vsel %vm2374_vm4, %v2370_v7, -1e+30  ;;  %v20905_v24 = vand.u32 4294901760, %v17812_v49  ;;  %v20904_v7 = vand.u32 4294901760, %v17817_v45  ;;  %v17919_v37 = vsub.f32 %v17788_v13, %v2431_v29 }
 0x33c   :  { %2384 = vmax.xlane.f32.xlu1 %v17727_v47  ;;  %2382 = vmax.xlane.f32.xlu0 %v17731_v39  ;;  %21431 = vst [vmem:[#allocation61_spill] sm:$0xff] %v17821_v52  ;;  %v17829_v48 = vpack.c.bf16 %v20900_v58, %v20901_v19  ;;  %v21434_v58 = vand.u32 4294901760, %v17697_v59 }
 0x33d   :  { %14184 = vmatpush3.bf16.msra.mxu1 %v17783_v6  ;;  %v17838_v32 = vpack.c.bf16 %v20904_v7, %v20905_v24  ;;  %v2525_v7 = vsub.f32 %v17843_v31, %v20909_v9  ;;  %v2539_v9 = vsub.f32 %v17860_v3, %v20910_v35 }
 0x33e   :  { %21432 = vst [vmem:[#allocation62_spill] sm:$0xff] %v17829_v48  ;;  %14186 = vmatprep.subr.bf16.mxu1 %v17821_v52  ;;  %v17848_v19 = vsub.f32 %v17697_v59, %v21434_v58  ;;  %v17862_v59 = vsub.f32 %v153_v4, %v2410_v22  ;;  %v17875_v4 = vsub.f32 %v154_v53, %v2413_v23 }
 0x33f   :  { %21433 = vst [vmem:[#allocation29_spill] sm:$0xff] %v17838_v32  ;;  %v2526_v58 = vand.u32 4294901760, %v2525_v7  ;;  %v2540_v22 = vand.u32 4294901760, %v2539_v9  ;;  %v17892_v23 = vsub.f32 %v157_v44, %v2422_v26  ;;  %v20915_v26 = vand.u32 4294901760, %v17905_v62 }
 0x340   :  { %2386 = vmax.xlane.f32.xlu1 %v17738_v2  ;;  %v20924_v34 = vand.u32 4294901760, %v17848_v19  ;;  %v20911_v38 = vand.u32 4294901760, %v17862_v59 }
 0x341   :  { %14188 = vmatpush3.bf16.msra.mxu1 %v17821_v52 }
 0x342   :  { %14190 = vmatprep.subr.bf16.mxu1 %v17829_v48  ;;  %v2532_v36 = vsub.f32 %v17848_v19, %v20924_v34  ;;  %v2546_v1 = vsub.f32 %v17862_v59, %v20911_v38  ;;  %v20913_v38 = vand.u32 4294901760, %v17892_v23 }
 0x344   :  { %v2533_v24 = vand.u32 4294901760, %v2532_v36  ;;  %v2547_v7 = vand.u32 4294901760, %v2546_v1  ;;  %v20912_v36 = vand.u32 4294901760, %v17875_v4  ;;  %v20914_v1 = vand.u32 4294901760, %v17890_v33 }
 0x345   :  { %14192 = vmatpush3.bf16.msra.mxu1 %v17829_v48 }
 0x346   :  { %14194 = vmatprep.subr.bf16.mxu1 %v17838_v32  ;;  %v17867_v63 = vpack.c.bf16 %v2533_v24, %v2526_v58  ;;  %v20923_v24 = vand.u32 4294901760, %v17877_v57  ;;  %v17882_v58 = vpack.c.bf16 %v2547_v7, %v2540_v22  ;;  %v2553_v35 = vsub.f32 %v17875_v4, %v20912_v36 }
 0x347   :  { %v2567_v7 = vsub.f32 %v17890_v33, %v20914_v1  ;;  %v17902_v36 = vsub.f32 %v17772_v27, %v2425_v11  ;;  %v2588_v27 = vsub.f32 %v17905_v62, %v20915_v26  ;;  %v17922_v11 = vsub.f32 %v17793_v61, %v2434_v20 }
 0x348   :  { %21435 = vst [vmem:[#allocation63_spill] sm:$0xff] %v17867_v63  ;;  %21436 = vst [vmem:[#allocation64_spill] sm:$0xff] %v17882_v58  ;;  %v2560_v53 = vsub.f32 %v17877_v57, %v20923_v24  ;;  %v2554_v9 = vand.u32 4294901760, %v2553_v35  ;;  %v2574_v35 = vsub.f32 %v17892_v23, %v20913_v38  ;;  %v21440_v61 = vand.u32 4294901760, %v17798_v18 }
 0x349   :  { %14196 = vmatpush3.bf16.msra.mxu1 %v17838_v32  ;;  %v2568_v44 = vand.u32 4294901760, %v2567_v7  ;;  %v20919_v10 = vand.u32 4294901760, %v17902_v36  ;;  %v2589_v7 = vand.u32 4294901760, %v2588_v27  ;;  %v20916_v38 = vand.u32 4294901760, %v17922_v11 }
 0x34a   :  { %14198 = vmatprep.subr.bf16.mxu1 %v17867_v63  ;;  %v2561_v30 = vand.u32 4294901760, %v2560_v53  ;;  %v2575_v53 = vand.u32 4294901760, %v2574_v35  ;;  %v20918_v35 = vand.u32 4294901760, %v17919_v37  ;;  %v17939_v29 = vsub.f32 %v17798_v18, %v21440_v61 }
 0x34b   :  { %v2602_v13 = vsub.f32 %v17922_v11, %v20916_v38  ;;  %v21441_v20 = vand.u32 4294901760, %v17806_v56  ;;  %v21443_v18 = vand.u32 4294901760, %v17812_v49 }
 0x34c   :  { %v17896_v22 = vpack.c.bf16 %v2561_v30, %v2554_v9  ;;  %v2581_v9 = vsub.f32 %v17902_v36, %v20919_v10  ;;  %v17924_v14 = vpack.c.bf16 %v2575_v53, %v2568_v44  ;;  %v2595_v26 = vsub.f32 %v17919_v37, %v20918_v35 }
 0x34d   :  { %v17944_v44 = vsub.f32 %v17806_v56, %v21441_v20  ;;  %v20917_v27 = vand.u32 4294901760, %v17939_v29  ;;  %v17956_v61 = vsub.f32 %v17812_v49, %v21443_v18  ;;  %v21444_v56 = vand.u32 4294901760, %v17817_v45 }
 0x34e   :  { %21437 = vst [vmem:[#allocation43_spill] sm:$0xff] %v17896_v22  ;;  %21438 = vst [vmem:[#allocation24_spill] sm:$0xff] %v17924_v14  ;;  %v2582_v30 = vand.u32 4294901760, %v2581_v9  ;;  %v2596_v53 = vand.u32 4294901760, %v2595_v26  ;;  %v2603_v9 = vand.u32 4294901760, %v2602_v13 }
 0x34f   :  { %v2609_v38 = vsub.f32 %v17939_v29, %v20917_v27  ;;  %v17961_v26 = vsub.f32 %v17817_v45, %v21444_v56 }
 0x350   :  { %v17928_v1 = vpack.c.bf16 %v2589_v7, %v2582_v30  ;;  %v20922_v30 = vand.u32 4294901760, %v17944_v44  ;;  %v17948_v7 = vpack.c.bf16 %v2603_v9, %v2596_v53  ;;  %v20920_v53 = vand.u32 4294901760, %v17956_v61 }
 0x351   :  { %v2610_v20 = vand.u32 4294901760, %v2609_v38  ;;  %v20921_v9 = vand.u32 4294901760, %v17961_v26  ;;  %v17980_v38 = vpack.c.bf16 %v17848_v19, %v17843_v31 }
 0x352   :  { %21439 = vst [vmem:[#allocation26_spill] sm:$0xff] %v17928_v1  ;;  %21442 = vst [vmem:[#allocation30_spill] sm:$0xff] %v17948_v7  ;;  %v2616_v13 = vsub.f32 %v17944_v44, %v20922_v30  ;;  %v2623_v49 = vsub.f32 %v17956_v61, %v20920_v53  ;;  %v17988_v53 = vpack.c.bf16 %v17877_v57, %v17875_v4 }
 0x353   :  { %v2630_v18 = vsub.f32 %v17961_v26, %v20921_v9  ;;  %21447 = vst [vmem:[#allocation76_spill] sm:$0xff] %v17980_v38 }
 0x354   :  { %v2617_v27 = vand.u32 4294901760, %v2616_v13  ;;  %v2624_v56 = vand.u32 4294901760, %v2623_v49  ;;  %v17984_v13 = vpack.c.bf16 %v17862_v59, %v17860_v3  ;;  %21449 = vst [vmem:[#allocation33_spill] sm:$0xff] %v17988_v53  ;;  %v18004_v49 = vpack.c.bf16 %v17944_v44, %v17939_v29 }
 0x355   :  { %v2631_v35 = vand.u32 4294901760, %v2630_v18  ;;  %v18008_v18 = vpack.c.bf16 %v17961_v26, %v17956_v61 }
 0x356   :  { %v17974_v45 = vpack.c.bf16 %v2617_v27, %v2610_v20  ;;  %21448 = vst [vmem:[#allocation32_spill] sm:$0xff] %v17984_v13  ;;  %v17992_v27 = vpack.c.bf16 %v17892_v23, %v17890_v33  ;;  %v18000_v20 = vpack.c.bf16 %v17922_v11, %v17919_v37  ;;  %21453 = vst [vmem:[#allocation35_spill] sm:$0xff] %v18004_v49 }
 0x357   :  { %v17976_v10 = vpack.c.bf16 %v2631_v35, %v2624_v56  ;;  %v17996_v35 = vpack.c.bf16 %v17905_v62, %v17902_v36  ;;  %21454 = vst [vmem:[#allocation56_spill] sm:$0xff] %v18008_v18 }
 0x358   :  { %21445 = vst [vmem:[#allocation31_spill] sm:$0xff] %v17974_v45  ;;  %21450 = vst [vmem:[#allocation55_spill] sm:$0xff] %v17992_v27 }
 0x359   :  { %21446 = vst [vmem:[#allocation54_spill] sm:$0xff] %v17976_v10  ;;  %21451 = vst [vmem:[#allocation77_spill] sm:$0xff] %v17996_v35 }
 0x35a   :  { %21452 = vst [vmem:[#allocation34_spill] sm:$0xff] %v18000_v20 }
 0x3c5   :  { %v2381_v56 = vpop.xlane.xlu0 %2380 }
 0x3c6   :  { %v2388_v9 = vsub.f32 %v17718_v21, %v2381_v56 }
 0x3c8   :  { %v2392_v30 = vmul.f32 1.442695, %v2388_v9 }
 0x3c9   :  { %v2385_v24 = vpop.xlane.xlu1 %2384  ;;  %v2383_v34 = vpop.xlane.xlu0 %2382 }
 0x3ca   :  { %15987 = vpow2.f32 %v2392_v30  ;;  %v2390_v60 = vsub.f32 %v17727_v47, %v2385_v24  ;;  %v2389_v12 = vsub.f32 %v17731_v39, %v2383_v34 }
 0x3cc   :  { %v2396_v51 = vmul.f32 1.442695, %v2390_v60  ;;  %v2394_v8 = vmul.f32 1.442695, %v2389_v12 }
 0x3cd   :  { %v2387_v55 = vpop.xlane.xlu1 %2386 }
 0x3ce   :  { %15989 = vpow2.f32 %v2396_v51  ;;  %v2391_v46 = vsub.f32 %v17738_v2, %v2387_v55 }
 0x3cf   :  { %15991 = vpow2.f32 %v2394_v8 }
 0x3d0   :  { %v2398_v43 = vmul.f32 1.442695, %v2391_v46 }
 0x3d2   :  { %15993 = vpow2.f32 %v2398_v43 }
 0x3d4   :  { %v18014_v28 = vpop.eup %15987 }
 0x3d5   :  { %v18017_v21 = vand.u32 4294901760, %v18014_v28 }
 0x3d7   :  { %v18021_v30 = vsub.f32 %v18014_v28, %v18017_v21 }
 0x3d8   :  { %v18023_v47 = vpop.eup %15989 }
 0x3d9   :  { %v18025_v60 = vpop.eup %15991  ;;  %v20933_v51 = vand.u32 4294901760, %v18021_v30  ;;  %v18029_v55 = vand.u32 4294901760, %v18023_v47 }
 0x3da   :  { %v18032_v43 = vand.u32 4294901760, %v18025_v60 }
 0x3db   :  { %v2484_v46 = vsub.f32 %v18021_v30, %v20933_v51  ;;  %v18039_v8 = vsub.f32 %v18023_v47, %v18029_v55 }
 0x3dc   :  { %v18041_v12 = vpop.eup %15993  ;;  %v18045_v34 = vsub.f32 %v18025_v60, %v18032_v43 }
 0x3dd   :  { %v2485_v39 = vand.u32 4294901760, %v2484_v46  ;;  %v20937_v2 = vand.u32 4294901760, %v18039_v8  ;;  %v18049_v24 = vand.u32 4294901760, %v18041_v12 }
 0x3de   :  { %v2493_v9 = vand.u32 4294901760, %v18045_v34 }
 0x3df   :  { %11869 = vmatprep.mubr.f32.mxu1 %v2485_v39  ;;  %v2504_v56 = vsub.f32 %v18039_v8, %v20937_v2  ;;  %v18057_v51 = vsub.f32 %v18041_v12, %v18049_v24 }
 0x3e0   :  { %v2494_v46 = vsub.f32 %v18045_v34, %v2493_v9 }
 0x3e1   :  { %v2505_v5 = vand.u32 4294901760, %v2504_v56  ;;  %v2513_v16 = vand.u32 4294901760, %v18057_v51  ;;  %v21459_v56 = vand.u32 4294901760, %v17860_v3  ;;  %v21466_v3 = vand.u32 4294901760, %v17890_v33 }
 0x3e2   :  { %v2495_v42 = vand.u32 4294901760, %v2494_v46  ;;  %v21460_v46 = vand.u32 4294901760, %v17862_v59  ;;  %v21467_v59 = vand.u32 4294901760, %v17892_v23  ;;  %v21472_v33 = vand.u32 4294901760, %v17919_v37 }
 0x3e3   :  { %v2514_v39 = vsub.f32 %v18057_v51, %v2513_v16  ;;  %v21473_v23 = vand.u32 4294901760, %v17922_v11  ;;  %v21478_v37 = vand.u32 4294901760, %v17956_v61  ;;  %v21479_v11 = vand.u32 4294901760, %v17961_v26 }
 0x3e4   :  { %11870 = vmatmul.mubr.f32.vlgmr.msra.gmra.mrb[8].mxu1 %v2495_v42  ;;  %v21456_v42 = vand.u32 4294901760, %v17843_v31  ;;  %v21463_v31 = vand.u32 4294901760, %v17875_v4  ;;  %v21469_v4 = vand.u32 4294901760, %v17902_v36  ;;  %v21475_v36 = vand.u32 4294901760, %v17939_v29  ;;  %v166_v29 = vld [vmem:[#allocation7] sm:$0xf] }
 0x3e5   :  { %14200 = vmatpush3.bf16.msra.mxu1 %v17867_v63  ;;  %11872 = vmatprep.mubr.f32.mxu1 %v2505_v5  ;;  %v2515_v2 = vand.u32 4294901760, %v2514_v39  ;;  %v21455_v5 = vand.u32 4294901760, %v18021_v30  ;;  %v18134_v39 = vpack.c.bf16 %v21460_v46, %v21459_v56 }
 0x3e6   :  { %14202 = vmatprep.subr.bf16.mxu1 %v17882_v58 }
 0x3e7   :  { %21461 = vst [vmem:[#allocation37_spill] sm:$0xff] %v18134_v39 }
 0x3e8   :  { %11873 = vmatmul.mubr.f32.gmra.mrb[10].mxu1 %v2515_v2 }
 0x3e9   :  { %14204 = vmatpush3.bf16.msra.mxu1 %v17882_v58  ;;  %11907 = vmatprep.mubr.f32.mxu1 %v18017_v21 }
 0x3ea   :  { %14206 = vmatprep.subr.bf16.mxu1 %v17896_v22 }
 0x3ed   :  { %14208 = vmatpush3.bf16.msra.mxu1 %v17896_v22 }
 0x3ee   :  { %14210 = vmatprep.subr.bf16.mxu1 %v17924_v14 }
 0x3f1   :  { %14212 = vmatpush3.bf16.msra.mxu1 %v17924_v14 }
 0x3f2   :  { %14214 = vmatprep.subr.bf16.mxu1 %v17928_v1 }
 0x3f5   :  { %14216 = vmatpush3.bf16.msra.mxu1 %v17928_v1 }
 0x3f6   :  { %14218 = vmatprep.subr.bf16.mxu1 %v17948_v7 }
 0x3f9   :  { %14220 = vmatpush3.bf16.msra.mxu1 %v17948_v7 }
 0x3fa   :  { %14222 = vmatprep.subr.bf16.mxu1 %v17974_v45 }
 0x3fd   :  { %14224 = vmatpush3.bf16.msra.mxu1 %v17974_v45 }
 0x3fe   :  { %14226 = vmatprep.subr.bf16.mxu1 %v17976_v10 }
 0x401   :  { %14228 = vmatpush3.bf16.msra.mxu1 %v17976_v10 }
 0x402   :  { %14230 = vmatprep.subr.bf16.mxu1 %v17980_v38 }
 0x404   :  { %11908 = vmatmul.mubr.f32.vlgmr.msra.gmra.mrb[8].mxu1 %v18032_v43 }
 0x405   :  { %11910 = vmatprep.mubr.f32.mxu1 %v18029_v55  ;;  %14232 = vmatpush3.bf16.msra.mxu1 %v17980_v38 }
 0x406   :  { %14234 = vmatprep.subr.bf16.mxu1 %v17984_v13 }
 0x408   :  { %11911 = vmatmul.mubr.f32.gmra.mrb[10].mxu1 %v18049_v24 }
 0x409   :  { %14236 = vmatpush3.bf16.msra.mxu1 %v17984_v13  ;;  %11945 = vmatprep.mubr.f32.mxu1 %v18021_v30  ;;  %v21457_v30 = vand.u32 4294901760, %v17848_v19  ;;  %v21464_v19 = vand.u32 4294901760, %v17877_v57 }
 0x40a   :  { %14238 = vmatprep.subr.bf16.mxu1 %v17988_v53 }
 0x40b   :  { %v18126_v2 = vpack.c.bf16 %v21457_v30, %v21456_v42  ;;  %v18146_v42 = vpack.c.bf16 %v21464_v19, %v21463_v31 }
 0x40d   :  { %14240 = vmatpush3.bf16.msra.mxu1 %v17988_v53  ;;  %21458 = vst [vmem:[#allocation36_spill] sm:$0xff] %v18126_v2  ;;  %21465 = vst [vmem:[#allocation20_spill] sm:$0xff] %v18146_v42 }
 0x40e   :  { %14242 = vmatprep.subr.bf16.mxu1 %v17992_v27 }
 0x411   :  { %14244 = vmatpush3.bf16.msra.mxu1 %v17992_v27 }
 0x412   :  { %14246 = vmatprep.subr.bf16.mxu1 %v17996_v35 }
 0x415   :  { %14248 = vmatpush3.bf16.msra.mxu1 %v17996_v35 }
 0x416   :  { %14250 = vmatprep.subr.bf16.mxu1 %v18000_v20 }
 0x419   :  { %14252 = vmatpush3.bf16.msra.mxu1 %v18000_v20 }
 0x41a   :  { %14254 = vmatprep.subr.bf16.mxu1 %v18004_v49 }
 0x41d   :  { %14256 = vmatpush3.bf16.msra.mxu1 %v18004_v49 }
 0x41e   :  { %14258 = vmatprep.subr.bf16.mxu1 %v18008_v18 }
 0x421   :  { %14260 = vmatpush3.bf16.msra.mxu1 %v18008_v18 }
 0x422   :  { %14262 = vmatprep.subr.bf16.mxu1 %v17705_v54 }
 0x424   :  { %11946 = vmatmul.mubr.f32.vlgmr.msra.gmra.mrb[8].mxu1 %v18045_v34 }
 0x425   :  { %11948 = vmatprep.mubr.f32.mxu1 %v18039_v8  ;;  %14264 = vmatpush3.bf16.msra.mxu1 %v17705_v54 }
 0x426   :  { %14266 = vmatprep.subr.bf16.mxu1 %v17747_v15 }
 0x428   :  { %11949 = vmatmul.mubr.f32.gmra.mrb[10].mxu1 %v18057_v51  ;;  %v18173_v51 = vpack.c.bf16 %v21473_v23, %v21472_v33 }
 0x429   :  { %14268 = vmatpush3.bf16.msra.mxu1 %v17747_v15  ;;  %11983 = vmatprep.mubr.f32.mxu1 %v21455_v5  ;;  %v21462_v5 = vand.u32 4294901760, %v18039_v8  ;;  %v18157_v8 = vpack.c.bf16 %v21467_v59, %v21466_v3 }
 0x42a   :  { %14270 = vmatprep.subr.bf16.mxu1 %v17757_v17  ;;  %21474 = vst [vmem:[#allocation21_spill] sm:$0xff] %v18173_v51 }
 0x42b   :  { %21468 = vst [vmem:[#allocation38_spill] sm:$0xff] %v18157_v8 }
 0x42d   :  { %14272 = vmatpush3.bf16.msra.mxu1 %v17757_v17 }
 0x42e   :  { %14274 = vmatprep.subr.bf16.mxu1 %v17767_v41 }
 0x431   :  { %14276 = vmatpush3.bf16.msra.mxu1 %v17767_v41 }
 0x432   :  { %14278 = vmatprep.subr.bf16.mxu1 %v17783_v6 }
 0x435   :  { %14280 = vmatpush3.bf16.msra.mxu1 %v17783_v6 }
 0x436   :  { %14282 = vmatprep.subr.bf16.mxu1 %v17821_v52 }
 0x439   :  { %14284 = vmatpush3.bf16.msra.mxu1 %v17821_v52 }
 0x43a   :  { %14286 = vmatprep.subr.bf16.mxu1 %v17829_v48 }
 0x43d   :  { %14288 = vmatpush3.bf16.msra.mxu1 %v17829_v48 }
 0x43e   :  { %14290 = vmatprep.subr.bf16.mxu1 %v17838_v32 }
 0x441   :  { %14292 = vmatpush3.bf16.msra.mxu1 %v17838_v32 }
 0x442   :  { %14294 = vmatprep.subr.bf16.mxu1 %v18126_v2 }
 0x444   :  { %11984 = vmatmul.mubr.f32.vlgmr.msra.gmra.mrb[8].mxu1 %v2493_v9  ;;  %v18189_v9 = vpack.c.bf16 %v21479_v11, %v21478_v37 }
 0x445   :  { %11986 = vmatprep.mubr.f32.mxu1 %v21462_v5  ;;  %14296 = vmatpush3.bf16.msra.mxu1 %v18126_v2 }
 0x446   :  { %14298 = vmatprep.subr.bf16.mxu1 %v18134_v39  ;;  %21480 = vst [vmem:[#allocation40_spill] sm:$0xff] %v18189_v9 }
 0x448   :  { %11987 = vmatmul.mubr.f32.gmra.mrb[10].mxu1 %v2513_v16  ;;  %v21470_v16 = vand.u32 4294901760, %v17905_v62  ;;  %v21476_v62 = vand.u32 4294901760, %v17944_v44  ;;  %v3193_v44 = vsel %vm3191_vm9, %v166_v29, 0 }
 0x449   :  { %14300 = vmatpush3.bf16.msra.mxu1 %v18134_v39  ;;  %12021 = vmatprep.mubr.f32.mxu1 %v18017_v21  ;;  %v18217_v61 = vand.u32 4294901760, %v3193_v44 }
 0x44a   :  { %14302 = vmatprep.subr.bf16.mxu1 %v18146_v42  ;;  %v18165_v57 = vpack.c.bf16 %v21470_v16, %v21469_v4  ;;  %v18181_v34 = vpack.c.bf16 %v21476_v62, %v21475_v36 }
 0x44b   :  { %21481 = vst [vmem:[#allocation41_spill] sm:$0xff] %v18217_v61  ;;  %12065 = vmatprep.subr.mxu0 %v18217_v61  ;;  %v18222_v26 = vsub.f32 %v3193_v44, %v18217_v61 }
 0x44c   :  { %21471 = vst [vmem:[#allocation39_spill] sm:$0xff] %v18165_v57  ;;  %21477 = vst [vmem:[#allocation22_spill] sm:$0xff] %v18181_v34  ;;  %12066 = vmatpush3.msra.mxu0 %v18217_v61 }
 0x44d   :  { %14304 = vmatpush3.bf16.msra.mxu1 %v18146_v42  ;;  %21482 = vst [vmem:[#allocation25_spill] sm:$0xff] %v18222_v26  ;;  %v18439_v42 = vld [vmem:[#allocation11 + $0x78] sm:$0xff] }
 0x44e   :  { %14306 = vmatprep.subr.bf16.mxu1 %v18157_v8 }
 0x451   :  { %14308 = vmatpush3.bf16.msra.mxu1 %v18157_v8  ;;  %v18437_v8 = vld [vmem:[#allocation11 + $0x70] sm:$0xff] }
 0x452   :  { %14310 = vmatprep.subr.bf16.mxu1 %v18165_v57  ;;  %v4666_v49 = vand.u32 4294901760, %v18437_v8 }
 0x455   :  { %14312 = vmatpush3.bf16.msra.mxu1 %v18165_v57 }
 0x456   :  { %14314 = vmatprep.subr.bf16.mxu1 %v18173_v51 }
 0x459   :  { %14316 = vmatpush3.bf16.msra.mxu1 %v18173_v51 }
 0x45a   :  { %14318 = vmatprep.subr.bf16.mxu1 %v18181_v34 }
 0x45d   :  { %14320 = vmatpush3.bf16.msra.mxu1 %v18181_v34 }
 0x45e   :  { %14322 = vmatprep.subr.bf16.mxu1 %v18189_v9 }
 0x461   :  { %14324 = vmatpush3.bf16.msra.mxu1 %v18189_v9 }
 0x462   :  { %14326 = vmatprep.subr.bf16.mxu1 %v17705_v54 }
 0x464   :  { %12022 = vmatmul.mubr.f32.vlgmr.msra.gmra.mrb[8].mxu1 %v18032_v43 }
 0x465   :  { %12024 = vmatprep.mubr.f32.mxu1 %v18029_v55  ;;  %14328 = vmatpush3.bf16.msra.mxu1 %v17705_v54 }
 0x466   :  { %14330 = vmatprep.subr.bf16.mxu1 %v17747_v15 }
 0x468   :  { %12025 = vmatmul.mubr.f32.gmra.mrb[10].mxu1 %v18049_v24 }
 0x469   :  { %14332 = vmatpush3.bf16.msra.mxu1 %v17747_v15  ;;  %12059 = vmatprep.mubr.f32.mxu1 %v18017_v21  ;;  %v18225_v21 = vand.u32 4294901760, %v18222_v26 }
 0x46a   :  { %14334 = vmatprep.subr.bf16.mxu1 %v17757_v17 }
 0x46b   :  { %21483 = vst [vmem:[#allocation28_spill] sm:$0xff] %v18225_v21 }
 0x46d   :  { %14336 = vmatpush3.bf16.msra.mxu1 %v17757_v17 }
 0x46e   :  { %14338 = vmatprep.subr.bf16.mxu1 %v17767_v41 }
 0x471   :  { %14340 = vmatpush3.bf16.msra.mxu1 %v17767_v41 }
 0x472   :  { %14342 = vmatprep.subr.bf16.mxu1 %v17783_v6 }
 0x475   :  { %14344 = vmatpush3.bf16.msra.mxu1 %v17783_v6 }
 0x476   :  { %14346 = vmatprep.subr.bf16.mxu1 %v17821_v52 }
 0x479   :  { %14348 = vmatpush3.bf16.msra.mxu1 %v17821_v52 }
 0x47a   :  { %14350 = vmatprep.subr.bf16.mxu1 %v17829_v48 }
 0x47d   :  { %14352 = vmatpush3.bf16.msra.mxu1 %v17829_v48 }
 0x47e   :  { %14354 = vmatprep.subr.bf16.mxu1 %v17838_v32 }
 0x481   :  { %14356 = vmatpush3.bf16.msra.mxu1 %v17838_v32 }
 0x484   :  { %12060 = vmatmul.mubr.f32.vlgmr.msra.gmra.mrb[8].mxu1 %v18032_v43 }
 0x485   :  { %12062 = vmatprep.mubr.f32.mxu1 %v18029_v55  ;;  %v3305_v55 = vsub.f32 %v18222_v26, %v18225_v21 }
 0x487   :  { %v18229_v43 = vand.u32 4294901760, %v3305_v55 }
 0x488   :  { %12063 = vmatmul.mubr.f32.gmra.mrb[10].mxu1 %v18049_v24 }
 0x489   :  { %21484 = vst [vmem:[#allocation42_spill] sm:$0xff] %v18229_v43  ;;  %12073 = vmatprep.subr.mxu0 %v18229_v43 }
 0x557   :  { %v12061_v24 = vpop.f32.mrb[8].mxu1 }
 0x558   :  { %15995 = vrcp.f32 %v12061_v24  ;;  %v3148_v30 = vpop.f32.mrb[9].mxu1 }
 0x559   :  { %15997 = vrcp.f32 %v3148_v30 }
 0x55b   :  { %v12064_v56 = vpop.f32.mrb[10].mxu1 }
 0x55c   :  { %15999 = vrcp.f32 %v12064_v56  ;;  %v3160_v46 = vpop.f32.mrb[11].mxu1 }
 0x55d   :  { %16001 = vrcp.f32 %v3160_v46 }
 0x562   :  { %v15996_v5 = vpop.eup %15995 }
 0x563   :  { %v15998_v31 = vpop.eup %15997  ;;  %v3183_v19 = vsel %vm3178_vm10, %v15996_v5, 0 }
 0x564   :  { %v3271_v3 = vand.u32 4294901760, %v3183_v19  ;;  %v3180_v59 = vsel %vm3178_vm10, %v15998_v31, 0 }
 0x565   :  { %v3261_v4 = vand.u32 4294901760, %v3180_v59 }
 0x566   :  { %v16000_v16 = vpop.eup %15999  ;;  %v3272_v33 = vsub.f32 %v3183_v19, %v3271_v3 }
 0x567   :  { %v16002_v23 = vpop.eup %16001  ;;  %v3262_v36 = vsub.f32 %v3180_v59, %v3261_v4  ;;  %v3189_v62 = vsel %vm3178_vm10, %v16000_v16, 0 }
 0x568   :  { %v3273_v37 = vand.u32 4294901760, %v3272_v33  ;;  %v3186_v11 = vsel %vm3178_vm10, %v16002_v23, 0  ;;  %v3291_v29 = vand.u32 4294901760, %v3189_v62  ;;  %v21489_v23 = vld [vmem:[#allocation73_spill] sm:$0xff] }
 0x569   :  { %v3263_v44 = vand.u32 4294901760, %v3262_v36  ;;  %v3281_v55 = vand.u32 4294901760, %v3186_v11 }
 0x56a   :  { %v3274_v24 = vsub.f32 %v3272_v33, %v3273_v37  ;;  %v3292_v30 = vsub.f32 %v3189_v62, %v3291_v29 }
 0x56b   :  { %v3264_v56 = vsub.f32 %v3262_v36, %v3263_v44  ;;  %v3282_v46 = vsub.f32 %v3186_v11, %v3281_v55 }
 0x56c   :  { %v3293_v5 = vand.u32 4294901760, %v3292_v30  ;;  %v3275_v34 = vand.u32 4294901760, %v3274_v24 }
 0x56d   :  { %v3265_v9 = vand.u32 4294901760, %v3264_v56  ;;  %v3283_v31 = vand.u32 4294901760, %v3282_v46 }
 0x56e   :  { %v3294_v51 = vsub.f32 %v3292_v30, %v3293_v5 }
 0x56f   :  { %12067 = vmatprep.mubr.f32.mxu0 %v3265_v9  ;;  %v3284_v19 = vsub.f32 %v3282_v46, %v3283_v31  ;;  %v21487_v9 = vld [vmem:[#allocation72_spill] sm:$0xff] }
 0x570   :  { %12068 = vmatmul.mubr.f32.vlgmr.msra.gmra.mrb[8].mxu0 %v3275_v34  ;;  %v3295_v16 = vand.u32 4294901760, %v3294_v51  ;;  %v21485_v51 = vld [vmem:[#allocation71_spill] sm:$0xff]  ;;  %v21486_v34 = vld [vmem:[#allocation78_spill] sm:$0xff] }
 0x571   :  { %12074 = vmatpush3.msra.mxu0 %v18229_v43  ;;  %v3285_v59 = vand.u32 4294901760, %v3284_v19 }
 0x572   :  { %12081 = vmatprep.subr.mxu0 %v18222_v26 }
 0x573   :  { %12070 = vmatprep.mubr.f32.mxu0 %v3285_v59 }
 0x574   :  { %12071 = vmatmul.mubr.f32.gmra.mrb[10].mxu0 %v3295_v16 }
 0x575   :  { %12075 = vmatprep.mubr.f32.mxu0 %v3261_v4 }
 0x578   :  { %12076 = vmatmul.mubr.f32.vlgmr.msra.gmra.mrb[8].mxu0 %v3271_v3 }
 0x579   :  { %12078 = vmatprep.mubr.f32.mxu0 %v3281_v55  ;;  %12082 = vmatpush3.msra.mxu0 %v18222_v26 }
 0x57a   :  { %12089 = vmatprep.subr.mxu0 %v18217_v61 }
 0x57c   :  { %12079 = vmatmul.mubr.f32.gmra.mrb[10].mxu0 %v3291_v29 }
 0x57d   :  { %12083 = vmatprep.mubr.f32.mxu0 %v3262_v36  ;;  %v21492_v36 = vld [vmem:[#allocation81_spill] sm:$0xff] }
 0x580   :  { %12084 = vmatmul.mubr.f32.vlgmr.msra.gmra.mrb[8].mxu0 %v3272_v33  ;;  %v21488_v33 = vld [vmem:[#allocation79_spill] sm:$0xff] }
 0x581   :  { %12086 = vmatprep.mubr.f32.mxu0 %v3282_v46  ;;  %12090 = vmatpush3.msra.mxu0 %v18217_v61 }
 0x582   :  { %12097 = vmatprep.subr.mxu0 %v18225_v21 }
 0x584   :  { %12087 = vmatmul.mubr.f32.gmra.mrb[10].mxu0 %v3292_v30 }
 0x585   :  { %12091 = vmatprep.mubr.f32.mxu0 %v3263_v44 }
 0x588   :  { %12092 = vmatmul.mubr.f32.vlgmr.msra.gmra.mrb[8].mxu0 %v3273_v37 }
 0x589   :  { %12094 = vmatprep.mubr.f32.mxu0 %v3283_v31  ;;  %12098 = vmatpush3.msra.mxu0 %v18225_v21 }
 0x58a   :  { %12105 = vmatprep.subr.mxu0 %v18217_v61 }
 0x58c   :  { %12095 = vmatmul.mubr.f32.gmra.mrb[10].mxu0 %v3293_v5 }
 0x58d   :  { %12099 = vmatprep.mubr.f32.mxu0 %v3261_v4 }
 0x590   :  { %12100 = vmatmul.mubr.f32.vlgmr.msra.gmra.mrb[8].mxu0 %v3271_v3 }
 0x591   :  { %12106 = vmatpush3.msra.mxu0 %v18217_v61  ;;  %12102 = vmatprep.mubr.f32.mxu0 %v3281_v55 }
 0x592   :  { %14358 = vmatprep.subr.bf16.mxu0 %v21485_v51 }
 0x594   :  { %12103 = vmatmul.mubr.f32.gmra.mrb[10].mxu0 %v3291_v29 }
 0x595   :  { %12107 = vmatprep.mubr.f32.mxu0 %v3261_v4  ;;  %v21491_v4 = vld [vmem:[#allocation80_spill] sm:$0xff] }
 0x598   :  { %12108 = vmatmul.mubr.f32.vlgmr.msra.gmra.mrb[8].mxu0 %v3271_v3  ;;  %v21490_v3 = vld [vmem:[#allocation74_spill] sm:$0xff] }
 0x599   :  { %14360 = vmatpush3.bf16.msra.mxu0 %v21485_v51  ;;  %12110 = vmatprep.mubr.f32.mxu0 %v3281_v55 }
 0x59a   :  { %14362 = vmatprep.subr.bf16.mxu0 %v21486_v34 }
 0x59c   :  { %12111 = vmatmul.mubr.f32.gmra.mrb[10].mxu0 %v3291_v29 }
 0x59d   :  { %14364 = vmatpush3.bf16.msra.mxu0 %v21486_v34 }
 0x59e   :  { %14366 = vmatprep.subr.bf16.mxu0 %v21487_v9 }
 0x5a1   :  { %14368 = vmatpush3.bf16.msra.mxu0 %v21487_v9 }
 0x5a2   :  { %14370 = vmatprep.subr.bf16.mxu0 %v21488_v33 }
 0x5a5   :  { %14372 = vmatpush3.bf16.msra.mxu0 %v21488_v33 }
 0x5a6   :  { %14374 = vmatprep.subr.bf16.mxu0 %v21489_v23 }
 0x5a9   :  { %14376 = vmatpush3.bf16.msra.mxu0 %v21489_v23 }
 0x5aa   :  { %14378 = vmatprep.subr.bf16.mxu0 %v17256_v25 }
 0x5ad   :  { %14380 = vmatpush3.bf16.msra.mxu0 %v17256_v25 }
 0x5ae   :  { %14382 = vmatprep.subr.bf16.mxu0 %v21490_v3 }
 0x5b1   :  { %14384 = vmatpush3.bf16.msra.mxu0 %v21490_v3 }
 0x5b2   :  { %14386 = vmatprep.subr.bf16.mxu0 %v21491_v4 }
 0x5b5   :  { %14388 = vmatpush3.bf16.msra.mxu0 %v21491_v4 }
 0x5b6   :  { %14390 = vmatprep.subr.bf16.mxu0 %v21492_v36 }
 0x66b   :  { %v12109_v62 = vpop.f32.mrb[8].mxu0 }
 0x66c   :  { %v3771_v37 = vmul.f32 %v18025_v60, %v12109_v62  ;;  %v3748_v11 = vpop.f32.mrb[9].mxu0 }
 0x66d   :  { %v3770_v29 = vmul.f32 %v18014_v28, %v3748_v11 }
 0x66e   :  { %v18264_v44 = vand.u32 4294901760, %v3771_v37 }
 0x66f   :  { %v18266_v55 = vand.u32 4294901760, %v3770_v29  ;;  %v12112_v24 = vpop.f32.mrb[10].mxu0 }
 0x670   :  { %v18269_v30 = vsub.f32 %v3771_v37, %v18264_v44  ;;  %v3773_v56 = vmul.f32 %v18041_v12, %v12112_v24  ;;  %v3760_v46 = vpop.f32.mrb[11].mxu0 }
 0x671   :  { %v18273_v5 = vsub.f32 %v3770_v29, %v18266_v55  ;;  %v3772_v31 = vmul.f32 %v18023_v47, %v3760_v46 }
 0x672   :  { %v20944_v60 = vand.u32 4294901760, %v18269_v30  ;;  %v18277_v19 = vand.u32 4294901760, %v3773_v56 }
 0x673   :  { %v18279_v28 = vand.u32 4294901760, %v3772_v31  ;;  %v3896_v59 = vand.u32 4294901760, %v18273_v5 }
 0x674   :  { %v3907_v16 = vsub.f32 %v18269_v30, %v20944_v60  ;;  %v18286_v12 = vsub.f32 %v3773_v56, %v18277_v19  ;;  %v21493_v60 = vld [vmem:[#allocation82_spill] sm:$0xff] }
 0x675   :  { %v18289_v62 = vsub.f32 %v3772_v31, %v18279_v28  ;;  %v3897_v47 = vsub.f32 %v18273_v5, %v3896_v59 }
 0x676   :  { %v3926_v37 = vand.u32 4294901760, %v18286_v12  ;;  %v3908_v24 = vand.u32 4294901760, %v3907_v16  ;;  %v21494_v16 = vld [vmem:[#allocation83_spill] sm:$0xff] }
 0x677   :  { %v3898_v11 = vand.u32 4294901760, %v3897_v47  ;;  %v3916_v29 = vand.u32 4294901760, %v18289_v62  ;;  %v21495_v47 = vld [vmem:[#allocation84_spill] sm:$0xff] }
 0x678   :  { %v3927_v46 = vsub.f32 %v18286_v12, %v3926_v37 }
 0x679   :  { %12145 = vmatprep.mubr.f32.mxu0 %v3898_v11  ;;  %v3917_v56 = vsub.f32 %v18289_v62, %v3916_v29  ;;  %v21502_v11 = vld [vmem:[#allocation90_spill] sm:$0xff] }
 0x67a   :  { %12146 = vmatmul.mubr.f32.vlgmr.msra.gmra.mrb[12].mxu0 %v3908_v24  ;;  %v3928_v21 = vand.u32 4294901760, %v3927_v46  ;;  %v21503_v24 = vld [vmem:[#allocation91_spill] sm:$0xff]  ;;  %v21506_v46 = vand.u32 4294901760, %v18269_v30 }
 0x67b   :  { %14392 = vmatpush3.bf16.msra.mxu0 %v21492_v36  ;;  %v3918_v31 = vand.u32 4294901760, %v3917_v56  ;;  %v21497_v36 = vld [vmem:[#allocation85_spill] sm:$0xff]  ;;  %v21507_v56 = vld [vmem:[#allocation94_spill] sm:$0xff] }
 0x67c   :  { %14394 = vmatprep.subr.bf16.mxu0 %v21493_v60 }
 0x67d   :  { %12148 = vmatprep.mubr.f32.mxu0 %v3918_v31  ;;  %v21508_v31 = vld [vmem:[#allocation96_spill] sm:$0xff] }
 0x67e   :  { %12149 = vmatmul.mubr.f32.gmra.mrb[14].mxu0 %v3928_v21  ;;  %v21496_v21 = vld [vmem:[#allocation95_spill] sm:$0xff] }
 0x67f   :  { %14396 = vmatpush3.bf16.msra.mxu0 %v21493_v60  ;;  %12183 = vmatprep.mubr.f32.mxu0 %v18266_v55  ;;  %v21501_v60 = vld [vmem:[#allocation89_spill] sm:$0xff] }
 0x680   :  { %14398 = vmatprep.subr.bf16.mxu0 %v21494_v16 }
 0x683   :  { %14400 = vmatpush3.bf16.msra.mxu0 %v21494_v16 }
 0x684   :  { %14402 = vmatprep.subr.bf16.mxu0 %v21495_v47 }
 0x687   :  { %14404 = vmatpush3.bf16.msra.mxu0 %v21495_v47 }
 0x688   :  { %14406 = vmatprep.subr.bf16.mxu0 %v17420_v50 }
 0x68b   :  { %14408 = vmatpush3.bf16.msra.mxu0 %v17420_v50  ;;  %v21498_v50 = vld [vmem:[#allocation86_spill] sm:$0xff] }
 0x68c   :  { %14410 = vmatprep.subr.bf16.mxu0 %v17427_v40 }
 0x68f   :  { %14412 = vmatpush3.bf16.msra.mxu0 %v17427_v40  ;;  %v21499_v40 = vld [vmem:[#allocation87_spill] sm:$0xff] }
 0x690   :  { %14414 = vmatprep.subr.bf16.mxu0 %v17438_v0 }
 0x693   :  { %14416 = vmatpush3.bf16.msra.mxu0 %v17438_v0  ;;  %v21500_v0 = vld [vmem:[#allocation88_spill] sm:$0xff] }
 0x694   :  { %14418 = vmatprep.subr.bf16.mxu0 %v21496_v21 }
 0x697   :  { %14420 = vmatpush3.bf16.msra.mxu0 %v21496_v21 }
 0x698   :  { %14422 = vmatprep.subr.bf16.mxu0 %v21497_v36 }
 0x69a   :  { %12184 = vmatmul.mubr.f32.vlgmr.msra.gmra.mrb[12].mxu0 %v18264_v44 }
 0x69b   :  { %12186 = vmatprep.mubr.f32.mxu0 %v18279_v28  ;;  %14424 = vmatpush3.bf16.msra.mxu0 %v21497_v36  ;;  %v4613_v36 = vld [vmem:[#allocation11 + $0x30] sm:$0xff] }
 0x69c   :  { %14426 = vmatprep.subr.bf16.mxu0 %v21498_v50 }
 0x69e   :  { %12187 = vmatmul.mubr.f32.gmra.mrb[14].mxu0 %v18277_v19 }
 0x69f   :  { %14428 = vmatpush3.bf16.msra.mxu0 %v21498_v50  ;;  %12221 = vmatprep.mubr.f32.mxu0 %v18273_v5  ;;  %v21504_v5 = vld [vmem:[#allocation92_spill] sm:$0xff]  ;;  %v4614_v50 = vld [vmem:[#allocation11 + $0x38] sm:$0xff] }
 0x6a0   :  { %14430 = vmatprep.subr.bf16.mxu0 %v21499_v40 }
 0x6a3   :  { %14432 = vmatpush3.bf16.msra.mxu0 %v21499_v40  ;;  %v4642_v40 = vand.u32 4294901760, %v4613_v36 }
 0x6a4   :  { %14434 = vmatprep.subr.bf16.mxu0 %v21500_v0 }
 0x6a7   :  { %14436 = vmatpush3.bf16.msra.mxu0 %v21500_v0  ;;  %v4645_v0 = vand.u32 4294901760, %v4614_v50 }
 0x6a8   :  { %14438 = vmatprep.subr.bf16.mxu0 %v21501_v60 }
 0x6ab   :  { %14440 = vmatpush3.bf16.msra.mxu0 %v21501_v60  ;;  %v18413_v60 = vpack.c.bf16 %v4645_v0, %v4642_v40 }
 0x6ac   :  { %14442 = vmatprep.subr.bf16.mxu0 %v21502_v11 }
 0x6af   :  { %14444 = vmatpush3.bf16.msra.mxu0 %v21502_v11  ;;  %v4615_v11 = vld [vmem:[#allocation11 + $0x40] sm:$0xff] }
 0x6b0   :  { %14446 = vmatprep.subr.bf16.mxu0 %v21503_v24 }
 0x6b3   :  { %14448 = vmatpush3.bf16.msra.mxu0 %v21503_v24  ;;  %v4616_v24 = vld [vmem:[#allocation11 + $0x48] sm:$0xff] }
 0x6b4   :  { %14450 = vmatprep.subr.bf16.mxu0 %v21504_v5 }
 0x6b7   :  { %14452 = vmatpush3.bf16.msra.mxu0 %v21504_v5  ;;  %v18415_v5 = vld [vmem:[#allocation11 + $0x50] sm:$0xff] }
 0x6b8   :  { %14454 = vmatprep.subr.bf16.mxu0 %v21485_v51 }
 0x6ba   :  { %12222 = vmatmul.mubr.f32.vlgmr.msra.gmra.mrb[12].mxu0 %v18269_v30  ;;  %v21509_v30 = vld [vmem:[#allocation97_spill] sm:$0xff] }
 0x6bb   :  { %12224 = vmatprep.mubr.f32.mxu0 %v18289_v62  ;;  %14456 = vmatpush3.bf16.msra.mxu0 %v21485_v51  ;;  %v21510_v62 = vld [vmem:[#allocation98_spill] sm:$0xff] }
 0x6bc   :  { %14458 = vmatprep.subr.bf16.mxu0 %v21486_v34 }
 0x6be   :  { %12225 = vmatmul.mubr.f32.gmra.mrb[14].mxu0 %v18286_v12  ;;  %v21512_v12 = vld [vmem:[#allocation100_spill] sm:$0xff] }
 0x6bf   :  { %14460 = vmatpush3.bf16.msra.mxu0 %v21486_v34  ;;  %12259 = vmatprep.mubr.f32.mxu0 %v3896_v59  ;;  %v21505_v59 = vld [vmem:[#allocation93_spill] sm:$0xff] }
 0x6c0   :  { %14462 = vmatprep.subr.bf16.mxu0 %v21487_v9 }
 0x6c3   :  { %14464 = vmatpush3.bf16.msra.mxu0 %v21487_v9 }
 0x6c4   :  { %14466 = vmatprep.subr.bf16.mxu0 %v21488_v33 }
 0x6c7   :  { %14468 = vmatpush3.bf16.msra.mxu0 %v21488_v33 }
 0x6c8   :  { %14470 = vmatprep.subr.bf16.mxu0 %v21489_v23 }
 0x6cb   :  { %14472 = vmatpush3.bf16.msra.mxu0 %v21489_v23 }
 0x6cc   :  { %14474 = vmatprep.subr.bf16.mxu0 %v17256_v25 }
 0x6cf   :  { %14476 = vmatpush3.bf16.msra.mxu0 %v17256_v25 }
 0x6d0   :  { %14478 = vmatprep.subr.bf16.mxu0 %v21490_v3 }
 0x6d3   :  { %14480 = vmatpush3.bf16.msra.mxu0 %v21490_v3 }
 0x6d4   :  { %14482 = vmatprep.subr.bf16.mxu0 %v21491_v4 }
 0x6d7   :  { %14484 = vmatpush3.bf16.msra.mxu0 %v21491_v4 }
 0x6d8   :  { %14486 = vmatprep.subr.bf16.mxu0 %v21505_v59 }
 0x6da   :  { %12260 = vmatmul.mubr.f32.vlgmr.msra.gmra.mrb[12].mxu0 %v21506_v46  ;;  %v4651_v46 = vand.u32 4294901760, %v4616_v24 }
 0x6db   :  { %12262 = vmatprep.mubr.f32.mxu0 %v3916_v29  ;;  %14488 = vmatpush3.bf16.msra.mxu0 %v21505_v59  ;;  %v21511_v29 = vld [vmem:[#allocation99_spill] sm:$0xff]  ;;  %v4648_v59 = vand.u32 4294901760, %v4615_v11 }
 0x6dc   :  { %14490 = vmatprep.subr.bf16.mxu0 %v21507_v56 }
 0x6de   :  { %12263 = vmatmul.mubr.f32.gmra.mrb[14].mxu0 %v3926_v37  ;;  %v21513_v37 = vld [vmem:[#allocation101_spill] sm:$0xff] }
 0x6df   :  { %14492 = vmatpush3.bf16.msra.mxu0 %v21507_v56  ;;  %12297 = vmatprep.mubr.f32.mxu0 %v18266_v55  ;;  %v18417_v56 = vld [vmem:[#allocation11 + $0x58] sm:$0xff] }
 0x6e0   :  { %14494 = vmatprep.subr.bf16.mxu0 %v21508_v31 }
 0x6e3   :  { %14496 = vmatpush3.bf16.msra.mxu0 %v21508_v31  ;;  %v20962_v31 = vand.u32 4294901760, %v18415_v5 }
 0x6e4   :  { %14498 = vmatprep.subr.bf16.mxu0 %v21509_v30 }
 0x6e7   :  { %14500 = vmatpush3.bf16.msra.mxu0 %v21509_v30  ;;  %v18420_v30 = vld [vmem:[#allocation11 + $0x60] sm:$0xff] }
 0x6e8   :  { %14502 = vmatprep.subr.bf16.mxu0 %v21510_v62  ;;  %v21514_v18 = vand.u32 4294901760, %v18420_v30 }
 0x6eb   :  { %14504 = vmatpush3.bf16.msra.mxu0 %v21510_v62  ;;  %v18422_v62 = vld [vmem:[#allocation11 + $0x68] sm:$0xff] }
 0x6ec   :  { %14506 = vmatprep.subr.bf16.mxu0 %v21511_v29 }
 0x6ef   :  { %14508 = vmatpush3.bf16.msra.mxu0 %v21511_v29  ;;  %v20961_v29 = vand.u32 4294901760, %v18417_v56 }
 0x6f0   :  { %14510 = vmatprep.subr.bf16.mxu0 %v21512_v12 }
 0x6f1   :  { %v18435_v57 = vpack.c.bf16 %v20961_v29, %v20962_v31  ;;  %v21515_v29 = vand.u32 4294901760, %v18422_v62 }
 0x6f3   :  { %14512 = vmatpush3.bf16.msra.mxu0 %v21512_v12  ;;  %v18427_v12 = vpack.c.bf16 %v4651_v46, %v4648_v59  ;;  %v18453_v31 = vpack.c.bf16 %v21515_v29, %v21514_v18 }
 0x6f4   :  { %14514 = vmatprep.subr.bf16.mxu0 %v21513_v37 }
 0x6f7   :  { %14516 = vmatpush3.bf16.msra.mxu0 %v21513_v37 }
 0x6f8   :  { %14518 = vmatprep.subr.bf16.mxu0 %v21485_v51 }
 0x6fa   :  { %12298 = vmatmul.mubr.f32.vlgmr.msra.gmra.mrb[12].mxu0 %v18264_v44 }
 0x6fb   :  { %12300 = vmatprep.mubr.f32.mxu0 %v18279_v28  ;;  %14520 = vmatpush3.bf16.msra.mxu0 %v21485_v51  ;;  %v4607_v51 = vld [vmem:[#allocation11] sm:$0xff] }
 0x6fc   :  { %14522 = vmatprep.subr.bf16.mxu0 %v21486_v34 }
 0x6fe   :  { %12301 = vmatmul.mubr.f32.gmra.mrb[14].mxu0 %v18277_v19 }
 0x6ff   :  { %14524 = vmatpush3.bf16.msra.mxu0 %v21486_v34  ;;  %12335 = vmatprep.mubr.f32.mxu0 %v18266_v55  ;;  %v4608_v34 = vld [vmem:[#allocation11 + $0x8] sm:$0xff]  ;;  %v4610_v55 = vld [vmem:[#allocation11 + $0x18] sm:$0xff] }
 0x700   :  { %14526 = vmatprep.subr.bf16.mxu0 %v21487_v9  ;;  %v4633_v16 = vand.u32 4294901760, %v4610_v55 }
 0x702   :  { %v18466_v20 = vsub.f32 %v4610_v55, %v4633_v16 }
 0x703   :  { %14528 = vmatpush3.bf16.msra.mxu0 %v21487_v9  ;;  %v4624_v9 = vand.u32 4294901760, %v4607_v51 }
 0x704   :  { %14530 = vmatprep.subr.bf16.mxu0 %v21488_v33  ;;  %v20974_v29 = vand.u32 4294901760, %v18466_v20 }
 0x705   :  { %v18441_v39 = vsub.f32 %v4607_v51, %v4624_v9  ;;  %v20973_v51 = vand.u32 4294901760, %v18439_v42 }
 0x707   :  { %14532 = vmatpush3.bf16.msra.mxu0 %v21488_v33  ;;  %v4627_v33 = vand.u32 4294901760, %v4608_v34  ;;  %v20969_v37 = vand.u32 4294901760, %v18441_v39  ;;  %v18475_v35 = vpack.c.bf16 %v20973_v51, %v4666_v49 }
 0x708   :  { %14534 = vmatprep.subr.bf16.mxu0 %v21489_v23 }
 0x709   :  { %v18443_v2 = vsub.f32 %v4608_v34, %v4627_v33  ;;  %v4748_v34 = vsub.f32 %v18441_v39, %v20969_v37 }
 0x70b   :  { %14536 = vmatpush3.bf16.msra.mxu0 %v21489_v23  ;;  %v18401_v23 = vpack.c.bf16 %v4627_v33, %v4624_v9  ;;  %v20972_v61 = vand.u32 4294901760, %v18443_v2 }
 0x70c   :  { %14538 = vmatprep.subr.bf16.mxu0 %v17256_v25 }
 0x70d   :  { %14550 = vmatprep.subr.bf16.mxu1 %v18401_v23  ;;  %v4755_v9 = vsub.f32 %v18443_v2, %v20972_v61 }
 0x70e   :  { %14552 = vmatpush3.bf16.msra.mxu1 %v18401_v23 }
 0x70f   :  { %14540 = vmatpush3.bf16.msra.mxu0 %v17256_v25  ;;  %v4609_v25 = vld [vmem:[#allocation11 + $0x10] sm:$0xff]  ;;  %v4756_v55 = vand.u32 4294901760, %v4755_v9 }
 0x710   :  { %14542 = vmatprep.subr.bf16.mxu0 %v21490_v3 }
 0x713   :  { %14544 = vmatpush3.bf16.msra.mxu0 %v21490_v3  ;;  %v4630_v3 = vand.u32 4294901760, %v4609_v25 }
 0x714   :  { %14546 = vmatprep.subr.bf16.mxu0 %v21491_v4 }
 0x715   :  { %v18464_v33 = vsub.f32 %v4609_v25, %v4630_v3  ;;  %v4749_v25 = vand.u32 4294901760, %v4748_v34 }
 0x717   :  { %14548 = vmatpush3.bf16.msra.mxu0 %v21491_v4  ;;  %v18405_v4 = vpack.c.bf16 %v4633_v16, %v4630_v3  ;;  %v20984_v18 = vand.u32 4294901760, %v18464_v33  ;;  %v4769_v16 = vsub.f32 %v18466_v20, %v20974_v29  ;;  %v18502_v29 = vpack.c.bf16 %v4756_v55, %v4749_v25 }
 0x718   :  { %v18516_v25 = vsub.f32 %v4616_v24, %v4651_v46 }
 0x719   :  { %14554 = vmatprep.subr.bf16.mxu1 %v18405_v4  ;;  %v4762_v3 = vsub.f32 %v18464_v33, %v20984_v18 }
 0x71a   :  { %12336 = vmatmul.mubr.f32.vlgmr.msra.gmra.mrb[12].mxu0 %v18264_v44  ;;  %v4611_v44 = vld [vmem:[#allocation11 + $0x20] sm:$0xff]  ;;  %14556 = vmatpush3.bf16.msra.mxu1 %v18405_v4 }
 0x71b   :  { %12338 = vmatprep.mubr.f32.mxu0 %v18279_v28  ;;  %v4612_v28 = vld [vmem:[#allocation11 + $0x28] sm:$0xff] }
 0x71c   :  { %v4639_v47 = vand.u32 4294901760, %v4612_v28 }
 0x71e   :  { %12339 = vmatmul.mubr.f32.gmra.mrb[14].mxu0 %v18277_v19  ;;  %v4636_v19 = vand.u32 4294901760, %v4611_v44  ;;  %v18479_v27 = vsub.f32 %v4612_v28, %v4639_v47  ;;  %v18490_v28 = vsub.f32 %v4613_v36, %v4642_v40 }
 0x720   :  { %v18409_v21 = vpack.c.bf16 %v4639_v47, %v4636_v19  ;;  %v18477_v37 = vsub.f32 %v4611_v44, %v4636_v19  ;;  %v20975_v51 = vand.u32 4294901760, %v18479_v27  ;;  %v4763_v44 = vand.u32 4294901760, %v4762_v3 }
 0x721   :  { %v4770_v19 = vand.u32 4294901760, %v4769_v16  ;;  %v18492_v47 = vsub.f32 %v4614_v50, %v4645_v0  ;;  %v20977_v36 = vand.u32 4294901760, %v18490_v28 }
 0x722   :  { %14558 = vmatprep.subr.bf16.mxu1 %v18409_v21  ;;  %v20976_v61 = vand.u32 4294901760, %v18477_v37  ;;  %v4783_v9 = vsub.f32 %v18479_v27, %v20975_v51 }
 0x723   :  { %14560 = vmatpush3.bf16.msra.mxu1 %v18409_v21  ;;  %v18504_v3 = vpack.c.bf16 %v4770_v19, %v4763_v44  ;;  %v20982_v50 = vand.u32 4294901760, %v18492_v47  ;;  %v4790_v16 = vsub.f32 %v18490_v28, %v20977_v36 }
 0x724   :  { %14562 = vmatprep.subr.bf16.mxu1 %v18413_v60  ;;  %v4776_v34 = vsub.f32 %v18477_v37, %v20976_v61  ;;  %v4784_v0 = vand.u32 4294901760, %v4783_v9  ;;  %v18514_v61 = vsub.f32 %v4615_v11, %v4648_v59  ;;  %v20979_v9 = vand.u32 4294901760, %v18516_v25 }
 0x725   :  { %v4797_v51 = vsub.f32 %v18492_v47, %v20982_v50  ;;  %v4791_v44 = vand.u32 4294901760, %v4790_v16  ;;  %v21516_v59 = vand.u32 4294901760, %v18415_v5 }
 0x726   :  { %v4777_v40 = vand.u32 4294901760, %v4776_v34  ;;  %v20978_v34 = vand.u32 4294901760, %v18514_v61  ;;  %v4811_v24 = vsub.f32 %v18516_v25, %v20979_v9 }
 0x727   :  { %14564 = vmatpush3.bf16.msra.mxu1 %v18413_v60  ;;  %v4798_v19 = vand.u32 4294901760, %v4797_v51  ;;  %v18535_v46 = vsub.f32 %v18415_v5, %v21516_v59  ;;  %v21517_v51 = vand.u32 4294901760, %v18417_v56  ;;  %v21518_v5 = vand.u32 4294901760, %v18420_v30 }
 0x728   :  { %14566 = vmatprep.subr.bf16.mxu1 %v18427_v12  ;;  %v18519_v55 = vpack.c.bf16 %v4784_v0, %v4777_v40  ;;  %v4804_v11 = vsub.f32 %v18514_v61, %v20978_v34  ;;  %v4812_v16 = vand.u32 4294901760, %v4811_v24 }
 0x729   :  { %v18524_v36 = vpack.c.bf16 %v4798_v19, %v4791_v44  ;;  %v18540_v40 = vsub.f32 %v18417_v56, %v21517_v51  ;;  %v20980_v44 = vand.u32 4294901760, %v18535_v46  ;;  %v18552_v59 = vsub.f32 %v18420_v30, %v21518_v5 }
 0x72a   :  { %v4805_v0 = vand.u32 4294901760, %v4804_v11  ;;  %v21519_v56 = vand.u32 4294901760, %v18422_v62 }
 0x72b   :  { %14568 = vmatpush3.bf16.msra.mxu1 %v18427_v12  ;;  %v20981_v19 = vand.u32 4294901760, %v18540_v40  ;;  %v4818_v9 = vsub.f32 %v18535_v46, %v20980_v44 }
 0x72c   :  { %14570 = vmatprep.subr.bf16.mxu1 %v18435_v57  ;;  %v18544_v34 = vpack.c.bf16 %v4812_v16, %v4805_v0  ;;  %v18557_v11 = vsub.f32 %v18422_v62, %v21519_v56  ;;  %v20983_v0 = vand.u32 4294901760, %v18552_v59  ;;  %v18573_v62 = vsub.f32 %v18437_v8, %v4666_v49 }
 0x72d   :  { %v4825_v24 = vsub.f32 %v18540_v40, %v20981_v19  ;;  %v4819_v51 = vand.u32 4294901760, %v4818_v9  ;;  %v21520_v9 = vand.u32 4294901760, %v18439_v42 }
 0x72e   :  { %v20989_v16 = vand.u32 4294901760, %v18557_v11  ;;  %v4832_v30 = vsub.f32 %v18552_v59, %v20983_v0  ;;  %v20988_v0 = vand.u32 4294901760, %v18573_v62 }
 0x72f   :  { %14572 = vmatpush3.bf16.msra.mxu1 %v18435_v57  ;;  %v4826_v44 = vand.u32 4294901760, %v4825_v24  ;;  %v18578_v56 = vsub.f32 %v18439_v42, %v21520_v9 }
 0x730   :  { %14574 = vmatprep.subr.bf16.mxu1 %v18453_v31  ;;  %v4839_v5 = vsub.f32 %v18557_v11, %v20989_v16  ;;  %v4833_v24 = vand.u32 4294901760, %v4832_v30  ;;  %v4846_v49 = vsub.f32 %v18573_v62, %v20988_v0  ;;  %v18604_v30 = vpack.c.bf16 %v18479_v27, %v18477_v37 }
 0x731   :  { %v18580_v19 = vpack.c.bf16 %v4826_v44, %v4819_v51  ;;  %v20987_v18 = vand.u32 4294901760, %v18578_v56  ;;  %v18594_v44 = vpack.c.bf16 %v18443_v2, %v18441_v39 }
 0x732   :  { %v4840_v50 = vand.u32 4294901760, %v4839_v5  ;;  %v4847_v42 = vand.u32 4294901760, %v4846_v49  ;;  %v18608_v5 = vpack.c.bf16 %v18492_v47, %v18490_v28  ;;  %v18616_v49 = vpack.c.bf16 %v18540_v40, %v18535_v46 }
 0x733   :  { %14576 = vmatpush3.bf16.msra.mxu1 %v18453_v31  ;;  %v4853_v8 = vsub.f32 %v18578_v56, %v20987_v18 }
 0x734   :  { %14578 = vmatprep.subr.bf16.mxu1 %v18475_v35  ;;  %v18584_v53 = vpack.c.bf16 %v4840_v50, %v4833_v24  ;;  %v18600_v50 = vpack.c.bf16 %v18466_v20, %v18464_v33  ;;  %v18612_v24 = vpack.c.bf16 %v18516_v25, %v18514_v61 }
 0x735   :  { %v4854_v9 = vand.u32 4294901760, %v4853_v8  ;;  %v18620_v8 = vpack.c.bf16 %v18557_v11, %v18552_v59 }
 0x737   :  { %14580 = vmatpush3.bf16.msra.mxu1 %v18475_v35  ;;  %v18596_v51 = vpack.c.bf16 %v4854_v9, %v4847_v42  ;;  %v18624_v42 = vpack.c.bf16 %v18578_v56, %v18573_v62  ;;  %v10015_v9 = vld [vmem:[%s20747_s10] ss:$0 sm:$0xff] }
 0x738   :  { %14582 = vmatprep.subr.bf16.mxu1 %v18502_v29 }
 0x7ed   :  { %v12337_v18 = vpop.f32.mrb[12].mxu0 }
 0x7ee   :  { %v15709_v0 = vadd.f32 %v12337_v18, %v10015_v9  ;;  %v4561_v16 = vpop.f32.mrb[13].mxu0 }
 0x7ef   :  { %v15710_v13 = vadd.f32 %v10015_v9, %v4561_v16 }
 0x7f0   :  { %v4588_v38 = vmin.f32 %v15709_v0, 0.0  ;;  %vm4584_vm11 = vcmp.gt.f32.partialorder %v15709_v0, 0.0 }
 0x7f1   :  { %v4587_v10 = vmin.f32 %v15710_v13, 0.0  ;;  %v12340_v45 = vpop.f32.mrb[14].mxu0  ;;  %vm4583_vm12 = vcmp.gt.f32.partialorder %v15710_v13, 0.0 }
 0x7f2   :  { %v4593_v7 = vmul.f32 1.442695, %v4588_v38  ;;  %v15711_v1 = vadd.f32 %v12340_v45, %v10015_v9  ;;  %v4573_v14 = vpop.f32.mrb[15].mxu0 }
 0x7f3   :  { %v4591_v22 = vmul.f32 1.442695, %v4587_v10  ;;  %v15712_v58 = vadd.f32 %v10015_v9, %v4573_v14 }
 0x7f4   :  { %16003 = vpow2.f32 %v4593_v7  ;;  %v4590_v63 = vmin.f32 %v15711_v1, 0.0  ;;  %vm4586_vm13 = vcmp.gt.f32.partialorder %v15711_v1, 0.0 }
 0x7f5   :  { %16005 = vpow2.f32 %v4591_v22  ;;  %v4589_v32 = vmin.f32 %v15712_v58, 0.0  ;;  %vm4585_vm14 = vcmp.gt.f32.partialorder %v15712_v58, 0.0 }
 0x7f6   :  { %v4597_v48 = vmul.f32 1.442695, %v4590_v63 }
 0x7f7   :  { %v4595_v52 = vmul.f32 1.442695, %v4589_v32 }
 0x7f8   :  { %16007 = vpow2.f32 %v4597_v48 }
 0x7f9   :  { %16009 = vpow2.f32 %v4595_v52 }
 0x7fe   :  { %v16004_v6 = vpop.eup %16003 }
 0x7ff   :  { %v16006_v18 = vpop.eup %16005  ;;  %v10017_v41 = vadd.f32 -1.0, %v16004_v6 }
 0x800   :  { %v10016_v16 = vadd.f32 -1.0, %v16006_v18 }
 0x801   :  { %v18629_v17 = vsel %vm4584_vm11, %v15709_v0, %v10017_v41 }
 0x802   :  { %21521 = vst [vmem:[#allocation44_spill] sm:$0xff] %v18629_v17  ;;  %v16008_v45 = vpop.eup %16007  ;;  %v18632_v10 = vand.u32 4294901760, %v18629_v17  ;;  %v18634_v14 = vsel %vm4583_vm12, %v15710_v13, %v10016_v16 }
 0x803   :  { %21522 = vst [vmem:[#allocation47_spill] sm:$0xff] %v18634_v14  ;;  %v16010_v22 = vpop.eup %16009  ;;  %v18637_v63 = vand.u32 4294901760, %v18634_v14  ;;  %v10019_v32 = vadd.f32 -1.0, %v16008_v45 }
 0x804   :  { %v18641_v52 = vsub.f32 %v18629_v17, %v18632_v10  ;;  %v10018_v6 = vadd.f32 -1.0, %v16010_v22 }
 0x805   :  { %v18645_v41 = vsub.f32 %v18634_v14, %v18637_v63  ;;  %v18647_v48 = vsel %vm4586_vm13, %v15711_v1, %v10019_v32 }
 0x806   :  { %21523 = vst [vmem:[#allocation45_spill] sm:$0xff] %v18647_v48  ;;  %v21022_v7 = vand.u32 4294901760, %v18641_v52  ;;  %v18651_v38 = vand.u32 4294901760, %v18647_v48  ;;  %v18653_v13 = vsel %vm4585_vm14, %v15712_v58, %v10018_v6 }
 0x807   :  { %21524 = vst [vmem:[#allocation46_spill] sm:$0xff] %v18653_v13  ;;  %v18656_v0 = vand.u32 4294901760, %v18653_v13  ;;  %v21025_v9 = vand.u32 4294901760, %v18645_v41 }
 0x808   :  { %v4717_v18 = vsub.f32 %v18641_v52, %v21022_v7  ;;  %v18664_v1 = vsub.f32 %v18647_v48, %v18651_v38 }
 0x809   :  { %v18668_v16 = vsub.f32 %v18653_v13, %v18656_v0  ;;  %v4707_v58 = vsub.f32 %v18645_v41, %v21025_v9 }
 0x80a   :  { %v4736_v45 = vand.u32 4294901760, %v18664_v1  ;;  %v4718_v6 = vand.u32 4294901760, %v4717_v18  ;;  %v18738_v18 = vld [vmem:[#allocation13 + $0x30] sm:$0xff] }
 0x80b   :  { %v4708_v22 = vand.u32 4294901760, %v4707_v58  ;;  %v4726_v32 = vand.u32 4294901760, %v18668_v16  ;;  %v18740_v58 = vld [vmem:[#allocation13 + $0x38] sm:$0xff] }
 0x80c   :  { %v4737_v7 = vsub.f32 %v18664_v1, %v4736_v45 }
 0x80d   :  { %12373 = vmatprep.mubr.f32.mxu1 %v4708_v22  ;;  %v4727_v13 = vsub.f32 %v18668_v16, %v4726_v32 }
 0x80e   :  { %12374 = vmatmul.mubr.f32.vlgmr.msra.gmra.mrb[12].mxu1 %v4718_v6  ;;  %v4738_v9 = vand.u32 4294901760, %v4737_v7  ;;  %v21037_v6 = vand.u32 4294901760, %v18740_v58 }
 0x80f   :  { %14584 = vmatpush3.bf16.msra.mxu1 %v18502_v29  ;;  %v4728_v48 = vand.u32 4294901760, %v4727_v13  ;;  %v18703_v29 = vld [vmem:[#allocation13] sm:$0xff] }
 0x810   :  { %14586 = vmatprep.subr.bf16.mxu1 %v18504_v3  ;;  %v21557_v14 = vand.u32 4294901760, %v18703_v29 }
 0x811   :  { %12376 = vmatprep.mubr.f32.mxu1 %v4728_v48  ;;  %v18726_v48 = vld [vmem:[#allocation13 + $0x28] sm:$0xff] }
 0x812   :  { %12377 = vmatmul.mubr.f32.gmra.mrb[14].mxu1 %v4738_v9  ;;  %v21028_v9 = vand.u32 4294901760, %v18726_v48  ;;  %v19025_v17 = vsub.f32 %v18703_v29, %v21557_v14 }
 0x813   :  { %14588 = vmatpush3.bf16.msra.mxu1 %v18504_v3  ;;  %12411 = vmatprep.mubr.f32.mxu1 %v18637_v63  ;;  %v18705_v3 = vld [vmem:[#allocation13 + $0x8] sm:$0xff] }
 0x814   :  { %14590 = vmatprep.subr.bf16.mxu1 %v18519_v55  ;;  %21558 = vst [vmem:[#allocation82_spill] sm:$0xff] %v19025_v17  ;;  %v21559_v26 = vand.u32 4294901760, %v18705_v3 }
 0x816   :  { %v19030_v15 = vsub.f32 %v18705_v3, %v21559_v26 }
 0x817   :  { %14592 = vmatpush3.bf16.msra.mxu1 %v18519_v55  ;;  %v18711_v55 = vld [vmem:[#allocation13 + $0x10] sm:$0xff] }
 0x818   :  { %14594 = vmatprep.subr.bf16.mxu1 %v18524_v36  ;;  %21560 = vst [vmem:[#allocation83_spill] sm:$0xff] %v19030_v15  ;;  %v21073_v26 = vand.u32 4294901760, %v19030_v15 }
 0x81b   :  { %14596 = vmatpush3.bf16.msra.mxu1 %v18524_v36  ;;  %v21030_v36 = vand.u32 4294901760, %v18705_v3 }
 0x81c   :  { %14598 = vmatprep.subr.bf16.mxu1 %v18544_v34 }
 0x81f   :  { %14600 = vmatpush3.bf16.msra.mxu1 %v18544_v34  ;;  %v18713_v34 = vld [vmem:[#allocation13 + $0x18] sm:$0xff] }
 0x820   :  { %14602 = vmatprep.subr.bf16.mxu1 %v18580_v19 }
 0x823   :  { %14604 = vmatpush3.bf16.msra.mxu1 %v18580_v19  ;;  %v21027_v19 = vand.u32 4294901760, %v18711_v55 }
 0x824   :  { %14606 = vmatprep.subr.bf16.mxu1 %v18584_v53 }
 0x827   :  { %14608 = vmatpush3.bf16.msra.mxu1 %v18584_v53  ;;  %v21045_v53 = vand.u32 4294901760, %v18703_v29 }
 0x828   :  { %14610 = vmatprep.subr.bf16.mxu1 %v18596_v51 }
 0x82b   :  { %14612 = vmatpush3.bf16.msra.mxu1 %v18596_v51  ;;  %v18718_v51 = vld [vmem:[#allocation13 + $0x20] sm:$0xff] }
 0x82c   :  { %14614 = vmatprep.subr.bf16.mxu1 %v18594_v44  ;;  %v21029_v7 = vand.u32 4294901760, %v18718_v51 }
 0x82e   :  { %12412 = vmatmul.mubr.f32.vlgmr.msra.gmra.mrb[12].mxu1 %v18632_v10  ;;  %v18749_v22 = vpack.c.bf16 %v21028_v9, %v21029_v7 }
 0x82f   :  { %12414 = vmatprep.mubr.f32.mxu1 %v18656_v0  ;;  %14616 = vmatpush3.bf16.msra.mxu1 %v18594_v44  ;;  %v21026_v44 = vand.u32 4294901760, %v18713_v34 }
 0x830   :  { %14618 = vmatprep.subr.bf16.mxu1 %v18600_v50  ;;  %21527 = vst [vmem:[#allocation50_spill] sm:$0xff] %v18749_v22 }
 0x831   :  { %v18733_v13 = vpack.c.bf16 %v21026_v44, %v21027_v19  ;;  %v18754_v44 = vld [vmem:[#allocation13 + $0x40] sm:$0xff]  ;;  %v18756_v19 = vld [vmem:[#allocation13 + $0x48] sm:$0xff] }
 0x832   :  { %12415 = vmatmul.mubr.f32.gmra.mrb[14].mxu1 %v18651_v38  ;;  %v21032_v7 = vand.u32 4294901760, %v18754_v44 }
 0x833   :  { %14620 = vmatpush3.bf16.msra.mxu1 %v18600_v50  ;;  %12449 = vmatprep.mubr.f32.mxu1 %v18645_v41  ;;  %v18724_v50 = vpack.c.bf16 %v21030_v36, %v21045_v53  ;;  %21526 = vst [vmem:[#allocation49_spill] sm:$0xff] %v18733_v13 }
 0x834   :  { %14622 = vmatprep.subr.bf16.mxu1 %v18604_v30 }
 0x835   :  { %21525 = vst [vmem:[#allocation48_spill] sm:$0xff] %v18724_v50  ;;  %14742 = vmatprep.subr.bf16.mxu0 %v18724_v50 }
 0x836   :  { %14744 = vmatpush3.bf16.msra.mxu0 %v18724_v50 }
 0x837   :  { %14624 = vmatpush3.bf16.msra.mxu1 %v18604_v30  ;;  %14746 = vmatprep.subr.bf16.mxu0 %v18733_v13  ;;  %v21038_v30 = vand.u32 4294901760, %v18738_v18 }
 0x838   :  { %14626 = vmatprep.subr.bf16.mxu1 %v18608_v5 }
 0x839   :  { %v18765_v9 = vpack.c.bf16 %v21037_v6, %v21038_v30  ;;  %v5423_v30 = vld [vmem:[#allocation13 + $0x70] sm:$0xff] }
 0x83a   :  { %14748 = vmatpush3.bf16.msra.mxu0 %v18733_v13 }
 0x83b   :  { %14628 = vmatpush3.bf16.msra.mxu1 %v18608_v5  ;;  %14750 = vmatprep.subr.bf16.mxu0 %v18749_v22  ;;  %21528 = vst [vmem:[#allocation51_spill] sm:$0xff] %v18765_v9  ;;  %v21031_v5 = vand.u32 4294901760, %v18756_v19 }
 0x83c   :  { %14630 = vmatprep.subr.bf16.mxu1 %v18612_v24 }
 0x83d   :  { %v18777_v36 = vpack.c.bf16 %v21031_v5, %v21032_v7  ;;  %v21535_v7 = vand.u32 4294901760, %v18641_v52 }
 0x83e   :  { %14752 = vmatpush3.bf16.msra.mxu0 %v18749_v22 }
 0x83f   :  { %14632 = vmatpush3.bf16.msra.mxu1 %v18612_v24  ;;  %14754 = vmatprep.subr.bf16.mxu0 %v18765_v9  ;;  %21529 = vst [vmem:[#allocation52_spill] sm:$0xff] %v18777_v36  ;;  %v21530_v24 = vand.u32 4294901760, %v18645_v41  ;;  %v21533_v41 = vand.u32 4294901760, %v18464_v33  ;;  %v21539_v33 = vand.u32 4294901760, %v18492_v47  ;;  %v21545_v47 = vand.u32 4294901760, %v18557_v11  ;;  %v18899_v11 = vld [vmem:[%s20749_s12 + $0x20] sm:$0xff] }
 0x840   :  { %14634 = vmatprep.subr.bf16.mxu1 %v18616_v49 }
 0x842   :  { %14756 = vmatpush3.bf16.msra.mxu0 %v18765_v9 }
 0x843   :  { %14636 = vmatpush3.bf16.msra.mxu1 %v18616_v49  ;;  %14758 = vmatprep.subr.bf16.mxu0 %v18777_v36  ;;  %v21531_v49 = vand.u32 4294901760, %v18441_v39  ;;  %v21536_v39 = vand.u32 4294901760, %v18477_v37  ;;  %v21541_v37 = vand.u32 4294901760, %v18516_v25  ;;  %v21547_v25 = vand.u32 4294901760, %v18578_v56 }
 0x844   :  { %14638 = vmatprep.subr.bf16.mxu1 %v18620_v8  ;;  %v21040_v56 = vand.u32 4294901760, %v18899_v11 }
 0x846   :  { %14760 = vmatpush3.bf16.msra.mxu0 %v18777_v36 }
 0x847   :  { %14640 = vmatpush3.bf16.msra.mxu1 %v18620_v8  ;;  %v21532_v8 = vand.u32 4294901760, %v18443_v2  ;;  %v21537_v2 = vand.u32 4294901760, %v18479_v27 }
 0x848   :  { %14642 = vmatprep.subr.bf16.mxu1 %v18624_v42 }
 0x84b   :  { %14644 = vmatpush3.bf16.msra.mxu1 %v18624_v42  ;;  %v14677_v42 = vpack.c.bf16 %v21532_v8, %v21531_v49  ;;  %v14685_v49 = vpack.c.bf16 %v21537_v2, %v21536_v39  ;;  %v18919_v8 = vld [vmem:[%s20749_s12 + $0x30] sm:$0xff] }
 0x84c   :  { %14646 = vmatprep.subr.bf16.mxu1 %v18401_v23 }
 0x84e   :  { %12450 = vmatmul.mubr.f32.vlgmr.msra.gmra.mrb[12].mxu1 %v18641_v52 }
 0x84f   :  { %12452 = vmatprep.mubr.f32.mxu1 %v18668_v16  ;;  %14648 = vmatpush3.bf16.msra.mxu1 %v18401_v23  ;;  %v21540_v16 = vand.u32 4294901760, %v18514_v61  ;;  %v21546_v61 = vand.u32 4294901760, %v18573_v62 }
 0x850   :  { %14650 = vmatprep.subr.bf16.mxu1 %v18405_v4 }
 0x851   :  { %v14693_v27 = vpack.c.bf16 %v21541_v37, %v21540_v16 }
 0x852   :  { %12453 = vmatmul.mubr.f32.gmra.mrb[14].mxu1 %v18664_v1  ;;  %v21542_v1 = vand.u32 4294901760, %v18535_v46  ;;  %v18884_v46 = vld [vmem:[%s20749_s12 + $0x18] sm:$0xff] }
 0x853   :  { %14652 = vmatpush3.bf16.msra.mxu1 %v18405_v4  ;;  %12487 = vmatprep.mubr.f32.mxu1 %v21530_v24  ;;  %v21534_v24 = vand.u32 4294901760, %v18466_v20  ;;  %v21538_v20 = vand.u32 4294901760, %v18490_v28  ;;  %v21544_v28 = vand.u32 4294901760, %v18552_v59  ;;  %v21041_v59 = vand.u32 4294901760, %v18884_v46 }
 0x854   :  { %14654 = vmatprep.subr.bf16.mxu1 %v18409_v21 }
 0x855   :  { %v14681_v5 = vpack.c.bf16 %v21534_v24, %v21533_v41  ;;  %v14689_v52 = vpack.c.bf16 %v21539_v33, %v21538_v20  ;;  %v21036_v41 = vand.u32 4294901760, %v18919_v8  ;;  %v5419_v20 = vld [vmem:[#allocation13 + $0x50] sm:$0xff]  ;;  %v5420_v33 = vld [vmem:[#allocation13 + $0x58] sm:$0xff] }
 0x856   :  { %v5456_v16 = vand.u32 4294901760, %v5419_v20  ;;  %v5459_v37 = vand.u32 4294901760, %v5420_v33 }
 0x857   :  { %14656 = vmatpush3.bf16.msra.mxu1 %v18409_v21 }
 0x858   :  { %14658 = vmatprep.subr.bf16.mxu1 %v18413_v60 }
 0x85b   :  { %14660 = vmatpush3.bf16.msra.mxu1 %v18413_v60 }
 0x85c   :  { %14662 = vmatprep.subr.bf16.mxu1 %v18427_v12 }
 0x85f   :  { %14664 = vmatpush3.bf16.msra.mxu1 %v18427_v12 }
 0x860   :  { %14666 = vmatprep.subr.bf16.mxu1 %v18435_v57 }
 0x863   :  { %14668 = vmatpush3.bf16.msra.mxu1 %v18435_v57 }
 0x864   :  { %14670 = vmatprep.subr.bf16.mxu1 %v18453_v31 }
 0x867   :  { %14672 = vmatpush3.bf16.msra.mxu1 %v18453_v31 }
 0x868   :  { %14674 = vmatprep.subr.bf16.mxu1 %v18475_v35 }
 0x86b   :  { %14676 = vmatpush3.bf16.msra.mxu1 %v18475_v35 }
 0x86c   :  { %14678 = vmatprep.subr.bf16.mxu1 %v14677_v42 }
 0x86e   :  { %12488 = vmatmul.mubr.f32.vlgmr.msra.gmra.mrb[12].mxu1 %v21535_v7  ;;  %v14701_v7 = vpack.c.bf16 %v21545_v47, %v21544_v28  ;;  %v5421_v47 = vld [vmem:[#allocation13 + $0x60] sm:$0xff] }
 0x86f   :  { %12490 = vmatprep.mubr.f32.mxu1 %v4726_v32  ;;  %14680 = vmatpush3.bf16.msra.mxu1 %v14677_v42 }
 0x870   :  { %14682 = vmatprep.subr.bf16.mxu1 %v14681_v5 }
 0x872   :  { %12491 = vmatmul.mubr.f32.gmra.mrb[14].mxu1 %v4736_v45  ;;  %v21543_v45 = vand.u32 4294901760, %v18540_v40 }
 0x873   :  { %14684 = vmatpush3.bf16.msra.mxu1 %v14681_v5  ;;  %12525 = vmatprep.mubr.f32.mxu1 %v18637_v63  ;;  %v14705_v5 = vpack.c.bf16 %v21547_v25, %v21546_v61  ;;  %v18987_v61 = vld [vmem:[%s20749_s12 + $0x60] sm:$0xff]  ;;  %v5462_v25 = vand.u32 4294901760, %v5421_v47 }
 0x874   :  { %14686 = vmatprep.subr.bf16.mxu1 %v14685_v49  ;;  %v14697_v32 = vpack.c.bf16 %v21543_v45, %v21542_v1 }
 0x877   :  { %14688 = vmatpush3.bf16.msra.mxu1 %v14685_v49 }
 0x878   :  { %14690 = vmatprep.subr.bf16.mxu1 %v14689_v52 }
 0x87b   :  { %14692 = vmatpush3.bf16.msra.mxu1 %v14689_v52  ;;  %v18973_v52 = vld [vmem:[%s20749_s12 + $0x50] sm:$0xff] }
 0x87c   :  { %14694 = vmatprep.subr.bf16.mxu1 %v14693_v27  ;;  %v6239_v1 = vand.u32 4294901760, %v18973_v52 }
 0x87f   :  { %14696 = vmatpush3.bf16.msra.mxu1 %v14693_v27  ;;  %v5404_v27 = vld [vmem:[%s20749_s12 + $0x58] sm:$0xff] }
 0x880   :  { %14698 = vmatprep.subr.bf16.mxu1 %v14697_v32  ;;  %v6242_v45 = vand.u32 4294901760, %v5404_v27 }
 0x882   :  { %v18981_v28 = vpack.c.bf16 %v6242_v45, %v6239_v1 }
 0x883   :  { %14700 = vmatpush3.bf16.msra.mxu1 %v14697_v32  ;;  %v18979_v32 = vpack.c.bf16 %v5459_v37, %v5456_v16 }
 0x884   :  { %14702 = vmatprep.subr.bf16.mxu1 %v14701_v7  ;;  %21554 = vst [vmem:[#allocation74_spill] sm:$0xff] %v18981_v28 }
 0x885   :  { %21553 = vst [vmem:[#allocation73_spill] sm:$0xff] %v18979_v32  ;;  %14762 = vmatprep.subr.bf16.mxu0 %v18979_v32 }
 0x886   :  { %14764 = vmatpush3.bf16.msra.mxu0 %v18979_v32 }
 0x887   :  { %14704 = vmatpush3.bf16.msra.mxu1 %v14701_v7  ;;  %v5422_v7 = vld [vmem:[#allocation13 + $0x68] sm:$0xff] }
 0x888   :  { %14706 = vmatprep.subr.bf16.mxu1 %v14705_v5 }
 0x88b   :  { %14708 = vmatpush3.bf16.msra.mxu1 %v14705_v5  ;;  %v5465_v5 = vand.u32 4294901760, %v5422_v7 }
 0x88c   :  { %14710 = vmatprep.subr.bf16.mxu1 %v18401_v23 }
 0x88e   :  { %12526 = vmatmul.mubr.f32.vlgmr.msra.gmra.mrb[12].mxu1 %v18632_v10 }
 0x88f   :  { %12528 = vmatprep.mubr.f32.mxu1 %v18656_v0  ;;  %14712 = vmatpush3.bf16.msra.mxu1 %v18401_v23  ;;  %v18865_v23 = vld [vmem:[%s20749_s12] sm:$0xff] }
 0x890   :  { %14714 = vmatprep.subr.bf16.mxu1 %v18405_v4  ;;  %v21561_v43 = vand.u32 4294901760, %v18865_v23 }
 0x892   :  { %12529 = vmatmul.mubr.f32.gmra.mrb[14].mxu1 %v18651_v38  ;;  %v19035_v54 = vsub.f32 %v18865_v23, %v21561_v43 }
 0x893   :  { %14716 = vmatpush3.bf16.msra.mxu1 %v18405_v4  ;;  %12563 = vmatprep.mubr.f32.mxu1 %v18637_v63  ;;  %v18870_v4 = vld [vmem:[%s20749_s12 + $0x8] sm:$0xff] }
 0x894   :  { %14718 = vmatprep.subr.bf16.mxu1 %v18409_v21  ;;  %21562 = vst [vmem:[#allocation84_spill] sm:$0xff] %v19035_v54  ;;  %v21074_v3 = vand.u32 4294901760, %v19035_v54 }
 0x897   :  { %14720 = vmatpush3.bf16.msra.mxu1 %v18409_v21  ;;  %v21044_v21 = vand.u32 4294901760, %v18865_v23  ;;  %v5557_v23 = vsub.f32 %v19030_v15, %v21073_v26  ;;  %v19074_v26 = vsub.f32 %v5419_v20, %v5456_v16  ;;  %v19095_v16 = vsub.f32 %v5422_v7, %v5465_v5 }
 0x898   :  { %14722 = vmatprep.subr.bf16.mxu1 %v18413_v60 }
 0x899   :  { %21568 = vst [vmem:[#allocation87_spill] sm:$0xff] %v19074_v26  ;;  %21573 = vst [vmem:[#allocation92_spill] sm:$0xff] %v19095_v16 }
 0x89b   :  { %14724 = vmatpush3.bf16.msra.mxu1 %v18413_v60  ;;  %v21043_v60 = vand.u32 4294901760, %v18870_v4 }
 0x89c   :  { %14726 = vmatprep.subr.bf16.mxu1 %v18427_v12 }
 0x89f   :  { %14728 = vmatpush3.bf16.msra.mxu1 %v18427_v12  ;;  %v18879_v12 = vld [vmem:[%s20749_s12 + $0x10] sm:$0xff] }
 0x8a0   :  { %14730 = vmatprep.subr.bf16.mxu1 %v18435_v57  ;;  %v21042_v40 = vand.u32 4294901760, %v18879_v12 }
 0x8a2   :  { %v18912_v62 = vpack.c.bf16 %v21041_v59, %v21042_v40  ;;  %v5468_v59 = vand.u32 4294901760, %v5423_v30 }
 0x8a3   :  { %14732 = vmatpush3.bf16.msra.mxu1 %v18435_v57  ;;  %v18892_v57 = vpack.c.bf16 %v21043_v60, %v21044_v21  ;;  %v19017_v60 = vld [vmem:[%s20749_s12 + $0x78] sm:$0xff] }
 0x8a4   :  { %14734 = vmatprep.subr.bf16.mxu1 %v18453_v31  ;;  %21549 = vst [vmem:[#allocation71_spill] sm:$0xff] %v18912_v62  ;;  %v21566_v14 = vand.u32 4294901760, %v19017_v60 }
 0x8a5   :  { %21548 = vst [vmem:[#allocation53_spill] sm:$0xff] %v18892_v57 }
 0x8a7   :  { %14736 = vmatpush3.bf16.msra.mxu1 %v18453_v31  ;;  %v18904_v31 = vld [vmem:[%s20749_s12 + $0x28] sm:$0xff] }
 0x8a8   :  { %14738 = vmatprep.subr.bf16.mxu1 %v18475_v35  ;;  %v21039_v63 = vand.u32 4294901760, %v18904_v31 }
 0x8aa   :  { %v18934_v42 = vpack.c.bf16 %v21039_v63, %v21040_v56  ;;  %v19004_v63 = vld [vmem:[#allocation13 + $0x78] sm:$0xff] }
 0x8ab   :  { %14740 = vmatpush3.bf16.msra.mxu1 %v18475_v35  ;;  %v18924_v35 = vld [vmem:[%s20749_s12 + $0x38] sm:$0xff]  ;;  %v19009_v56 = vld [vmem:[%s20749_s12 + $0x70] sm:$0xff]  ;;  %v5471_v40 = vand.u32 4294901760, %v19004_v63 }
 0x8ac   :  { %14934 = vmatprep.subr.bf16.mxu1 %v18892_v57  ;;  %21550 = vst [vmem:[#allocation78_spill] sm:$0xff] %v18934_v42  ;;  %v21035_v24 = vand.u32 4294901760, %v18924_v35  ;;  %v6251_v21 = vand.u32 4294901760, %v19009_v56 }
 0x8ae   :  { %12564 = vmatmul.mubr.f32.vlgmr.msra.gmra.mrb[12].mxu1 %v18632_v10  ;;  %v18941_v10 = vld [vmem:[%s20749_s12 + $0x40] sm:$0xff]  ;;  %v18955_v39 = vpack.c.bf16 %v21035_v24, %v21036_v41  ;;  %v18999_v41 = vpack.c.bf16 %v5465_v5, %v5462_v25  ;;  %v19046_v29 = vpack.c.bf16 %v21566_v14, %v6251_v21  ;;  %v19113_v5 = vsub.f32 %v5423_v30, %v5468_v59 }
 0x8af   :  { %12566 = vmatprep.mubr.f32.mxu1 %v18656_v0  ;;  %14936 = vmatpush3.bf16.msra.mxu1 %v18892_v57  ;;  %v18946_v0 = vld [vmem:[%s20749_s12 + $0x48] sm:$0xff]  ;;  %v21034_v2 = vand.u32 4294901760, %v18941_v10  ;;  %v19128_v30 = vsub.f32 %v19009_v56, %v6251_v21 }
 0x8b0   :  { %14938 = vmatprep.subr.bf16.mxu1 %v18912_v62  ;;  %21551 = vst [vmem:[#allocation72_spill] sm:$0xff] %v18955_v39  ;;  %v21033_v49 = vand.u32 4294901760, %v18946_v0  ;;  %21555 = vst [vmem:[#allocation80_spill] sm:$0xff] %v18999_v41  ;;  %14766 = vmatprep.subr.bf16.mxu0 %v18999_v41 }
 0x8b1   :  { %14768 = vmatpush3.bf16.msra.mxu0 %v18999_v41  ;;  %v19037_v41 = vpack.c.bf16 %v5471_v40, %v5468_v59  ;;  %21567 = vst [vmem:[#allocation86_spill] sm:$0xff] %v19046_v29  ;;  %21576 = vst [vmem:[#allocation96_spill] sm:$0xff] %v19113_v5  ;;  %v21084_v21 = vand.u32 4294901760, %v19128_v30 }
 0x8b2   :  { %12567 = vmatmul.mubr.f32.gmra.mrb[14].mxu1 %v18651_v38  ;;  %v18965_v38 = vpack.c.bf16 %v21033_v49, %v21034_v2  ;;  %v18994_v49 = vld [vmem:[%s20749_s12 + $0x68] sm:$0xff]  ;;  %v6245_v2 = vand.u32 4294901760, %v18987_v61  ;;  %21578 = vst [vmem:[#allocation98_spill] sm:$0xff] %v19128_v30 }
 0x8b3   :  { %14940 = vmatpush3.bf16.msra.mxu1 %v18912_v62  ;;  %v6248_v24 = vand.u32 4294901760, %v18994_v49  ;;  %21563 = vst [vmem:[#allocation95_spill] sm:$0xff] %v19037_v41  ;;  %14770 = vmatprep.subr.bf16.mxu0 %v19037_v41 }
 0x8b4   :  { %14942 = vmatprep.subr.bf16.mxu1 %v18934_v42  ;;  %21552 = vst [vmem:[#allocation79_spill] sm:$0xff] %v18965_v38 }
 0x8b5   :  { %v19001_v6 = vpack.c.bf16 %v6248_v24, %v6245_v2  ;;  %14772 = vmatpush3.bf16.msra.mxu0 %v19037_v41  ;;  %v5558_v41 = vand.u32 4294901760, %v5557_v23  ;;  %v19083_v23 = vsub.f32 %v5404_v27, %v6242_v45 }
 0x8b7   :  { %14944 = vmatpush3.bf16.msra.mxu1 %v18934_v42  ;;  %21556 = vst [vmem:[#allocation81_spill] sm:$0xff] %v19001_v6  ;;  %21571 = vst [vmem:[#allocation90_spill] sm:$0xff] %v19083_v23  ;;  %v21085_v20 = vand.u32 4294901760, %v19083_v23 }
 0x8b8   :  { %14946 = vmatprep.subr.bf16.mxu1 %v18955_v39 }
 0x8bb   :  { %14948 = vmatpush3.bf16.msra.mxu1 %v18955_v39 }
 0x8bc   :  { %14950 = vmatprep.subr.bf16.mxu1 %v18965_v38 }
 0x8bf   :  { %14952 = vmatpush3.bf16.msra.mxu1 %v18965_v38 }
 0x8c0   :  { %14954 = vmatprep.subr.bf16.mxu1 %v18981_v28 }
 0x8c3   :  { %14956 = vmatpush3.bf16.msra.mxu1 %v18981_v28  ;;  %v21072_v28 = vand.u32 4294901760, %v19025_v17 }
 0x8c4   :  { %14958 = vmatprep.subr.bf16.mxu1 %v19001_v6 }
 0x8c7   :  { %14960 = vmatpush3.bf16.msra.mxu1 %v19001_v6  ;;  %v21564_v6 = vand.u32 4294901760, %v18870_v4 }
 0x8c8   :  { %14962 = vmatprep.subr.bf16.mxu1 %v19046_v29 }
 0x8c9   :  { %v19042_v53 = vsub.f32 %v18870_v4, %v21564_v6  ;;  %v5550_v6 = vsub.f32 %v19025_v17, %v21072_v28  ;;  %v6333_v4 = vsub.f32 %v19035_v54, %v21074_v3  ;;  %v19076_v3 = vsub.f32 %v5420_v33, %v5459_v37 }
 0x8ca   :  { %v19093_v33 = vsub.f32 %v5421_v47, %v5462_v25  ;;  %v19111_v25 = vsub.f32 %v18994_v49, %v6248_v24  ;;  %v19125_v24 = vsub.f32 %v19004_v63, %v5471_v40 }
 0x8cb   :  { %21565 = vst [vmem:[#allocation85_spill] sm:$0xff] %v19042_v53  ;;  %v21077_v43 = vand.u32 4294901760, %v19042_v53  ;;  %14964 = vmatpush3.bf16.msra.mxu1 %v19046_v29  ;;  %v5551_v32 = vand.u32 4294901760, %v5550_v6  ;;  %v6334_v38 = vand.u32 4294901760, %v6333_v4  ;;  %21569 = vst [vmem:[#allocation88_spill] sm:$0xff] %v19076_v3  ;;  %v21089_v29 = vand.u32 4294901760, %v19074_v26 }
 0x8cc   :  { %v19081_v6 = vsub.f32 %v18973_v52, %v6239_v1  ;;  %21572 = vst [vmem:[#allocation91_spill] sm:$0xff] %v19093_v33  ;;  %v6410_v1 = vsub.f32 %v19083_v23, %v21085_v20  ;;  %v21083_v45 = vand.u32 4294901760, %v19093_v33  ;;  %v19106_v4 = vsub.f32 %v18987_v61, %v6245_v2  ;;  %21575 = vst [vmem:[#allocation94_spill] sm:$0xff] %v19111_v25 }
 0x8cd   :  { %v6340_v14 = vsub.f32 %v19042_v53, %v21077_v43  ;;  %v19068_v39 = vpack.c.bf16 %v5558_v41, %v5551_v32  ;;  %v21088_v43 = vand.u32 4294901760, %v19076_v3  ;;  %v21081_v32 = vand.u32 4294901760, %v19095_v16  ;;  %21577 = vst [vmem:[#allocation97_spill] sm:$0xff] %v19125_v24 }
 0x8ce   :  { %21570 = vst [vmem:[#allocation89_spill] sm:$0xff] %v19081_v6  ;;  %21574 = vst [vmem:[#allocation93_spill] sm:$0xff] %v19106_v4  ;;  %v21079_v2 = vand.u32 4294901760, %v19106_v4  ;;  %v21078_v61 = vand.u32 4294901760, %v19111_v25  ;;  %v21082_v63 = vand.u32 4294901760, %v19125_v24  ;;  %v19180_v20 = vpack.c.bf16 %v19083_v23, %v19081_v6 }
 0x8cf   :  { %v6341_v36 = vand.u32 4294901760, %v6340_v14  ;;  %14774 = vmatprep.subr.bf16.mxu0 %v19068_v39  ;;  %v5627_v41 = vsub.f32 %v19076_v3, %v21088_v43  ;;  %v6411_v14 = vand.u32 4294901760, %v6410_v1 }
 0x8d0   :  { %v6424_v1 = vsub.f32 %v19111_v25, %v21078_v61  ;;  %21584 = vst [vmem:[#allocation103_spill] sm:$0xff] %v19180_v20 }
 0x8d1   :  { %v19070_v28 = vpack.c.bf16 %v6341_v36, %v6334_v38  ;;  %v5620_v36 = vsub.f32 %v19074_v26, %v21089_v29  ;;  %v21087_v38 = vand.u32 4294901760, %v19081_v6  ;;  %v5628_v37 = vand.u32 4294901760, %v5627_v41 }
 0x8d2   :  { %v5641_v41 = vsub.f32 %v19095_v16, %v21081_v32  ;;  %v6425_v61 = vand.u32 4294901760, %v6424_v1  ;;  %v21597_v29 = vand.u32 4294901760, %v18718_v51 }
 0x8d3   :  { %14966 = vmatprep.subr.bf16.mxu1 %v19070_v28  ;;  %v5621_v52 = vand.u32 4294901760, %v5620_v36  ;;  %v6403_v27 = vsub.f32 %v19081_v6, %v21087_v38  ;;  %v5634_v36 = vsub.f32 %v19093_v33, %v21083_v45  ;;  %v21595_v38 = vand.u32 4294901760, %v18884_v46 }
 0x8d5   :  { %v19108_v47 = vpack.c.bf16 %v5628_v37, %v5621_v52  ;;  %v6404_v7 = vand.u32 4294901760, %v6403_v27  ;;  %v21080_v52 = vand.u32 4294901760, %v19113_v5  ;;  %v5635_v49 = vand.u32 4294901760, %v5634_v36 }
 0x8d6   :  { %v5642_v37 = vand.u32 4294901760, %v5641_v41  ;;  %v6417_v27 = vsub.f32 %v19106_v4, %v21079_v2  ;;  %v19152_v41 = vpack.c.bf16 %v19030_v15, %v19025_v17  ;;  %v19216_v43 = vsub.f32 %v18884_v46, %v21595_v38 }
 0x8d7   :  { %v19130_v59 = vpack.c.bf16 %v6411_v14, %v6404_v7  ;;  %v5648_v40 = vsub.f32 %v19113_v5, %v21080_v52  ;;  %v21579_v14 = vand.u32 4294901760, %v19017_v60  ;;  %v5655_v52 = vsub.f32 %v19125_v24, %v21082_v63 }
 0x8d8   :  { %v19143_v56 = vpack.c.bf16 %v5642_v37, %v5635_v49  ;;  %v6418_v7 = vand.u32 4294901760, %v6417_v27  ;;  %21581 = vst [vmem:[#allocation100_spill] sm:$0xff] %v19152_v41  ;;  %v6431_v49 = vsub.f32 %v19128_v30, %v21084_v21  ;;  %v19176_v21 = vpack.c.bf16 %v19076_v3, %v19074_v26  ;;  %21596 = vst [vmem:[#allocation111_spill] sm:$0xff] %v19216_v43  ;;  %v21639_v26 = vld [vmem:[#allocation67_spill] sm:$0xff] }
 0x8d9   :  { %v19148_v36 = vsub.f32 %v19017_v60, %v21579_v14  ;;  %v5649_v2 = vand.u32 4294901760, %v5648_v40  ;;  %v19163_v60 = vpack.c.bf16 %v19042_v53, %v19035_v54  ;;  %v5656_v14 = vand.u32 4294901760, %v5655_v52 }
 0x8da   :  { %v19165_v27 = vpack.c.bf16 %v6425_v61, %v6418_v7  ;;  %v6432_v32 = vand.u32 4294901760, %v6431_v49  ;;  %21583 = vst [vmem:[#allocation102_spill] sm:$0xff] %v19176_v21  ;;  %v19184_v61 = vpack.c.bf16 %v19095_v16, %v19093_v33  ;;  %v19188_v52 = vpack.c.bf16 %v19111_v25, %v19106_v4 }
 0x8db   :  { %21580 = vst [vmem:[#allocation99_spill] sm:$0xff] %v19148_v36  ;;  %v21086_v37 = vand.u32 4294901760, %v19148_v36  ;;  %21582 = vst [vmem:[#allocation101_spill] sm:$0xff] %v19163_v60  ;;  %v19170_v40 = vpack.c.bf16 %v5656_v14, %v5649_v2  ;;  %v19196_v2 = vpack.c.bf16 %v19148_v36, %v19128_v30  ;;  %v21591_v49 = vand.u32 4294901760, %v18713_v34 }
 0x8dc   :  { %21585 = vst [vmem:[#allocation104_spill] sm:$0xff] %v19184_v61  ;;  %21586 = vst [vmem:[#allocation105_spill] sm:$0xff] %v19188_v52  ;;  %v21605_v38 = vand.u32 4294901760, %v18738_v18 }
 0x8dd   :  { %v6438_v1 = vsub.f32 %v19148_v36, %v21086_v37  ;;  %21588 = vst [vmem:[#allocation107_spill] sm:$0xff] %v19196_v2  ;;  %v19206_v14 = vsub.f32 %v18713_v34, %v21591_v49  ;;  %v21601_v49 = vand.u32 4294901760, %v18899_v11 }
 0x8df   :  { %v6439_v63 = vand.u32 4294901760, %v6438_v1  ;;  %21592 = vst [vmem:[#allocation109_spill] sm:$0xff] %v19206_v14  ;;  %v21593_v1 = vand.u32 4294901760, %v18879_v12 }
 0x8e1   :  { %v19172_v45 = vpack.c.bf16 %v6439_v63, %v6432_v32  ;;  %v19192_v32 = vpack.c.bf16 %v19125_v24, %v19113_v5  ;;  %v21589_v63 = vand.u32 4294901760, %v18711_v55  ;;  %v19211_v37 = vsub.f32 %v18879_v12, %v21593_v1 }
 0x8e2   :  { %v19231_v12 = vsub.f32 %v18899_v11, %v21601_v49  ;;  %v21603_v1 = vand.u32 4294901760, %v18904_v31  ;;  %v21611_v49 = vand.u32 4294901760, %v18924_v35 }
 0x8e3   :  { %21587 = vst [vmem:[#allocation106_spill] sm:$0xff] %v19192_v32  ;;  %v19201_v7 = vsub.f32 %v18711_v55, %v21589_v63  ;;  %21594 = vst [vmem:[#allocation110_spill] sm:$0xff] %v19211_v37  ;;  %v19221_v55 = vsub.f32 %v18718_v51, %v21597_v29  ;;  %v21599_v63 = vand.u32 4294901760, %v18726_v48  ;;  %v19241_v51 = vsub.f32 %v18738_v18, %v21605_v38 }
 0x8e4   :  { %21602 = vst [vmem:[#allocation114_spill] sm:$0xff] %v19231_v12  ;;  %v19236_v46 = vsub.f32 %v18904_v31, %v21603_v1  ;;  %v21607_v29 = vand.u32 4294901760, %v18740_v58  ;;  %v19256_v31 = vsub.f32 %v18924_v35, %v21611_v49  ;;  %v21613_v1 = vand.u32 4294901760, %v18754_v44 }
 0x8e5   :  { %21590 = vst [vmem:[#allocation108_spill] sm:$0xff] %v19201_v7  ;;  %21598 = vst [vmem:[#allocation112_spill] sm:$0xff] %v19221_v55  ;;  %v19226_v34 = vsub.f32 %v18726_v48, %v21599_v63  ;;  %v21609_v63 = vand.u32 4294901760, %v18919_v8  ;;  %v21615_v38 = vand.u32 4294901760, %v18756_v19  ;;  %v21622_v49 = vand.u32 4294901760, %v19211_v37 }
 0x8e6   :  { %21604 = vst [vmem:[#allocation115_spill] sm:$0xff] %v19236_v46  ;;  %21606 = vst [vmem:[#allocation116_spill] sm:$0xff] %v19241_v51  ;;  %v19246_v48 = vsub.f32 %v18740_v58, %v21607_v29  ;;  %v19261_v18 = vsub.f32 %v18754_v44, %v21613_v1  ;;  %v21617_v29 = vand.u32 4294901760, %v18941_v10  ;;  %v21619_v1 = vand.u32 4294901760, %v18946_v0 }
 0x8e7   :  { %21600 = vst [vmem:[#allocation113_spill] sm:$0xff] %v19226_v34  ;;  %v19251_v11 = vsub.f32 %v18919_v8, %v21609_v63  ;;  %21612 = vst [vmem:[#allocation119_spill] sm:$0xff] %v19256_v31  ;;  %v19266_v58 = vsub.f32 %v18756_v19, %v21615_v38  ;;  %v21092_v63 = vand.u32 4294901760, %v19201_v7  ;;  %v19306_v36 = vsub.f32 %v19211_v37, %v21622_v49 }
 0x8e8   :  { %21608 = vst [vmem:[#allocation117_spill] sm:$0xff] %v19246_v48  ;;  %21614 = vst [vmem:[#allocation120_spill] sm:$0xff] %v19261_v18  ;;  %v19271_v8 = vsub.f32 %v18941_v10, %v21617_v29  ;;  %v19291_v19 = vsub.f32 %v18946_v0, %v21619_v1  ;;  %v21621_v29 = vand.u32 4294901760, %v19206_v14  ;;  %v21623_v44 = vand.u32 4294901760, %v19216_v43 }
 0x8e9   :  { %21610 = vst [vmem:[#allocation118_spill] sm:$0xff] %v19251_v11  ;;  %21616 = vst [vmem:[#allocation121_spill] sm:$0xff] %v19266_v58  ;;  %v19296_v30 = vsub.f32 %v19201_v7, %v21092_v63  ;;  %v21624_v1 = vand.u32 4294901760, %v19221_v55  ;;  %v21625_v10 = vand.u32 4294901760, %v19226_v34  ;;  %v21626_v38 = vand.u32 4294901760, %v19231_v12 }
 0x8ea   :  { %21618 = vst [vmem:[#allocation122_spill] sm:$0xff] %v19271_v8  ;;  %21620 = vst [vmem:[#allocation123_spill] sm:$0xff] %v19291_v19  ;;  %v19301_v35 = vsub.f32 %v19206_v14, %v21621_v29  ;;  %v19311_v0 = vsub.f32 %v19216_v43, %v21623_v44  ;;  %v21627_v24 = vand.u32 4294901760, %v19236_v46  ;;  %v21628_v5 = vand.u32 4294901760, %v19241_v51 }
 0x8eb   :  { %v19316_v63 = vsub.f32 %v19221_v55, %v21624_v1  ;;  %v19321_v29 = vsub.f32 %v19226_v34, %v21625_v10  ;;  %v19326_v49 = vsub.f32 %v19231_v12, %v21626_v38  ;;  %v21629_v25 = vand.u32 4294901760, %v19246_v48 }
 0x8ec   :  { %v19331_v44 = vsub.f32 %v19236_v46, %v21627_v24  ;;  %v19336_v1 = vsub.f32 %v19241_v51, %v21628_v5  ;;  %v21630_v4 = vand.u32 4294901760, %v19251_v11  ;;  %v21631_v16 = vand.u32 4294901760, %v19256_v31 }
 0x8ed   :  { %v19341_v10 = vsub.f32 %v19246_v48, %v21629_v25  ;;  %v21632_v33 = vand.u32 4294901760, %v19261_v18  ;;  %v21633_v23 = vand.u32 4294901760, %v19266_v58  ;;  %v21634_v6 = vand.u32 4294901760, %v19271_v8 }
 0x8ee   :  { %v19346_v38 = vsub.f32 %v19251_v11, %v21630_v4  ;;  %v19351_v24 = vsub.f32 %v19256_v31, %v21631_v16  ;;  %v21638_v16 = vld [vmem:[#allocation66_spill] sm:$0xff] }
 0x8ef   :  { %v19356_v5 = vsub.f32 %v19261_v18, %v21632_v33  ;;  %v19361_v25 = vsub.f32 %v19266_v58, %v21633_v23  ;;  %v19366_v4 = vsub.f32 %v19271_v8, %v21634_v6  ;;  %v21635_v23 = vand.u32 4294901760, %v19291_v19  ;;  %v21637_v6 = vld [vmem:[#allocation65_spill] sm:$0xff]  ;;  %v21640_v33 = vld [vmem:[#allocation68_spill] sm:$0xff] }
 0x8f1   :  { %v19387_v15 = vsub.f32 %v19291_v19, %v21635_v23 }
 0x8f3   :  { %v6397_v37 = vand.u32 4294901760, %v19387_v15  ;;  %v21664_v15 = vand.u32 4294901760, %v19296_v30  ;;  %v21670_v30 = vand.u32 4294901760, %v19326_v49  ;;  %v21676_v49 = vand.u32 4294901760, %v19356_v5 }
 0x981   :  { %v12565_v9 = vpop.f32.mrb[12].mxu1 }
 0x982   :  { %v19389_v17 = vand.u32 4294901760, %v12565_v9  ;;  %v19392_v3 = vmul.f32 %v12565_v9, %v21637_v6  ;;  %v19395_v42 = vmul.f32 %v12565_v9, %v21638_v16  ;;  %v19398_v22 = vmul.f32 %v12565_v9, %v21639_v26  ;;  %v5371_v53 = vpop.f32.mrb[13].mxu1 }
 0x983   :  { %v19401_v62 = vmul.f32 %v12565_v9, %v21640_v33  ;;  %v19403_v54 = vand.u32 4294901760, %v5371_v53  ;;  %v19406_v23 = vmul.f32 %v5371_v53, %v21637_v6  ;;  %v19409_v13 = vmul.f32 %v5371_v53, %v21638_v16 }
 0x984   :  { %21636 = vst [vmem:[#allocation124_spill] sm:$0xff] %v19389_v17  ;;  %v19412_v57 = vsub.f32 %v12565_v9, %v19389_v17  ;;  %v19422_v20 = vmul.f32 %v5371_v53, %v21639_v26  ;;  %v19425_v21 = vmul.f32 %v5371_v53, %v21640_v33  ;;  %v21644_v31 = vand.u32 4294901760, %v19392_v3 }
 0x985   :  { %v19419_v61 = vsub.f32 %v5371_v53, %v19403_v54  ;;  %v12568_v19 = vpop.f32.mrb[14].mxu1  ;;  %v8400_v9 = vand.u32 4294901760, %v19406_v23  ;;  %v21152_v50 = vand.u32 4294901760, %v19409_v13  ;;  %v21646_v48 = vand.u32 4294901760, %v19395_v42 }
 0x986   :  { %21641 = vst [vmem:[#allocation65_spill] sm:$0xff] %v19412_v57  ;;  %v19429_v8 = vand.u32 4294901760, %v12568_v19  ;;  %v8386_v32 = vmul.f32 %v12568_v19, %v21637_v6  ;;  %v5383_v2 = vpop.f32.mrb[15].mxu1  ;;  %v19435_v18 = vmul.f32 %v12568_v19, %v21638_v16  ;;  %v19438_v53 = vmul.f32 %v12568_v19, %v21639_v26 }
 0x987   :  { %21642 = vst [vmem:[#allocation66_spill] sm:$0xff] %v19419_v61  ;;  %v19442_v11 = vpack.c.bf16 %v21644_v31, %v8400_v9  ;;  %v19448_v51 = vpack.c.bf16 %v21646_v48, %v21152_v50  ;;  %v19454_v58 = vmul.f32 %v12568_v19, %v21640_v33  ;;  %v21648_v46 = vand.u32 4294901760, %v19422_v20 }
 0x988   :  { %21643 = vst [vmem:[#allocation67_spill] sm:$0xff] %v19429_v8  ;;  %v19451_v52 = vsub.f32 %v12568_v19, %v19429_v8  ;;  %v21649_v12 = vand.u32 4294901760, %v19398_v22  ;;  %v21651_v31 = vand.u32 4294901760, %v19425_v21  ;;  %v8409_v48 = vand.u32 4294901760, %v8386_v32 }
 0x989   :  { %21645 = vst [vmem:[#allocation68_spill] sm:$0xff] %v19442_v11  ;;  %21647 = vst [vmem:[#allocation125_spill] sm:$0xff] %v19448_v51  ;;  %v21652_v11 = vand.u32 4294901760, %v19401_v62  ;;  %v8421_v50 = vand.u32 4294901760, %v19435_v18  ;;  %v19471_v8 = vand.u32 4294901760, %v5383_v2  ;;  %v8385_v17 = vmul.f32 %v5383_v2, %v21637_v6 }
 0x98a   :  { %v19460_v34 = vpack.c.bf16 %v21649_v12, %v21648_v46  ;;  %v8389_v12 = vmul.f32 %v5383_v2, %v21638_v16  ;;  %v19476_v46 = vmul.f32 %v5383_v2, %v21639_v26  ;;  %v19488_v19 = vand.u32 4294901760, %v19412_v57 }
 0x98b   :  { %v19466_v55 = vpack.c.bf16 %v21652_v11, %v21651_v31  ;;  %21654 = vst [vmem:[#allocation128_spill] sm:$0xff] %v19471_v8  ;;  %v19482_v11 = vand.u32 4294901760, %v19419_v61  ;;  %v19485_v31 = vsub.f32 %v5383_v2, %v19471_v8  ;;  %v8406_v51 = vand.u32 4294901760, %v8385_v17 }
 0x98c   :  { %21650 = vst [vmem:[#allocation126_spill] sm:$0xff] %v19460_v34  ;;  %v19479_v34 = vmul.f32 %v5383_v2, %v21640_v33  ;;  %21656 = vst [vmem:[#allocation130_spill] sm:$0xff] %v19488_v19  ;;  %v19491_v6 = vand.u32 4294901760, %v19451_v52  ;;  %v8418_v16 = vand.u32 4294901760, %v8389_v12  ;;  %v21182_v26 = vand.u32 4294901760, %v19476_v46 }
 0x98d   :  { %21653 = vst [vmem:[#allocation127_spill] sm:$0xff] %v19466_v55  ;;  %21655 = vst [vmem:[#allocation129_spill] sm:$0xff] %v19482_v11  ;;  %v5509_v33 = vsub.f32 %v19419_v61, %v19482_v11  ;;  %v19497_v43 = vpack.c.bf16 %v8409_v48, %v8406_v51  ;;  %v5519_v2 = vsub.f32 %v19412_v57, %v19488_v19  ;;  %v19502_v8 = vand.u32 4294901760, %v19485_v31 }
 0x98e   :  { %v19505_v14 = vpack.c.bf16 %v8421_v50, %v8418_v16  ;;  %v21659_v7 = vand.u32 4294901760, %v19438_v53  ;;  %v21661_v11 = vand.u32 4294901760, %v19479_v34  ;;  %v19571_v5 = vsub.f32 %v8385_v17, %v8406_v51 }
 0x98f   :  { %21657 = vst [vmem:[#allocation131_spill] sm:$0xff] %v19497_v43  ;;  %v21662_v43 = vand.u32 4294901760, %v19454_v58  ;;  %v5510_v19 = vand.u32 4294901760, %v5509_v33  ;;  %v5520_v57 = vand.u32 4294901760, %v5519_v2  ;;  %v5529_v60 = vsub.f32 %v19485_v31, %v19502_v8 }
 0x990   :  { %21658 = vst [vmem:[#allocation132_spill] sm:$0xff] %v19505_v14  ;;  %v19511_v55 = vpack.c.bf16 %v21659_v7, %v21182_v26  ;;  %v21665_v14 = vand.u32 4294901760, %v19301_v35  ;;  %v5539_v7 = vsub.f32 %v19451_v52, %v19491_v6  ;;  %v21666_v26 = vand.u32 4294901760, %v19306_v36 }
 0x991   :  { %v19517_v61 = vpack.c.bf16 %v21662_v43, %v21661_v11  ;;  %12601 = vmatprep.mubr.f32.mxu0 %v5510_v19  ;;  %12829 = vmatprep.mubr.f32.mxu1 %v5510_v19  ;;  %v21667_v43 = vand.u32 4294901760, %v19311_v0  ;;  %v21668_v33 = vand.u32 4294901760, %v19316_v63  ;;  %v21669_v2 = vand.u32 4294901760, %v19321_v29 }
 0x992   :  { %21660 = vst [vmem:[#allocation133_spill] sm:$0xff] %v19511_v55  ;;  %v14777_v41 = vpack.c.bf16 %v21665_v14, %v21664_v15  ;;  %v21671_v35 = vand.u32 4294901760, %v19331_v44  ;;  %12602 = vmatmul.mubr.f32.vlgmr.msra.gmra.mrb[16].mxu0 %v5520_v57  ;;  %12830 = vmatmul.mubr.f32.vlgmr.msra.gmra.mrb[16].mxu1 %v5520_v57  ;;  %v5530_v15 = vand.u32 4294901760, %v5529_v60  ;;  %v21672_v19 = vand.u32 4294901760, %v19336_v1 }
 0x993   :  { %21663 = vst [vmem:[#allocation134_spill] sm:$0xff] %v19517_v61  ;;  %v14969_v11 = vpack.c.bf16 %v21667_v43, %v21666_v26  ;;  %v14781_v61 = vpack.c.bf16 %v21669_v2, %v21668_v33  ;;  %v21673_v36 = vand.u32 4294901760, %v19341_v10  ;;  %v21674_v0 = vand.u32 4294901760, %v19346_v38  ;;  %14776 = vmatpush3.bf16.msra.mxu0 %v19068_v39  ;;  %14968 = vmatpush3.bf16.msra.mxu1 %v19070_v28 }
 0x994   :  { %v14973_v14 = vpack.c.bf16 %v21671_v35, %v21670_v30  ;;  %v21675_v63 = vand.u32 4294901760, %v19351_v24  ;;  %v21677_v44 = vand.u32 4294901760, %v19361_v25  ;;  %v21678_v57 = vand.u32 4294901760, %v19366_v4  ;;  %12604 = vmatprep.mubr.f32.mxu0 %v5530_v15  ;;  %14778 = vmatprep.subr.bf16.mxu0 %v14777_v41 }
 0x995   :  { %v19543_v55 = vpack.c.bf16 %v21673_v36, %v21672_v19  ;;  %v19564_v1 = vsub.f32 %v19406_v23, %v8400_v9  ;;  %v21679_v10 = vand.u32 4294901760, %v19392_v3  ;;  %v5540_v24 = vand.u32 4294901760, %v5539_v7  ;;  %12832 = vmatprep.mubr.f32.mxu1 %v5530_v15  ;;  %14970 = vmatprep.subr.bf16.mxu1 %v14969_v11 }
 0x996   :  { %v19549_v29 = vpack.c.bf16 %v21675_v63, %v21674_v0  ;;  %v19555_v26 = vpack.c.bf16 %v21677_v44, %v21676_v49  ;;  %v19561_v60 = vpack.c.bf16 %v6397_v37, %v21678_v57  ;;  %v19573_v39 = vsub.f32 %v8386_v32, %v8409_v48 }
 0x997   :  { %v19569_v38 = vsub.f32 %v19392_v3, %v21679_v10  ;;  %v21680_v28 = vand.u32 4294901760, %v19409_v13  ;;  %v8523_v25 = vand.u32 4294901760, %v19564_v1  ;;  %v21681_v3 = vand.u32 4294901760, %v19395_v42  ;;  %12605 = vmatmul.mubr.f32.gmra.mrb[18].mxu0 %v5540_v24  ;;  %12833 = vmatmul.mubr.f32.gmra.mrb[18].mxu1 %v5540_v24 }
 0x998   :  { %v19587_v17 = vsub.f32 %v8389_v12, %v8418_v16  ;;  %v8537_v32 = vand.u32 4294901760, %v19571_v5  ;;  %v19593_v9 = vsub.f32 %v19435_v18, %v8421_v50  ;;  %14780 = vmatpush3.bf16.msra.mxu0 %v14777_v41  ;;  %14972 = vmatpush3.bf16.msra.mxu1 %v14969_v11  ;;  %v21682_v49 = vand.u32 4294901760, %v19422_v20 }
 0x999   :  { %v19578_v37 = vsub.f32 %v19409_v13, %v21680_v28  ;;  %v8530_v4 = vand.u32 4294901760, %v19569_v38  ;;  %v19585_v23 = vsub.f32 %v19395_v42, %v21681_v3  ;;  %v8544_v13 = vand.u32 4294901760, %v19573_v39  ;;  %12639 = vmatprep.mubr.f32.mxu0 %v19403_v54  ;;  %12867 = vmatprep.mubr.f32.mxu1 %v19403_v54 }
 0x99a   :  { %v8524_v42 = vsub.f32 %v19564_v1, %v8523_v25  ;;  %v8565_v16 = vand.u32 4294901760, %v19587_v17  ;;  %v8538_v50 = vsub.f32 %v19571_v5, %v8537_v32  ;;  %v8572_v7 = vand.u32 4294901760, %v19593_v9  ;;  %14782 = vmatprep.subr.bf16.mxu0 %v14781_v61  ;;  %14974 = vmatprep.subr.bf16.mxu1 %v14973_v14 }
 0x99b   :  { %v8551_v51 = vand.u32 4294901760, %v19578_v37  ;;  %v8531_v48 = vsub.f32 %v19569_v38, %v8530_v4  ;;  %v8558_v12 = vand.u32 4294901760, %v19585_v23  ;;  %v8545_v41 = vsub.f32 %v19573_v39, %v8544_v13 }
 0x99c   :  { %v8525_v43 = vand.u32 4294901760, %v8524_v42  ;;  %v8566_v2 = vsub.f32 %v19587_v17, %v8565_v16  ;;  %v8539_v30 = vand.u32 4294901760, %v8538_v50  ;;  %v8573_v19 = vsub.f32 %v19593_v9, %v8572_v7  ;;  %14784 = vmatpush3.bf16.msra.mxu0 %v14781_v61  ;;  %14976 = vmatpush3.bf16.msra.mxu1 %v14973_v14 }
 0x99d   :  { %v8552_v18 = vsub.f32 %v19578_v37, %v8551_v51  ;;  %v8532_v11 = vand.u32 4294901760, %v8531_v48  ;;  %v8559_v33 = vsub.f32 %v19585_v23, %v8558_v12  ;;  %v8546_v35 = vand.u32 4294901760, %v8545_v41  ;;  %14786 = vmatprep.subr.bf16.mxu0 %v19543_v55  ;;  %14978 = vmatprep.subr.bf16.mxu1 %v19549_v29 }
 0x99e   :  { %v8567_v63 = vand.u32 4294901760, %v8566_v2  ;;  %v19629_v44 = vsub.f32 %v19422_v20, %v21682_v49  ;;  %v8574_v10 = vand.u32 4294901760, %v8573_v19  ;;  %v21683_v24 = vand.u32 4294901760, %v19398_v22 }
 0x99f   :  { %v8553_v15 = vand.u32 4294901760, %v8552_v18  ;;  %v19624_v36 = vpack.c.bf16 %v8532_v11, %v8525_v43  ;;  %v8560_v0 = vand.u32 4294901760, %v8559_v33  ;;  %v19633_v57 = vpack.c.bf16 %v8546_v35, %v8539_v30 }
 0x9a0   :  { %v8585_v61 = vsub.f32 %v19398_v22, %v21683_v24  ;;  %v21684_v14 = vand.u32 4294901760, %v19476_v46  ;;  %v8579_v20 = vand.u32 4294901760, %v19629_v44  ;;  %v21685_v42 = vand.u32 4294901760, %v19438_v53  ;;  %14788 = vmatpush3.bf16.msra.mxu0 %v19543_v55  ;;  %14980 = vmatpush3.bf16.msra.mxu1 %v19549_v29 }
 0x9a1   :  { %v19641_v3 = vpack.c.bf16 %v8560_v0, %v8553_v15  ;;  %v21686_v50 = vand.u32 4294901760, %v19425_v21  ;;  %v19650_v18 = vpack.c.bf16 %v8574_v10, %v8567_v63  ;;  %v21687_v11 = vand.u32 4294901760, %v19401_v62  ;;  %14790 = vmatprep.subr.bf16.mxu0 %v19555_v26  ;;  %14982 = vmatprep.subr.bf16.mxu1 %v19561_v60 }
 0x9a2   :  { %v8592_v28 = vsub.f32 %v19476_v46, %v21684_v14  ;;  %v8599_v48 = vsub.f32 %v19438_v53, %v21685_v42  ;;  %v8586_v43 = vand.u32 4294901760, %v8585_v61  ;;  %v8580_v33 = vsub.f32 %v19629_v44, %v8579_v20 }
 0x9a3   :  { %v8606_v41 = vsub.f32 %v19425_v21, %v21686_v50  ;;  %v8613_v46 = vsub.f32 %v19401_v62, %v21687_v11  ;;  %v21688_v30 = vand.u32 4294901760, %v19479_v34  ;;  %v21689_v62 = vand.u32 4294901760, %v19454_v58 }
 0x9a4   :  { %v8593_v22 = vand.u32 4294901760, %v8592_v28  ;;  %v8600_v2 = vand.u32 4294901760, %v8599_v48  ;;  %v8587_v35 = vsub.f32 %v8585_v61, %v8586_v43  ;;  %v8581_v29 = vand.u32 4294901760, %v8580_v33  ;;  %14792 = vmatpush3.bf16.msra.mxu0 %v19555_v26  ;;  %14984 = vmatpush3.bf16.msra.mxu1 %v19561_v60 }
 0x9a5   :  { %v8607_v53 = vand.u32 4294901760, %v8606_v41  ;;  %v8620_v21 = vsub.f32 %v19479_v34, %v21688_v30  ;;  %v8614_v19 = vand.u32 4294901760, %v8613_v46  ;;  %v8627_v55 = vsub.f32 %v19454_v58, %v21689_v62  ;;  %14794 = vmatprep.subr.bf16.mxu0 %v19108_v47  ;;  %14986 = vmatprep.subr.bf16.mxu1 %v19130_v59 }
 0x9a6   :  { %v8594_v15 = vsub.f32 %v8592_v28, %v8593_v22  ;;  %v8601_v0 = vsub.f32 %v8599_v48, %v8600_v2  ;;  %v8588_v10 = vand.u32 4294901760, %v8587_v35  ;;  %v19670_v30 = vpack.c.bf16 %v19569_v38, %v19564_v1 }
 0x9a7   :  { %v8608_v63 = vsub.f32 %v8606_v41, %v8607_v53  ;;  %v8621_v49 = vand.u32 4294901760, %v8620_v21  ;;  %v8615_v14 = vsub.f32 %v8613_v46, %v8614_v19  ;;  %v8628_v42 = vand.u32 4294901760, %v8627_v55 }
 0x9a8   :  { %v8595_v24 = vand.u32 4294901760, %v8594_v15  ;;  %v8602_v34 = vand.u32 4294901760, %v8601_v0  ;;  %v19674_v58 = vpack.c.bf16 %v8588_v10, %v8581_v29  ;;  %v19678_v26 = vpack.c.bf16 %v19573_v39, %v19571_v5  ;;  %14796 = vmatpush3.bf16.msra.mxu0 %v19108_v47  ;;  %14988 = vmatpush3.bf16.msra.mxu1 %v19130_v59 }
 0x9a9   :  { %v8609_v50 = vand.u32 4294901760, %v8608_v63  ;;  %v8622_v11 = vsub.f32 %v8620_v21, %v8621_v49  ;;  %v8616_v33 = vand.u32 4294901760, %v8615_v14  ;;  %v8629_v35 = vsub.f32 %v8627_v55, %v8628_v42  ;;  %14798 = vmatprep.subr.bf16.mxu0 %v19143_v56  ;;  %14990 = vmatprep.subr.bf16.mxu1 %v19165_v27 }
 0x9aa   :  { %v19680_v60 = vpack.c.bf16 %v8602_v34, %v8595_v24  ;;  %v19684_v62 = vpack.c.bf16 %v19585_v23, %v19578_v37  ;;  %v19688_v0 = vpack.c.bf16 %v19593_v9, %v19587_v17  ;;  %v19693_v10 = vpack.c.bf16 %v8585_v61, %v19629_v44  ;;  %v21700_v37 = vld [vmem:[#allocation100_spill] sm:$0xff]  ;;  %v21703_v17 = vld [vmem:[#allocation109_spill] sm:$0xff] }
 0x9ab   :  { %v8623_v15 = vand.u32 4294901760, %v8622_v11  ;;  %v19690_v63 = vpack.c.bf16 %v8616_v33, %v8609_v50  ;;  %v8630_v29 = vand.u32 4294901760, %v8629_v35  ;;  %v19695_v14 = vpack.c.bf16 %v8599_v48, %v8592_v28  ;;  %v21702_v23 = vld [vmem:[#allocation108_spill] sm:$0xff]  ;;  %v21712_v28 = vld [vmem:[#allocation67_spill] sm:$0xff]  ;;  %v21722_v11 = vld [vmem:[#allocation102_spill] sm:$0xff] }
 0x9ac   :  { %v19699_v24 = vpack.c.bf16 %v8613_v46, %v8606_v41  ;;  %v19701_v34 = vpack.c.bf16 %v8627_v55, %v8620_v21  ;;  %v19707_v50 = vpack.c.bf16 %v8530_v4, %v8523_v25  ;;  %v19717_v47 = vpack.c.bf16 %v8544_v13, %v8537_v32  ;;  %14800 = vmatpush3.bf16.msra.mxu0 %v19143_v56  ;;  %v21701_v4 = vld [vmem:[#allocation101_spill] sm:$0xff]  ;;  %v21704_v13 = vld [vmem:[#allocation110_spill] sm:$0xff]  ;;  %v21706_v9 = vld [vmem:[#allocation124_spill] sm:$0xff] }
 0x9ad   :  { %v19711_v44 = vpack.c.bf16 %v8630_v29, %v8623_v15  ;;  %v19723_v59 = vpack.c.bf16 %v8558_v12, %v8551_v51  ;;  %v19729_v1 = vpack.c.bf16 %v8572_v7, %v8565_v16  ;;  %v19731_v38 = vpack.c.bf16 %v8586_v43, %v8579_v20  ;;  %14992 = vmatpush3.bf16.msra.mxu1 %v19165_v27  ;;  %v21705_v51 = vld [vmem:[#allocation111_spill] sm:$0xff]  ;;  %v21707_v27 = vld [vmem:[#allocation128_spill] sm:$0xff]  ;;  %v21710_v16 = vld [vmem:[#allocation114_spill] sm:$0xff] }
 0x9ae   :  { %21690 = vst [vmem:[#allocation135_spill] sm:$0xff] %v19699_v24  ;;  %21691 = vst [vmem:[#allocation136_spill] sm:$0xff] %v19701_v34  ;;  %v19733_v25 = vpack.c.bf16 %v8600_v2, %v8593_v22  ;;  %v19735_v5 = vpack.c.bf16 %v8614_v19, %v8607_v53  ;;  %v19737_v39 = vpack.c.bf16 %v8628_v42, %v8621_v49  ;;  %14802 = vmatprep.subr.bf16.mxu0 %v19170_v40  ;;  %v21711_v7 = vld [vmem:[#allocation115_spill] sm:$0xff]  ;;  %v21713_v20 = vld [vmem:[#allocation66_spill] sm:$0xff] }
 0x9af   :  { %21692 = vst [vmem:[#allocation137_spill] sm:$0xff] %v19707_v50  ;;  %21693 = vst [vmem:[#allocation138_spill] sm:$0xff] %v19717_v47  ;;  %14994 = vmatprep.subr.bf16.mxu1 %v19172_v45  ;;  %v14809_v32 = vpack.c.bf16 %v21703_v17, %v21702_v23  ;;  %v15001_v56 = vpack.c.bf16 %v21705_v51, %v21704_v13  ;;  %v15005_v61 = vpack.c.bf16 %v21711_v7, %v21710_v16  ;;  %v21714_v48 = vld [vmem:[#allocation116_spill] sm:$0xff]  ;;  %v21715_v41 = vld [vmem:[#allocation117_spill] sm:$0xff] }
 0x9b0   :  { %21694 = vst [vmem:[#allocation139_spill] sm:$0xff] %v19723_v59  ;;  %21695 = vst [vmem:[#allocation140_spill] sm:$0xff] %v19729_v1  ;;  %14804 = vmatpush3.bf16.msra.mxu0 %v19170_v40  ;;  %v21709_v40 = vld [vmem:[#allocation113_spill] sm:$0xff]  ;;  %v14817_v43 = vpack.c.bf16 %v21715_v41, %v21714_v48  ;;  %v21716_v22 = vld [vmem:[#allocation118_spill] sm:$0xff]  ;;  %v21754_v34 = vand.u32 4294901760, %v21702_v23  ;;  %v21762_v23 = vand.u32 4294901760, %v21711_v7 }
 0x9b1   :  { %21696 = vst [vmem:[#allocation141_spill] sm:$0xff] %v19731_v38  ;;  %21697 = vst [vmem:[#allocation142_spill] sm:$0xff] %v19733_v25  ;;  %14996 = vmatpush3.bf16.msra.mxu1 %v19172_v45  ;;  %14806 = vmatprep.subr.bf16.mxu0 %v21700_v37  ;;  %v21708_v45 = vld [vmem:[#allocation112_spill] sm:$0xff]  ;;  %v21717_v46 = vld [vmem:[#allocation119_spill] sm:$0xff] }
 0x9b2   :  { %21698 = vst [vmem:[#allocation143_spill] sm:$0xff] %v19735_v5  ;;  %21699 = vst [vmem:[#allocation144_spill] sm:$0xff] %v19737_v39  ;;  %14998 = vmatprep.subr.bf16.mxu1 %v21701_v4  ;;  %v14813_v12 = vpack.c.bf16 %v21709_v40, %v21708_v45  ;;  %v15009_v2 = vpack.c.bf16 %v21717_v46, %v21716_v22  ;;  %v21718_v53 = vld [vmem:[#allocation120_spill] sm:$0xff]  ;;  %v21719_v21 = vld [vmem:[#allocation121_spill] sm:$0xff] }
 0x9b3   :  { %12640 = vmatmul.mubr.f32.vlgmr.msra.gmra.mrb[16].mxu0 %v21706_v9  ;;  %v14821_v19 = vpack.c.bf16 %v21719_v21, %v21718_v53  ;;  %v21720_v55 = vld [vmem:[#allocation122_spill] sm:$0xff]  ;;  %v21721_v49 = vld [vmem:[#allocation123_spill] sm:$0xff]  ;;  %v21724_v35 = vld [vmem:[#allocation104_spill] sm:$0xff] }
 0x9b4   :  { %12868 = vmatmul.mubr.f32.vlgmr.msra.gmra.mrb[16].mxu1 %v21706_v9  ;;  %12642 = vmatprep.mubr.f32.mxu0 %v21707_v27  ;;  %v15013_v42 = vpack.c.bf16 %v21721_v49, %v21720_v55  ;;  %v21723_v33 = vld [vmem:[#allocation103_spill] sm:$0xff]  ;;  %v21725_v15 = vld [vmem:[#allocation105_spill] sm:$0xff]  ;;  %v21726_v29 = vld [vmem:[#allocation106_spill] sm:$0xff]  ;;  %v21770_v7 = vand.u32 4294901760, %v21721_v49 }
 0x9b5   :  { %14808 = vmatpush3.bf16.msra.mxu0 %v21700_v37  ;;  %12870 = vmatprep.mubr.f32.mxu1 %v21707_v27  ;;  %v21727_v37 = vld [vmem:[#allocation107_spill] sm:$0xff]  ;;  %v21749_v25 = vld [vmem:[#allocation86_spill] sm:$0xff]  ;;  %v21750_v38 = vld [vmem:[#allocation84_spill] sm:$0xff] }
 0x9b6   :  { %15000 = vmatpush3.bf16.msra.mxu1 %v21701_v4  ;;  %14810 = vmatprep.subr.bf16.mxu0 %v14809_v32  ;;  %v21728_v4 = vld [vmem:[#allocation48_spill] sm:$0xff]  ;;  %v21751_v1 = vand.u32 4294901760, %v21750_v38  ;;  %v21752_v59 = vld [vmem:[#allocation85_spill] sm:$0xff]  ;;  %v21758_v38 = vand.u32 4294901760, %v21705_v51  ;;  %v21766_v51 = vand.u32 4294901760, %v21717_v46 }
 0x9b7   :  { %15002 = vmatprep.subr.bf16.mxu1 %v15001_v56  ;;  %12643 = vmatmul.mubr.f32.gmra.mrb[18].mxu0 %v21712_v28  ;;  %v21753_v47 = vand.u32 4294901760, %v21752_v59  ;;  %v21773_v46 = vld [vmem:[#allocation88_spill] sm:$0xff] }
 0x9b8   :  { %12871 = vmatmul.mubr.f32.gmra.mrb[18].mxu1 %v21712_v28  ;;  %12677 = vmatprep.mubr.f32.mxu0 %v21713_v20 }
 0x9b9   :  { %14812 = vmatpush3.bf16.msra.mxu0 %v14809_v32  ;;  %12905 = vmatprep.mubr.f32.mxu1 %v21713_v20  ;;  %v21729_v32 = vld [vmem:[#allocation53_spill] sm:$0xff]  ;;  %v15061_v50 = vpack.c.bf16 %v21753_v47, %v21751_v1  ;;  %v21759_v47 = vand.u32 4294901760, %v21708_v45  ;;  %v21761_v1 = vand.u32 4294901760, %v21710_v16  ;;  %v21769_v16 = vand.u32 4294901760, %v21720_v55  ;;  %v21779_v55 = vld [vmem:[#allocation91_spill] sm:$0xff] }
 0x9ba   :  { %15004 = vmatpush3.bf16.msra.mxu1 %v15001_v56  ;;  %14814 = vmatprep.subr.bf16.mxu0 %v14813_v12  ;;  %v21730_v56 = vld [vmem:[#allocation65_spill] sm:$0xff]  ;;  %v21780_v49 = vand.u32 4294901760, %v21779_v55 }
 0x9bb   :  { %15006 = vmatprep.subr.bf16.mxu1 %v15005_v61  ;;  %v21733_v20 = vld [vmem:[#allocation129_spill] sm:$0xff] }
 0x9bd   :  { %14816 = vmatpush3.bf16.msra.mxu0 %v14813_v12  ;;  %v21731_v12 = vld [vmem:[#allocation49_spill] sm:$0xff] }
 0x9be   :  { %15008 = vmatpush3.bf16.msra.mxu1 %v15005_v61  ;;  %14818 = vmatprep.subr.bf16.mxu0 %v14817_v43  ;;  %v21732_v61 = vld [vmem:[#allocation71_spill] sm:$0xff] }
 0x9bf   :  { %15010 = vmatprep.subr.bf16.mxu1 %v15009_v2 }
 0x9c1   :  { %14820 = vmatpush3.bf16.msra.mxu0 %v14817_v43  ;;  %v21734_v43 = vld [vmem:[#allocation50_spill] sm:$0xff] }
 0x9c2   :  { %15012 = vmatpush3.bf16.msra.mxu1 %v15009_v2  ;;  %14822 = vmatprep.subr.bf16.mxu0 %v14821_v19  ;;  %v21736_v2 = vld [vmem:[#allocation51_spill] sm:$0xff] }
 0x9c3   :  { %15014 = vmatprep.subr.bf16.mxu1 %v15013_v42 }
 0x9c5   :  { %14824 = vmatpush3.bf16.msra.mxu0 %v14821_v19  ;;  %v21737_v19 = vld [vmem:[#allocation72_spill] sm:$0xff] }
 0x9c6   :  { %15016 = vmatpush3.bf16.msra.mxu1 %v15013_v42  ;;  %14826 = vmatprep.subr.bf16.mxu0 %v21722_v11  ;;  %v21739_v42 = vld [vmem:[#allocation79_spill] sm:$0xff] }
 0x9c7   :  { %15018 = vmatprep.subr.bf16.mxu1 %v21723_v33 }
 0x9c9   :  { %14828 = vmatpush3.bf16.msra.mxu0 %v21722_v11  ;;  %v21740_v11 = vld [vmem:[#allocation73_spill] sm:$0xff] }
 0x9ca   :  { %15020 = vmatpush3.bf16.msra.mxu1 %v21723_v33  ;;  %14830 = vmatprep.subr.bf16.mxu0 %v21724_v35  ;;  %v21741_v33 = vld [vmem:[#allocation74_spill] sm:$0xff] }
 0x9cb   :  { %15022 = vmatprep.subr.bf16.mxu1 %v21725_v15 }
 0x9cd   :  { %14832 = vmatpush3.bf16.msra.mxu0 %v21724_v35  ;;  %v21742_v35 = vld [vmem:[#allocation80_spill] sm:$0xff] }
 0x9ce   :  { %15024 = vmatpush3.bf16.msra.mxu1 %v21725_v15  ;;  %14834 = vmatprep.subr.bf16.mxu0 %v21726_v29  ;;  %v21743_v15 = vld [vmem:[#allocation81_spill] sm:$0xff] }
 0x9cf   :  { %15026 = vmatprep.subr.bf16.mxu1 %v21727_v37 }
 0x9d1   :  { %14836 = vmatpush3.bf16.msra.mxu0 %v21726_v29  ;;  %v21744_v29 = vld [vmem:[#allocation95_spill] sm:$0xff] }
 0x9d2   :  { %15028 = vmatpush3.bf16.msra.mxu1 %v21727_v37  ;;  %14838 = vmatprep.subr.bf16.mxu0 %v21728_v4  ;;  %v21745_v37 = vld [vmem:[#allocation82_spill] sm:$0xff] }
 0x9d3   :  { %15030 = vmatprep.subr.bf16.mxu1 %v21729_v32 }
 0x9d4   :  { %12678 = vmatmul.mubr.f32.vlgmr.msra.gmra.mrb[16].mxu0 %v21730_v56 }
 0x9d5   :  { %12906 = vmatmul.mubr.f32.vlgmr.msra.gmra.mrb[16].mxu1 %v21730_v56  ;;  %12680 = vmatprep.mubr.f32.mxu0 %v19485_v31  ;;  %v21746_v56 = vand.u32 4294901760, %v21745_v37  ;;  %v21755_v37 = vand.u32 4294901760, %v21703_v17  ;;  %v15069_v17 = vpack.c.bf16 %v21762_v23, %v21761_v1  ;;  %v21783_v1 = vld [vmem:[#allocation93_spill] sm:$0xff] }
 0x9d6   :  { %14840 = vmatpush3.bf16.msra.mxu0 %v21728_v4  ;;  %12908 = vmatprep.mubr.f32.mxu1 %v19485_v31  ;;  %v21735_v31 = vld [vmem:[#allocation78_spill] sm:$0xff]  ;;  %v21784_v23 = vand.u32 4294901760, %v21783_v1 }
 0x9d7   :  { %15032 = vmatpush3.bf16.msra.mxu1 %v21729_v32  ;;  %14842 = vmatprep.subr.bf16.mxu0 %v21731_v12  ;;  %v14873_v24 = vpack.c.bf16 %v21755_v37, %v21754_v34  ;;  %v21760_v34 = vand.u32 4294901760, %v21709_v40  ;;  %v21774_v37 = vand.u32 4294901760, %v21773_v46 }
 0x9d8   :  { %12681 = vmatmul.mubr.f32.gmra.mrb[18].mxu0 %v19451_v52  ;;  %15034 = vmatprep.subr.bf16.mxu1 %v21732_v61 }
 0x9d9   :  { %12909 = vmatmul.mubr.f32.gmra.mrb[18].mxu1 %v19451_v52  ;;  %12715 = vmatprep.mubr.f32.mxu0 %v21733_v20  ;;  %v21738_v52 = vld [vmem:[#allocation52_spill] sm:$0xff]  ;;  %v14877_v59 = vpack.c.bf16 %v21760_v34, %v21759_v47 }
 0x9da   :  { %14844 = vmatpush3.bf16.msra.mxu0 %v21731_v12  ;;  %12943 = vmatprep.mubr.f32.mxu1 %v21733_v20  ;;  %v21747_v20 = vld [vmem:[#allocation83_spill] sm:$0xff]  ;;  %v21781_v47 = vld [vmem:[#allocation92_spill] sm:$0xff] }
 0x9db   :  { %15036 = vmatpush3.bf16.msra.mxu1 %v21732_v61  ;;  %14846 = vmatprep.subr.bf16.mxu0 %v21734_v43  ;;  %v21748_v39 = vand.u32 4294901760, %v21747_v20  ;;  %v21756_v20 = vld [vmem:[#allocation130_spill] sm:$0xff]  ;;  %v21782_v34 = vand.u32 4294901760, %v21781_v47 }
 0x9dc   :  { %15038 = vmatprep.subr.bf16.mxu1 %v21735_v31 }
 0x9dd   :  { %v14869_v5 = vpack.c.bf16 %v21748_v39, %v21746_v56  ;;  %v21757_v39 = vand.u32 4294901760, %v21704_v13  ;;  %v21765_v13 = vand.u32 4294901760, %v21716_v22 }
 0x9de   :  { %14848 = vmatpush3.bf16.msra.mxu0 %v21734_v43 }
 0x9df   :  { %15040 = vmatpush3.bf16.msra.mxu1 %v21735_v31  ;;  %14850 = vmatprep.subr.bf16.mxu0 %v21736_v2  ;;  %v15065_v56 = vpack.c.bf16 %v21758_v38, %v21757_v39  ;;  %v15073_v45 = vpack.c.bf16 %v21766_v51, %v21765_v13  ;;  %v21775_v39 = vld [vmem:[#allocation89_spill] sm:$0xff]  ;;  %v21777_v38 = vld [vmem:[#allocation90_spill] sm:$0xff] }
 0x9e0   :  { %15042 = vmatprep.subr.bf16.mxu1 %v21737_v19  ;;  %v21789_v51 = vld [vmem:[#allocation97_spill] sm:$0xff] }
 0x9e2   :  { %14852 = vmatpush3.bf16.msra.mxu0 %v21736_v2 }
 0x9e3   :  { %15044 = vmatpush3.bf16.msra.mxu1 %v21737_v19  ;;  %14854 = vmatprep.subr.bf16.mxu0 %v21738_v52 }
 0x9e4   :  { %15046 = vmatprep.subr.bf16.mxu1 %v21739_v42 }
 0x9e6   :  { %14856 = vmatpush3.bf16.msra.mxu0 %v21738_v52 }
 0x9e7   :  { %15048 = vmatpush3.bf16.msra.mxu1 %v21739_v42  ;;  %14858 = vmatprep.subr.bf16.mxu0 %v21740_v11 }
 0x9e8   :  { %15050 = vmatprep.subr.bf16.mxu1 %v21741_v33 }
 0x9ea   :  { %14860 = vmatpush3.bf16.msra.mxu0 %v21740_v11 }
 0x9eb   :  { %15052 = vmatpush3.bf16.msra.mxu1 %v21741_v33  ;;  %14862 = vmatprep.subr.bf16.mxu0 %v21742_v35 }
 0x9ec   :  { %15054 = vmatprep.subr.bf16.mxu1 %v21743_v15 }
 0x9ee   :  { %14864 = vmatpush3.bf16.msra.mxu0 %v21742_v35 }
 0x9ef   :  { %15056 = vmatpush3.bf16.msra.mxu1 %v21743_v15  ;;  %14866 = vmatprep.subr.bf16.mxu0 %v21744_v29 }
 0x9f0   :  { %15058 = vmatprep.subr.bf16.mxu1 %v21749_v25 }
 0x9f2   :  { %14868 = vmatpush3.bf16.msra.mxu0 %v21744_v29 }
 0x9f3   :  { %15060 = vmatpush3.bf16.msra.mxu1 %v21749_v25  ;;  %14870 = vmatprep.subr.bf16.mxu0 %v14869_v5 }
 0x9f4   :  { %15062 = vmatprep.subr.bf16.mxu1 %v15061_v50 }
 0x9f5   :  { %12716 = vmatmul.mubr.f32.vlgmr.msra.gmra.mrb[16].mxu0 %v21756_v20 }
 0x9f6   :  { %12944 = vmatmul.mubr.f32.vlgmr.msra.gmra.mrb[16].mxu1 %v21756_v20  ;;  %12718 = vmatprep.mubr.f32.mxu0 %v19502_v8 }
 0x9f7   :  { %14872 = vmatpush3.bf16.msra.mxu0 %v14869_v5  ;;  %12946 = vmatprep.mubr.f32.mxu1 %v19502_v8  ;;  %v21763_v8 = vand.u32 4294901760, %v21714_v48  ;;  %v15077_v48 = vpack.c.bf16 %v21770_v7, %v21769_v16  ;;  %v21793_v16 = vld [vmem:[#allocation99_spill] sm:$0xff] }
 0x9f8   :  { %15064 = vmatpush3.bf16.msra.mxu1 %v15061_v50  ;;  %14874 = vmatprep.subr.bf16.mxu0 %v14873_v24  ;;  %v21764_v50 = vand.u32 4294901760, %v21715_v41  ;;  %v21771_v41 = vld [vmem:[#allocation87_spill] sm:$0xff]  ;;  %v21794_v7 = vand.u32 4294901760, %v21793_v16 }
 0x9f9   :  { %12719 = vmatmul.mubr.f32.gmra.mrb[18].mxu0 %v19491_v6  ;;  %15066 = vmatprep.subr.bf16.mxu1 %v15065_v56  ;;  %v21772_v22 = vand.u32 4294901760, %v21771_v41 }
 0x9fa   :  { %12947 = vmatmul.mubr.f32.gmra.mrb[18].mxu1 %v19491_v6  ;;  %12753 = vmatprep.mubr.f32.mxu0 %v19403_v54  ;;  %v14881_v5 = vpack.c.bf16 %v21764_v50, %v21763_v8  ;;  %v21767_v6 = vand.u32 4294901760, %v21718_v53  ;;  %v21776_v53 = vand.u32 4294901760, %v21775_v39 }
 0x9fb   :  { %14876 = vmatpush3.bf16.msra.mxu0 %v14873_v24  ;;  %12981 = vmatprep.mubr.f32.mxu1 %v19403_v54  ;;  %v21768_v24 = vand.u32 4294901760, %v21719_v21  ;;  %v14889_v20 = vpack.c.bf16 %v21774_v37, %v21772_v22  ;;  %v21778_v21 = vand.u32 4294901760, %v21777_v38  ;;  %v16037_v37 = vld [vmem:[#allocation5 + $0x10] sm:$0xff] }
 0x9fc   :  { %15068 = vmatpush3.bf16.msra.mxu1 %v15065_v56  ;;  %14878 = vmatprep.subr.bf16.mxu0 %v14877_v59 }
 0x9fd   :  { %15070 = vmatprep.subr.bf16.mxu1 %v15069_v17  ;;  %v14885_v40 = vpack.c.bf16 %v21768_v24, %v21767_v6  ;;  %v15081_v56 = vpack.c.bf16 %v21778_v21, %v21776_v53  ;;  %v21791_v24 = vld [vmem:[#allocation98_spill] sm:$0xff]  ;;  %v16038_v53 = vld [vmem:[#allocation5 + $0x18] sm:$0xff] }
 0x9ff   :  { %14880 = vmatpush3.bf16.msra.mxu0 %v14877_v59  ;;  %v14893_v59 = vpack.c.bf16 %v21782_v34, %v21780_v49 }
 0xa00   :  { %15072 = vmatpush3.bf16.msra.mxu1 %v15069_v17  ;;  %14882 = vmatprep.subr.bf16.mxu0 %v14881_v5  ;;  %v21785_v17 = vld [vmem:[#allocation94_spill] sm:$0xff] }
 0xa01   :  { %15074 = vmatprep.subr.bf16.mxu1 %v15073_v45  ;;  %v21786_v8 = vand.u32 4294901760, %v21785_v17 }
 0xa03   :  { %14884 = vmatpush3.bf16.msra.mxu0 %v14881_v5  ;;  %v15085_v50 = vpack.c.bf16 %v21786_v8, %v21784_v23  ;;  %v21787_v5 = vld [vmem:[#allocation96_spill] sm:$0xff] }
 0xa04   :  { %15076 = vmatpush3.bf16.msra.mxu1 %v15073_v45  ;;  %14886 = vmatprep.subr.bf16.mxu0 %v14885_v40  ;;  %v21788_v13 = vand.u32 4294901760, %v21787_v5  ;;  %v21790_v45 = vand.u32 4294901760, %v21789_v51 }
 0xa05   :  { %15078 = vmatprep.subr.bf16.mxu1 %v15077_v48 }
 0xa06   :  { %v14897_v6 = vpack.c.bf16 %v21790_v45, %v21788_v13 }
 0xa07   :  { %14888 = vmatpush3.bf16.msra.mxu0 %v14885_v40  ;;  %v21792_v40 = vand.u32 4294901760, %v21791_v24 }
 0xa08   :  { %15080 = vmatpush3.bf16.msra.mxu1 %v15077_v48  ;;  %14890 = vmatprep.subr.bf16.mxu0 %v14889_v20 }
 0xa09   :  { %15082 = vmatprep.subr.bf16.mxu1 %v15081_v56  ;;  %v15089_v48 = vpack.c.bf16 %v21794_v7, %v21792_v40 }
 0xa0b   :  { %14892 = vmatpush3.bf16.msra.mxu0 %v14889_v20 }
 0xa0c   :  { %15084 = vmatpush3.bf16.msra.mxu1 %v15081_v56  ;;  %14894 = vmatprep.subr.bf16.mxu0 %v14893_v59 }
 0xa0d   :  { %15086 = vmatprep.subr.bf16.mxu1 %v15085_v50 }
 0xa0f   :  { %14896 = vmatpush3.bf16.msra.mxu0 %v14893_v59 }
 0xa10   :  { %15088 = vmatpush3.bf16.msra.mxu1 %v15085_v50  ;;  %14898 = vmatprep.subr.bf16.mxu0 %v14897_v6 }
 0xa11   :  { %15090 = vmatprep.subr.bf16.mxu1 %v15089_v48 }
 0xa13   :  { %14900 = vmatpush3.bf16.msra.mxu0 %v14897_v6 }
 0xa14   :  { %15092 = vmatpush3.bf16.msra.mxu1 %v15089_v48  ;;  %14902 = vmatprep.subr.bf16.mxu0 %v21728_v4 }
 0xa15   :  { %15094 = vmatprep.subr.bf16.mxu1 %v21729_v32 }
 0xa16   :  { %12754 = vmatmul.mubr.f32.vlgmr.msra.gmra.mrb[16].mxu0 %v21706_v9 }
 0xa17   :  { %12982 = vmatmul.mubr.f32.vlgmr.msra.gmra.mrb[16].mxu1 %v21706_v9  ;;  %12756 = vmatprep.mubr.f32.mxu0 %v21707_v27 }
 0xa18   :  { %14904 = vmatpush3.bf16.msra.mxu0 %v21728_v4  ;;  %12984 = vmatprep.mubr.f32.mxu1 %v21707_v27  ;;  %v21796_v4 = vld [vmem:[#allocation42_spill] sm:$0xff] }
 0xa19   :  { %15096 = vmatpush3.bf16.msra.mxu1 %v21729_v32  ;;  %14906 = vmatprep.subr.bf16.mxu0 %v21731_v12  ;;  %v21797_v32 = vld [vmem:[#allocation59_spill] sm:$0xff] }
 0xa1a   :  { %12757 = vmatmul.mubr.f32.gmra.mrb[18].mxu0 %v21712_v28  ;;  %15098 = vmatprep.subr.bf16.mxu1 %v21732_v61 }
 0xa1b   :  { %12985 = vmatmul.mubr.f32.gmra.mrb[18].mxu1 %v21712_v28  ;;  %12791 = vmatprep.mubr.f32.mxu0 %v19403_v54 }
 0xa1c   :  { %14908 = vmatpush3.bf16.msra.mxu0 %v21731_v12  ;;  %13019 = vmatprep.mubr.f32.mxu1 %v19403_v54  ;;  %v21795_v54 = vld [vmem:[#allocation57_spill] sm:$0xff]  ;;  %v21799_v12 = vld [vmem:[#allocation60_spill] sm:$0xff] }
 0xa1d   :  { %15100 = vmatpush3.bf16.msra.mxu1 %v21732_v61  ;;  %14910 = vmatprep.subr.bf16.mxu0 %v21734_v43  ;;  %v21802_v61 = vld [vmem:[#allocation61_spill] sm:$0xff] }
 0xa1e   :  { %15102 = vmatprep.subr.bf16.mxu1 %v21735_v31 }
 0xa20   :  { %14912 = vmatpush3.bf16.msra.mxu0 %v21734_v43  ;;  %v21803_v43 = vld [vmem:[#allocation62_spill] sm:$0xff] }
 0xa21   :  { %15104 = vmatpush3.bf16.msra.mxu1 %v21735_v31  ;;  %14914 = vmatprep.subr.bf16.mxu0 %v21736_v2  ;;  %v21805_v31 = vld [vmem:[#allocation63_spill] sm:$0xff] }
 0xa22   :  { %15106 = vmatprep.subr.bf16.mxu1 %v21737_v19 }
 0xa24   :  { %14916 = vmatpush3.bf16.msra.mxu0 %v21736_v2 }
 0xa25   :  { %15108 = vmatpush3.bf16.msra.mxu1 %v21737_v19  ;;  %14918 = vmatprep.subr.bf16.mxu0 %v21738_v52  ;;  %v16035_v19 = vld [vmem:[#allocation5 + $0x8] sm:$0xff] }
 0xa26   :  { %15110 = vmatprep.subr.bf16.mxu1 %v21739_v42 }
 0xa28   :  { %14920 = vmatpush3.bf16.msra.mxu0 %v21738_v52 }
 0xa29   :  { %15112 = vmatpush3.bf16.msra.mxu1 %v21739_v42  ;;  %14922 = vmatprep.subr.bf16.mxu0 %v21740_v11 }
 0xa2a   :  { %15114 = vmatprep.subr.bf16.mxu1 %v21741_v33 }
 0xa2c   :  { %14924 = vmatpush3.bf16.msra.mxu0 %v21740_v11 }
 0xa2d   :  { %15116 = vmatpush3.bf16.msra.mxu1 %v21741_v33  ;;  %14926 = vmatprep.subr.bf16.mxu0 %v21742_v35  ;;  %v16036_v33 = vld [vmem:[#allocation5] sm:$0xff] }
 0xa2e   :  { %15118 = vmatprep.subr.bf16.mxu1 %v21743_v15 }
 0xa30   :  { %14928 = vmatpush3.bf16.msra.mxu0 %v21742_v35 }
 0xa31   :  { %15120 = vmatpush3.bf16.msra.mxu1 %v21743_v15  ;;  %14930 = vmatprep.subr.bf16.mxu0 %v21744_v29 }
 0xa32   :  { %15122 = vmatprep.subr.bf16.mxu1 %v21749_v25 }
 0xa34   :  { %14932 = vmatpush3.bf16.msra.mxu0 %v21744_v29 }
 0xa35   :  { %15124 = vmatpush3.bf16.msra.mxu1 %v21749_v25  ;;  %15126 = vmatprep.subr.bf16.mxu0 %v21795_v54  ;;  %v21798_v25 = vld [vmem:[#allocation25_spill] sm:$0xff] }
 0xa36   :  { %13261 = vmatprep.subr.mxu1 %v21796_v4 }
 0xa37   :  { %12792 = vmatmul.mubr.f32.vlgmr.msra.gmra.mrb[16].mxu0 %v21706_v9 }
 0xa38   :  { %13020 = vmatmul.mubr.f32.vlgmr.msra.gmra.mrb[16].mxu1 %v21706_v9  ;;  %12794 = vmatprep.mubr.f32.mxu0 %v21707_v27  ;;  %v21800_v9 = vld [vmem:[#allocation70_spill] sm:$0xff] }
 0xa39   :  { %13022 = vmatprep.mubr.f32.mxu1 %v21707_v27  ;;  %15128 = vmatpush3.bf16.msra.mxu0 %v21795_v54  ;;  %v21801_v27 = vld [vmem:[#allocation27_spill] sm:$0xff] }
 0xa3a   :  { %15130 = vmatprep.subr.bf16.mxu0 %v21797_v32  ;;  %13262 = vmatpush3.msra.mxu1 %v21796_v4 }
 0xa3b   :  { %12795 = vmatmul.mubr.f32.gmra.mrb[18].mxu0 %v21712_v28  ;;  %13269 = vmatprep.subr.mxu1 %v21798_v25 }
 0xa3c   :  { %13023 = vmatmul.mubr.f32.gmra.mrb[18].mxu1 %v21712_v28  ;;  %v21804_v28 = vld [vmem:[#allocation29_spill] sm:$0xff] }
 0xa3d   :  { %15132 = vmatpush3.bf16.msra.mxu0 %v21797_v32 }
 0xa3e   :  { %15134 = vmatprep.subr.bf16.mxu0 %v21799_v12 }
 0xa41   :  { %15136 = vmatpush3.bf16.msra.mxu0 %v21799_v12 }
 0xa42   :  { %15138 = vmatprep.subr.bf16.mxu0 %v21800_v9 }
 0xa45   :  { %15140 = vmatpush3.bf16.msra.mxu0 %v21800_v9 }
 0xa46   :  { %15142 = vmatprep.subr.bf16.mxu0 %v21801_v27 }
 0xa49   :  { %15144 = vmatpush3.bf16.msra.mxu0 %v21801_v27 }
 0xa4a   :  { %15146 = vmatprep.subr.bf16.mxu0 %v21802_v61 }
 0xa4d   :  { %15148 = vmatpush3.bf16.msra.mxu0 %v21802_v61 }
 0xa4e   :  { %15150 = vmatprep.subr.bf16.mxu0 %v21803_v43 }
 0xa51   :  { %15152 = vmatpush3.bf16.msra.mxu0 %v21803_v43 }
 0xa52   :  { %15154 = vmatprep.subr.bf16.mxu0 %v21804_v28 }
 0xa55   :  { %15156 = vmatpush3.bf16.msra.mxu0 %v21804_v28 }
 0xa56   :  { %15158 = vmatprep.subr.bf16.mxu0 %v21805_v31 }
 0xb0a   :  { %v12793_v2 = vpop.f32.mrb[16].mxu0 }
 0xb0b   :  { %v6196_v52 = vmul.f32 %v16035_v19, %v12793_v2  ;;  %v13021_v42 = vpop.f32.mrb[16].mxu1  ;;  %v6173_v11 = vpop.f32.mrb[17].mxu0  ;;  %v21810_v19 = vld [vmem:[#allocation64_spill] sm:$0xff] }
 0xb0c   :  { %v6195_v35 = vmul.f32 %v16036_v33, %v6173_v11  ;;  %v6956_v15 = vpop.f32.mrb[17].mxu1 }
 0xb0e   :  { %v6199_v29 = vadd.f32 %v6196_v52, %v6195_v35  ;;  %v12796_v41 = vpop.f32.mrb[18].mxu0 }
 0xb0f   :  { %v13024_v22 = vpop.f32.mrb[18].mxu1  ;;  %v6185_v46 = vpop.f32.mrb[19].mxu0  ;;  %v6198_v38 = vmul.f32 %v16038_v53, %v12796_v41 }
 0xb10   :  { %v6197_v20 = vmul.f32 %v16037_v37, %v6185_v46  ;;  %v6968_v39 = vpop.f32.mrb[19].mxu1 }
 0xb12   :  { %v6200_v21 = vadd.f32 %v6199_v29, %v6197_v20 }
 0xb14   :  { %v6201_v56 = vadd.f32 %v6200_v21, %v6198_v38 }
 0xb16   :  { %v6202_v55 = vrot.slane %v6201_v56, 4 }
 0xb18   :  { %v6203_v49 = vadd.f32 %v6202_v55, %v6201_v56 }
 0xb1a   :  { %v6204_v47 = vrot.slane %v6203_v49, 2 }
 0xb1c   :  { %v6205_v34 = vadd.f32 %v6204_v47, %v6203_v49 }
 0xb1e   :  { %v6206_v59 = vrot.slane %v6205_v34, 1 }
 0xb20   :  { %v6207_v1 = vadd.f32 %v6206_v59, %v6205_v34 }
 0xb22   :  { %v15716_v23 = vadd.f32 %v6968_v39, %v6207_v1  ;;  %v15713_v17 = vadd.f32 %v13021_v42, %v6207_v1  ;;  %v15714_v8 = vadd.f32 %v6956_v15, %v6207_v1  ;;  %v15715_v50 = vadd.f32 %v13024_v22, %v6207_v1  ;;  %v21812_v42 = vld [vmem:[#allocation24_spill] sm:$0xff] }
 0xb24   :  { %v6984_v5 = vmul.f32 0.2, %v15716_v23  ;;  %vm6979_vm15 = vcmp.ge.f32.partialorder %v15713_v17, 0.0  ;;  %v6983_v13 = vmul.f32 0.2, %v15713_v17  ;;  %vm6978_vm0 = vcmp.ge.f32.partialorder %v15714_v8, 0.0 }
 0xb25   :  { %v6982_v51 = vmul.f32 0.2, %v15714_v8  ;;  %vm6981_vm2 = vcmp.ge.f32.partialorder %v15715_v50, 0.0  ;;  %v6985_v45 = vmul.f32 0.2, %v15715_v50  ;;  %vm6980_vm3 = vcmp.ge.f32.partialorder %v15716_v23, 0.0 }
 0xb26   :  { %v6987_v6 = vsel %vm6979_vm15, %v15713_v17, %v6983_v13  ;;  %v6988_v2 = vsel %vm6980_vm3, %v15716_v23, %v6984_v5 }
 0xb27   :  { %v6991_v40 = vsel %vm2373_vm5, %v6987_v6, -1e+30  ;;  %v6986_v16 = vsel %vm6978_vm0, %v15714_v8, %v6982_v51  ;;  %v6989_v4 = vsel %vm6981_vm2, %v15715_v50, %v6985_v45  ;;  %v6992_v11 = vsel %vm2374_vm4, %v6988_v2, -1e+30 }
 0xb28   :  { %6996 = vmax.xlane.f32.xlu1 %v6991_v40  ;;  %v6990_v48 = vsel %vm2372_vm1, %v6986_v16, -1e+30  ;;  %v6993_v52 = vsel %vm2375_vm8, %v6989_v4, -1e+30 }
 0xb29   :  { %6994 = vmax.xlane.f32.xlu0 %v6990_v48 }
 0xb2c   :  { %7000 = vmax.xlane.f32.xlu1 %v6993_v52 }
 0xb2d   :  { %6998 = vmax.xlane.f32.xlu0 %v6992_v11 }
 0xbb5   :  { %v6997_v33 = vpop.xlane.xlu1 %6996 }
 0xbb6   :  { %v7003_v35 = vsub.f32 %v6991_v40, %v6997_v33  ;;  %v6995_v15 = vpop.xlane.xlu0 %6994  ;;  %v21815_v33 = vld [vmem:[#allocation31_spill] sm:$0xff] }
 0xbb7   :  { %v7002_v29 = vsub.f32 %v6990_v48, %v6995_v15  ;;  %v21817_v15 = vld [vmem:[#allocation76_spill] sm:$0xff] }
 0xbb8   :  { %v7008_v41 = vmul.f32 1.442695, %v7003_v35  ;;  %v21816_v35 = vld [vmem:[#allocation54_spill] sm:$0xff] }
 0xbb9   :  { %v7006_v22 = vmul.f32 1.442695, %v7002_v29  ;;  %v7001_v46 = vpop.xlane.xlu1 %7000  ;;  %v21818_v29 = vld [vmem:[#allocation32_spill] sm:$0xff] }
 0xbba   :  { %16011 = vpow2.f32 %v7008_v41  ;;  %v7005_v37 = vsub.f32 %v6993_v52, %v7001_v46  ;;  %v6999_v20 = vpop.xlane.xlu0 %6998  ;;  %v21811_v52 = vld [vmem:[#allocation43_spill] sm:$0xff]  ;;  %v21819_v41 = vld [vmem:[#allocation33_spill] sm:$0xff] }
 0xbbb   :  { %16013 = vpow2.f32 %v7006_v22  ;;  %v7004_v39 = vsub.f32 %v6992_v11, %v6999_v20  ;;  %v21813_v11 = vld [vmem:[#allocation26_spill] sm:$0xff]  ;;  %v21820_v22 = vld [vmem:[#allocation55_spill] sm:$0xff]  ;;  %v21821_v46 = vld [vmem:[#allocation77_spill] sm:$0xff] }
 0xbbc   :  { %v7012_v53 = vmul.f32 1.442695, %v7005_v37  ;;  %v21822_v37 = vld [vmem:[#allocation34_spill] sm:$0xff]  ;;  %v21823_v20 = vld [vmem:[#allocation35_spill] sm:$0xff] }
 0xbbd   :  { %v7010_v38 = vmul.f32 1.442695, %v7004_v39  ;;  %v21824_v39 = vld [vmem:[#allocation56_spill] sm:$0xff] }
 0xbbe   :  { %16015 = vpow2.f32 %v7012_v53  ;;  %v21825_v53 = vld [vmem:[#allocation36_spill] sm:$0xff] }
 0xbbf   :  { %16017 = vpow2.f32 %v7010_v38  ;;  %v21826_v38 = vld [vmem:[#allocation37_spill] sm:$0xff] }
 0xbc4   :  { %v19971_v21 = vpop.eup %16011 }
 0xbc5   :  { %v19973_v56 = vpop.eup %16013  ;;  %v19976_v55 = vand.u32 4294901760, %v19971_v21 }
 0xbc6   :  { %v19979_v49 = vand.u32 4294901760, %v19973_v56 }
 0xbc7   :  { %v19983_v47 = vsub.f32 %v19971_v21, %v19976_v55 }
 0xbc8   :  { %v19985_v34 = vpop.eup %16015  ;;  %v19989_v59 = vsub.f32 %v19973_v56, %v19979_v49 }
 0xbc9   :  { %v19991_v1 = vpop.eup %16017  ;;  %v7107_v23 = vand.u32 4294901760, %v19983_v47  ;;  %v19995_v17 = vand.u32 4294901760, %v19985_v34 }
 0xbca   :  { %v7097_v8 = vand.u32 4294901760, %v19989_v59  ;;  %v19999_v50 = vand.u32 4294901760, %v19991_v1 }
 0xbcb   :  { %v7108_v5 = vsub.f32 %v19983_v47, %v7107_v23  ;;  %v20006_v13 = vsub.f32 %v19985_v34, %v19995_v17 }
 0xbcc   :  { %v7098_v51 = vsub.f32 %v19989_v59, %v7097_v8  ;;  %v20011_v45 = vsub.f32 %v19991_v1, %v19999_v50 }
 0xbcd   :  { %v7109_v6 = vand.u32 4294901760, %v7108_v5  ;;  %v7127_v24 = vand.u32 4294901760, %v20006_v13  ;;  %v21831_v5 = vld [vmem:[#allocation22_spill] sm:$0xff] }
 0xbce   :  { %v7099_v40 = vand.u32 4294901760, %v7098_v51  ;;  %v7117_v16 = vand.u32 4294901760, %v20011_v45 }
 0xbcf   :  { %v7128_v7 = vsub.f32 %v20006_v13, %v7127_v24 }
 0xbd0   :  { %13057 = vmatprep.mubr.f32.mxu0 %v7099_v40  ;;  %v7118_v48 = vsub.f32 %v20011_v45, %v7117_v16 }
 0xbd1   :  { %13058 = vmatmul.mubr.f32.vlgmr.msra.gmra.mrb[20].mxu0 %v7109_v6  ;;  %v7129_v4 = vand.u32 4294901760, %v7128_v7 }
 0xbd2   :  { %15160 = vmatpush3.bf16.msra.mxu0 %v21805_v31  ;;  %v7119_v2 = vand.u32 4294901760, %v7118_v48  ;;  %v21814_v31 = vld [vmem:[#allocation30_spill] sm:$0xff] }
 0xbd3   :  { %15162 = vmatprep.subr.bf16.mxu0 %v21810_v19 }
 0xbd4   :  { %13060 = vmatprep.mubr.f32.mxu0 %v7119_v2 }
 0xbd5   :  { %13061 = vmatmul.mubr.f32.gmra.mrb[22].mxu0 %v7129_v4 }
 0xbd6   :  { %15164 = vmatpush3.bf16.msra.mxu0 %v21810_v19  ;;  %13095 = vmatprep.mubr.f32.mxu0 %v19979_v49 }
 0xbd7   :  { %15166 = vmatprep.subr.bf16.mxu0 %v21811_v52 }
 0xbda   :  { %15168 = vmatpush3.bf16.msra.mxu0 %v21811_v52 }
 0xbdb   :  { %15170 = vmatprep.subr.bf16.mxu0 %v21812_v42 }
 0xbde   :  { %15172 = vmatpush3.bf16.msra.mxu0 %v21812_v42 }
 0xbdf   :  { %15174 = vmatprep.subr.bf16.mxu0 %v21813_v11 }
 0xbe2   :  { %15176 = vmatpush3.bf16.msra.mxu0 %v21813_v11 }
 0xbe3   :  { %15178 = vmatprep.subr.bf16.mxu0 %v21814_v31 }
 0xbe6   :  { %15180 = vmatpush3.bf16.msra.mxu0 %v21814_v31 }
 0xbe7   :  { %15182 = vmatprep.subr.bf16.mxu0 %v21815_v33 }
 0xbea   :  { %15184 = vmatpush3.bf16.msra.mxu0 %v21815_v33 }
 0xbeb   :  { %15186 = vmatprep.subr.bf16.mxu0 %v21816_v35 }
 0xbee   :  { %15188 = vmatpush3.bf16.msra.mxu0 %v21816_v35 }
 0xbef   :  { %15190 = vmatprep.subr.bf16.mxu0 %v21817_v15 }
 0xbf1   :  { %13096 = vmatmul.mubr.f32.vlgmr.msra.gmra.mrb[20].mxu0 %v19976_v55 }
 0xbf2   :  { %13098 = vmatprep.mubr.f32.mxu0 %v19999_v50  ;;  %15192 = vmatpush3.bf16.msra.mxu0 %v21817_v15 }
 0xbf3   :  { %15194 = vmatprep.subr.bf16.mxu0 %v21818_v29 }
 0xbf5   :  { %13099 = vmatmul.mubr.f32.gmra.mrb[22].mxu0 %v19995_v17 }
 0xbf6   :  { %15196 = vmatpush3.bf16.msra.mxu0 %v21818_v29  ;;  %13133 = vmatprep.mubr.f32.mxu0 %v19989_v59  ;;  %v21827_v59 = vld [vmem:[#allocation20_spill] sm:$0xff] }
 0xbf7   :  { %15198 = vmatprep.subr.bf16.mxu0 %v21819_v41 }
 0xbfa   :  { %15200 = vmatpush3.bf16.msra.mxu0 %v21819_v41 }
 0xbfb   :  { %15202 = vmatprep.subr.bf16.mxu0 %v21820_v22 }
 0xbfe   :  { %15204 = vmatpush3.bf16.msra.mxu0 %v21820_v22  ;;  %v21834_v22 = vld [vmem:[#allocation28_spill] sm:$0xff] }
 0xbff   :  { %15206 = vmatprep.subr.bf16.mxu0 %v21821_v46 }
 0xc02   :  { %15208 = vmatpush3.bf16.msra.mxu0 %v21821_v46  ;;  %v21835_v46 = vld [vmem:[#allocation68_spill] sm:$0xff] }
 0xc03   :  { %15210 = vmatprep.subr.bf16.mxu0 %v21822_v37 }
 0xc06   :  { %15212 = vmatpush3.bf16.msra.mxu0 %v21822_v37  ;;  %v21836_v37 = vld [vmem:[#allocation131_spill] sm:$0xff] }
 0xc07   :  { %15214 = vmatprep.subr.bf16.mxu0 %v21823_v20 }
 0xc0a   :  { %15216 = vmatpush3.bf16.msra.mxu0 %v21823_v20  ;;  %v21837_v20 = vld [vmem:[#allocation125_spill] sm:$0xff] }
 0xc0b   :  { %15218 = vmatprep.subr.bf16.mxu0 %v21824_v39 }
 0xc0e   :  { %15220 = vmatpush3.bf16.msra.mxu0 %v21824_v39  ;;  %v21838_v39 = vld [vmem:[#allocation132_spill] sm:$0xff] }
 0xc0f   :  { %15222 = vmatprep.subr.bf16.mxu0 %v21795_v54 }
 0xc11   :  { %13134 = vmatmul.mubr.f32.vlgmr.msra.gmra.mrb[20].mxu0 %v19983_v47  ;;  %v21828_v47 = vld [vmem:[#allocation38_spill] sm:$0xff] }
 0xc12   :  { %13136 = vmatprep.mubr.f32.mxu0 %v20011_v45  ;;  %15224 = vmatpush3.bf16.msra.mxu0 %v21795_v54 }
 0xc13   :  { %15226 = vmatprep.subr.bf16.mxu0 %v21797_v32 }
 0xc15   :  { %13137 = vmatmul.mubr.f32.gmra.mrb[22].mxu0 %v20006_v13  ;;  %v21832_v13 = vld [vmem:[#allocation40_spill] sm:$0xff] }
 0xc16   :  { %15228 = vmatpush3.bf16.msra.mxu0 %v21797_v32  ;;  %13171 = vmatprep.mubr.f32.mxu0 %v7097_v8  ;;  %v21830_v8 = vld [vmem:[#allocation21_spill] sm:$0xff] }
 0xc17   :  { %15230 = vmatprep.subr.bf16.mxu0 %v21799_v12 }
 0xc1a   :  { %15232 = vmatpush3.bf16.msra.mxu0 %v21799_v12 }
 0xc1b   :  { %15234 = vmatprep.subr.bf16.mxu0 %v21800_v9 }
 0xc1e   :  { %15236 = vmatpush3.bf16.msra.mxu0 %v21800_v9 }
 0xc1f   :  { %15238 = vmatprep.subr.bf16.mxu0 %v21801_v27 }
 0xc22   :  { %15240 = vmatpush3.bf16.msra.mxu0 %v21801_v27 }
 0xc23   :  { %15242 = vmatprep.subr.bf16.mxu0 %v21802_v61 }
 0xc26   :  { %15244 = vmatpush3.bf16.msra.mxu0 %v21802_v61 }
 0xc27   :  { %15246 = vmatprep.subr.bf16.mxu0 %v21803_v43 }
 0xc2a   :  { %15248 = vmatpush3.bf16.msra.mxu0 %v21803_v43 }
 0xc2b   :  { %15250 = vmatprep.subr.bf16.mxu0 %v21804_v28 }
 0xc2e   :  { %15252 = vmatpush3.bf16.msra.mxu0 %v21804_v28 }
 0xc2f   :  { %15254 = vmatprep.subr.bf16.mxu0 %v21825_v53 }
 0xc31   :  { %13172 = vmatmul.mubr.f32.vlgmr.msra.gmra.mrb[20].mxu0 %v7107_v23  ;;  %v21829_v23 = vld [vmem:[#allocation39_spill] sm:$0xff] }
 0xc32   :  { %13174 = vmatprep.mubr.f32.mxu0 %v7117_v16  ;;  %15256 = vmatpush3.bf16.msra.mxu0 %v21825_v53  ;;  %v21839_v53 = vld [vmem:[#allocation126_spill] sm:$0xff] }
 0xc33   :  { %15258 = vmatprep.subr.bf16.mxu0 %v21826_v38 }
 0xc35   :  { %13175 = vmatmul.mubr.f32.gmra.mrb[22].mxu0 %v7127_v24 }
 0xc36   :  { %15260 = vmatpush3.bf16.msra.mxu0 %v21826_v38  ;;  %13209 = vmatprep.mubr.f32.mxu0 %v19979_v49  ;;  %v21840_v38 = vld [vmem:[#allocation133_spill] sm:$0xff] }
 0xc37   :  { %15262 = vmatprep.subr.bf16.mxu0 %v21827_v59 }
 0xc3a   :  { %15264 = vmatpush3.bf16.msra.mxu0 %v21827_v59  ;;  %v21841_v59 = vld [vmem:[#allocation127_spill] sm:$0xff] }
 0xc3b   :  { %15266 = vmatprep.subr.bf16.mxu0 %v21828_v47 }
 0xc3e   :  { %15268 = vmatpush3.bf16.msra.mxu0 %v21828_v47  ;;  %v21842_v47 = vld [vmem:[#allocation134_spill] sm:$0xff] }
 0xc3f   :  { %15270 = vmatprep.subr.bf16.mxu0 %v21829_v23 }
 0xc42   :  { %15272 = vmatpush3.bf16.msra.mxu0 %v21829_v23 }
 0xc43   :  { %15274 = vmatprep.subr.bf16.mxu0 %v21830_v8 }
 0xc46   :  { %15276 = vmatpush3.bf16.msra.mxu0 %v21830_v8 }
 0xc47   :  { %15278 = vmatprep.subr.bf16.mxu0 %v21831_v5 }
 0xc4a   :  { %15280 = vmatpush3.bf16.msra.mxu0 %v21831_v5 }
 0xc4b   :  { %15282 = vmatprep.subr.bf16.mxu0 %v21832_v13 }
 0xc4e   :  { %15284 = vmatpush3.bf16.msra.mxu0 %v21832_v13 }
 0xc4f   :  { %15286 = vmatprep.subr.bf16.mxu0 %v21795_v54 }
 0xc51   :  { %13210 = vmatmul.mubr.f32.vlgmr.msra.gmra.mrb[20].mxu0 %v19976_v55 }
 0xc52   :  { %13212 = vmatprep.mubr.f32.mxu0 %v19999_v50  ;;  %15288 = vmatpush3.bf16.msra.mxu0 %v21795_v54  ;;  %v21833_v54 = vld [vmem:[#allocation41_spill] sm:$0xff] }
 0xc53   :  { %15290 = vmatprep.subr.bf16.mxu0 %v21797_v32 }
 0xc55   :  { %13213 = vmatmul.mubr.f32.gmra.mrb[22].mxu0 %v19995_v17 }
 0xc56   :  { %15292 = vmatpush3.bf16.msra.mxu0 %v21797_v32  ;;  %13247 = vmatprep.mubr.f32.mxu0 %v19979_v49 }
 0xc57   :  { %15294 = vmatprep.subr.bf16.mxu0 %v21799_v12 }
 0xc5a   :  { %15296 = vmatpush3.bf16.msra.mxu0 %v21799_v12 }
 0xc5b   :  { %15298 = vmatprep.subr.bf16.mxu0 %v21800_v9 }
 0xc5e   :  { %15300 = vmatpush3.bf16.msra.mxu0 %v21800_v9 }
 0xc5f   :  { %15302 = vmatprep.subr.bf16.mxu0 %v21801_v27 }
 0xc62   :  { %15304 = vmatpush3.bf16.msra.mxu0 %v21801_v27 }
 0xc63   :  { %15306 = vmatprep.subr.bf16.mxu0 %v21802_v61 }
 0xc66   :  { %15308 = vmatpush3.bf16.msra.mxu0 %v21802_v61 }
 0xc67   :  { %15310 = vmatprep.subr.bf16.mxu0 %v21803_v43 }
 0xc6a   :  { %15312 = vmatpush3.bf16.msra.mxu0 %v21803_v43 }
 0xc6b   :  { %15314 = vmatprep.subr.bf16.mxu0 %v21804_v28 }
 0xc6e   :  { %15316 = vmatpush3.bf16.msra.mxu0 %v21804_v28 }
 0xc6f   :  { %13253 = vmatprep.subr.mxu0 %v21833_v54 }
 0xc71   :  { %13248 = vmatmul.mubr.f32.vlgmr.msra.gmra.mrb[20].mxu0 %v19976_v55 }
 0xc72   :  { %13250 = vmatprep.mubr.f32.mxu0 %v19999_v50  ;;  %13254 = vmatpush3.msra.mxu0 %v21833_v54 }
 0xc75   :  { %13251 = vmatmul.mubr.f32.gmra.mrb[22].mxu0 %v19995_v17 }
 0xd44   :  { %v13249_v32 = vpop.f32.mrb[20].mxu0 }
 0xd45   :  { %16019 = vrcp.f32 %v13249_v32  ;;  %v7762_v12 = vpop.f32.mrb[21].mxu0 }
 0xd46   :  { %16021 = vrcp.f32 %v7762_v12 }
 0xd48   :  { %v13252_v9 = vpop.f32.mrb[22].mxu0 }
 0xd49   :  { %16023 = vrcp.f32 %v13252_v9  ;;  %v7774_v27 = vpop.f32.mrb[23].mxu0 }
 0xd4a   :  { %16025 = vrcp.f32 %v7774_v27 }
 0xd4f   :  { %v16020_v61 = vpop.eup %16019 }
 0xd50   :  { %v16022_v43 = vpop.eup %16021  ;;  %v7796_v28 = vsel %vm3178_vm10, %v16020_v61, 0 }
 0xd51   :  { %v7793_v55 = vsel %vm3178_vm10, %v16022_v43, 0  ;;  %v7880_v49 = vand.u32 4294901760, %v7796_v28 }
 0xd52   :  { %v7870_v50 = vand.u32 4294901760, %v7793_v55 }
 0xd53   :  { %v16024_v51 = vpop.eup %16023  ;;  %v7881_v45 = vsub.f32 %v7796_v28, %v7880_v49 }
 0xd54   :  { %v16026_v6 = vpop.eup %16025  ;;  %13263 = vmatprep.mubr.f32.mxu1 %v7870_v50  ;;  %v7802_v17 = vsel %vm3178_vm10, %v16024_v51, 0  ;;  %v7871_v24 = vsub.f32 %v7793_v55, %v7870_v50 }
 0xd55   :  { %13264 = vmatmul.mubr.f32.vlgmr.msra.gmra.mrb[20].mxu1 %v7880_v49  ;;  %v7799_v40 = vsel %vm3178_vm10, %v16026_v6, 0  ;;  %v7900_v16 = vand.u32 4294901760, %v7802_v17  ;;  %v7882_v7 = vand.u32 4294901760, %v7881_v45 }
 0xd56   :  { %13270 = vmatpush3.msra.mxu1 %v21798_v25  ;;  %v7890_v48 = vand.u32 4294901760, %v7799_v40  ;;  %v7872_v4 = vand.u32 4294901760, %v7871_v24 }
 0xd57   :  { %v7883_v2 = vsub.f32 %v7881_v45, %v7882_v7  ;;  %13277 = vmatprep.subr.mxu1 %v21833_v54  ;;  %v7901_v19 = vsub.f32 %v7802_v17, %v7900_v16 }
 0xd58   :  { %13266 = vmatprep.mubr.f32.mxu1 %v7890_v48  ;;  %v7873_v52 = vsub.f32 %v7871_v24, %v7872_v4  ;;  %v7891_v42 = vsub.f32 %v7799_v40, %v7890_v48 }
 0xd59   :  { %13267 = vmatmul.mubr.f32.gmra.mrb[22].mxu1 %v7900_v16  ;;  %v7902_v11 = vand.u32 4294901760, %v7901_v19  ;;  %v7884_v35 = vand.u32 4294901760, %v7883_v2 }
 0xd5a   :  { %13271 = vmatprep.mubr.f32.mxu1 %v7871_v24  ;;  %v7874_v31 = vand.u32 4294901760, %v7873_v52  ;;  %v7892_v33 = vand.u32 4294901760, %v7891_v42 }
 0xd5b   :  { %v7903_v15 = vsub.f32 %v7901_v19, %v7902_v11 }
 0xd5c   :  { %13255 = vmatprep.mubr.f32.mxu0 %v7874_v31  ;;  %v7893_v29 = vsub.f32 %v7891_v42, %v7892_v33 }
 0xd5d   :  { %13256 = vmatmul.mubr.f32.vlgmr.msra.gmra.mrb[24].mxu0 %v7884_v35  ;;  %13272 = vmatmul.mubr.f32.vlgmr.msra.gmra.mrb[20].mxu1 %v7881_v45  ;;  %v7904_v41 = vand.u32 4294901760, %v7903_v15  ;;  %v9206_v15 = vld [vmem:[%s20743_s6 + $0x10] sm:$0xff] }
 0xd5e   :  { %13274 = vmatprep.mubr.f32.mxu1 %v7891_v42  ;;  %13278 = vmatpush3.msra.mxu1 %v21833_v54  ;;  %v7894_v25 = vand.u32 4294901760, %v7893_v29  ;;  %v9207_v29 = vld [vmem:[%s20743_s6 + $0x18] sm:$0xff] }
 0xd5f   :  { %13285 = vmatprep.subr.mxu1 %v21834_v22 }
 0xd60   :  { %13258 = vmatprep.mubr.f32.mxu0 %v7894_v25  ;;  %v9227_v25 = vand.u32 4294901760, %v9206_v15 }
 0xd61   :  { %13259 = vmatmul.mubr.f32.gmra.mrb[26].mxu0 %v7904_v41  ;;  %13275 = vmatmul.mubr.f32.gmra.mrb[22].mxu1 %v7901_v19  ;;  %v9230_v41 = vand.u32 4294901760, %v9207_v29 }
 0xd62   :  { %13279 = vmatprep.mubr.f32.mxu1 %v7872_v4 }
 0xd65   :  { %13280 = vmatmul.mubr.f32.vlgmr.msra.gmra.mrb[20].mxu1 %v7882_v7 }
 0xd66   :  { %13282 = vmatprep.mubr.f32.mxu1 %v7892_v33  ;;  %13286 = vmatpush3.msra.mxu1 %v21834_v22  ;;  %v20307_v22 = vpack.c.bf16 %v9230_v41, %v9227_v25 }
 0xd67   :  { %13293 = vmatprep.subr.mxu1 %v21833_v54 }
 0xd69   :  { %13283 = vmatmul.mubr.f32.gmra.mrb[22].mxu1 %v7902_v11 }
 0xd6a   :  { %13287 = vmatprep.mubr.f32.mxu1 %v7870_v50 }
 0xd6d   :  { %13288 = vmatmul.mubr.f32.vlgmr.msra.gmra.mrb[20].mxu1 %v7880_v49 }
 0xd6e   :  { %13294 = vmatpush3.msra.mxu1 %v21833_v54  ;;  %13290 = vmatprep.mubr.f32.mxu1 %v7890_v48 }
 0xd6f   :  { %15318 = vmatprep.subr.bf16.mxu1 %v21835_v46 }
 0xd71   :  { %13291 = vmatmul.mubr.f32.gmra.mrb[22].mxu1 %v7900_v16 }
 0xd72   :  { %13295 = vmatprep.mubr.f32.mxu1 %v7870_v50 }
 0xd75   :  { %13296 = vmatmul.mubr.f32.vlgmr.msra.gmra.mrb[20].mxu1 %v7880_v49 }
 0xd76   :  { %15320 = vmatpush3.bf16.msra.mxu1 %v21835_v46  ;;  %13298 = vmatprep.mubr.f32.mxu1 %v7890_v48 }
 0xd77   :  { %15322 = vmatprep.subr.bf16.mxu1 %v21836_v37 }
 0xd79   :  { %13299 = vmatmul.mubr.f32.gmra.mrb[22].mxu1 %v7900_v16 }
 0xd7a   :  { %15324 = vmatpush3.bf16.msra.mxu1 %v21836_v37 }
 0xd7b   :  { %15326 = vmatprep.subr.bf16.mxu1 %v21837_v20 }
 0xd7e   :  { %15328 = vmatpush3.bf16.msra.mxu1 %v21837_v20 }
 0xd7f   :  { %15330 = vmatprep.subr.bf16.mxu1 %v21838_v39 }
 0xd82   :  { %15332 = vmatpush3.bf16.msra.mxu1 %v21838_v39 }
 0xd83   :  { %15334 = vmatprep.subr.bf16.mxu1 %v21839_v53 }
 0xd86   :  { %15336 = vmatpush3.bf16.msra.mxu1 %v21839_v53 }
 0xd87   :  { %15338 = vmatprep.subr.bf16.mxu1 %v21840_v38 }
 0xd8a   :  { %15340 = vmatpush3.bf16.msra.mxu1 %v21840_v38 }
 0xd8b   :  { %15342 = vmatprep.subr.bf16.mxu1 %v21841_v59 }
 0xd8e   :  { %15344 = vmatpush3.bf16.msra.mxu1 %v21841_v59 }
 0xd8f   :  { %15346 = vmatprep.subr.bf16.mxu1 %v21842_v47 }
 0xd92   :  { %15348 = vmatpush3.bf16.msra.mxu1 %v21842_v47 }
 0xd93   :  { %15350 = vmatprep.subr.bf16.mxu1 %v19624_v36 }
 0xe30   :  { %v13257_v23 = vpop.f32.mrb[24].mxu0 }
 0xe31   :  { %v7876_v8 = vpop.f32.mrb[25].mxu0 }
 0xe34   :  { %v13260_v5 = vpop.f32.mrb[26].mxu0 }
 0xe35   :  { %v7896_v13 = vpop.f32.mrb[27].mxu0 }
 0xe48   :  { %v13297_v54 = vpop.f32.mrb[20].mxu1 }
 0xe49   :  { %v15717_v32 = vadd.f32 %v13297_v54, %v13257_v23  ;;  %v8357_v12 = vpop.f32.mrb[21].mxu1 }
 0xe4a   :  { %v15718_v9 = vadd.f32 %v8357_v12, %v7876_v8  ;;  %v9212_v8 = vld [vmem:[%s20743_s6 + $0x40] sm:$0xff] }
 0xe4b   :  { %v8380_v27 = vmul.f32 %v19971_v21, %v15717_v32  ;;  %v9245_v32 = vand.u32 4294901760, %v9212_v8 }
 0xe4c   :  { %v8379_v61 = vmul.f32 %v19973_v56, %v15718_v9  ;;  %v13300_v43 = vpop.f32.mrb[22].mxu1  ;;  %v20343_v9 = vld [vmem:[%s20743_s6 + $0x58] sm:$0xff] }
 0xe4d   :  { %v20154_v28 = vand.u32 4294901760, %v8380_v27  ;;  %v15719_v55 = vadd.f32 %v13300_v43, %v13260_v5  ;;  %v8369_v49 = vpop.f32.mrb[23].mxu1  ;;  %v9213_v5 = vld [vmem:[%s20743_s6 + $0x48] sm:$0xff]  ;;  %v20350_v43 = vld [vmem:[%s20743_s6 + $0x60] sm:$0xff] }
 0xe4e   :  { %v20156_v50 = vand.u32 4294901760, %v8379_v61  ;;  %v15720_v51 = vadd.f32 %v8369_v49, %v7896_v13  ;;  %v20336_v13 = vld [vmem:[%s20743_s6 + $0x50] sm:$0xff]  ;;  %v9248_v12 = vand.u32 4294901760, %v9213_v5 }
 0xe4f   :  { %v20159_v45 = vsub.f32 %v8380_v27, %v20154_v28  ;;  %v8382_v6 = vmul.f32 %v19985_v34, %v15719_v55  ;;  %v9251_v27 = vand.u32 4294901760, %v20336_v13 }
 0xe50   :  { %v20163_v17 = vsub.f32 %v8379_v61, %v20156_v50  ;;  %v8381_v21 = vmul.f32 %v19991_v1, %v15720_v51  ;;  %v9254_v61 = vand.u32 4294901760, %v20343_v9  ;;  %v20358_v55 = vpack.c.bf16 %v9248_v12, %v9245_v32 }
 0xe51   :  { %v8492_v56 = vand.u32 4294901760, %v20159_v45  ;;  %v20167_v24 = vand.u32 4294901760, %v8382_v6 }
 0xe52   :  { %v20169_v40 = vand.u32 4294901760, %v8381_v21  ;;  %v8482_v16 = vand.u32 4294901760, %v20163_v17  ;;  %v20370_v51 = vpack.c.bf16 %v9254_v61, %v9251_v27 }
 0xe53   :  { %v8493_v7 = vsub.f32 %v20159_v45, %v8492_v56  ;;  %v20176_v48 = vsub.f32 %v8382_v6, %v20167_v24 }
 0xe54   :  { %v20179_v34 = vsub.f32 %v8381_v21, %v20169_v40  ;;  %v8483_v1 = vsub.f32 %v20163_v17, %v8482_v16  ;;  %v20382_v21 = vld [vmem:[%s20743_s6 + $0x78] sm:$0xff] }
 0xe55   :  { %v8512_v4 = vand.u32 4294901760, %v20176_v48  ;;  %v8494_v52 = vand.u32 4294901760, %v8493_v7  ;;  %v20389_v7 = vsub.f32 %v9206_v15, %v9227_v25 }
 0xe56   :  { %v8484_v2 = vand.u32 4294901760, %v8483_v1  ;;  %v8502_v19 = vand.u32 4294901760, %v20179_v34 }
 0xe57   :  { %v8513_v42 = vsub.f32 %v20176_v48, %v8512_v4 }
 0xe58   :  { %13333 = vmatprep.mubr.f32.mxu1 %v8484_v2  ;;  %v8503_v11 = vsub.f32 %v20179_v34, %v8502_v19  ;;  %v21208_v2 = vand.u32 4294901760, %v20389_v7 }
 0xe59   :  { %13334 = vmatmul.mubr.f32.vlgmr.msra.gmra.mrb[24].mxu1 %v8494_v52  ;;  %v8514_v33 = vand.u32 4294901760, %v8513_v42 }
 0xe5a   :  { %15352 = vmatpush3.bf16.msra.mxu1 %v19624_v36  ;;  %v8504_v31 = vand.u32 4294901760, %v8503_v11  ;;  %v21843_v36 = vld [vmem:[#allocation135_spill] sm:$0xff] }
 0xe5b   :  { %15354 = vmatprep.subr.bf16.mxu1 %v19633_v57 }
 0xe5c   :  { %13336 = vmatprep.mubr.f32.mxu1 %v8504_v31  ;;  %v9359_v31 = vsub.f32 %v20389_v7, %v21208_v2 }
 0xe5d   :  { %13337 = vmatmul.mubr.f32.gmra.mrb[26].mxu1 %v8514_v33 }
 0xe5e   :  { %15356 = vmatpush3.bf16.msra.mxu1 %v19633_v57  ;;  %13371 = vmatprep.mubr.f32.mxu1 %v20156_v50  ;;  %v21844_v57 = vld [vmem:[#allocation136_spill] sm:$0xff] }
 0xe5f   :  { %15358 = vmatprep.subr.bf16.mxu1 %v19641_v3 }
 0xe62   :  { %15360 = vmatpush3.bf16.msra.mxu1 %v19641_v3  ;;  %v21845_v3 = vld [vmem:[#allocation137_spill] sm:$0xff] }
 0xe63   :  { %15362 = vmatprep.subr.bf16.mxu1 %v19650_v18 }
 0xe66   :  { %15364 = vmatpush3.bf16.msra.mxu1 %v19650_v18  ;;  %v21846_v18 = vld [vmem:[#allocation138_spill] sm:$0xff] }
 0xe67   :  { %15366 = vmatprep.subr.bf16.mxu1 %v19674_v58 }
 0xe6a   :  { %15368 = vmatpush3.bf16.msra.mxu1 %v19674_v58  ;;  %v21848_v58 = vld [vmem:[#allocation140_spill] sm:$0xff] }
 0xe6b   :  { %15370 = vmatprep.subr.bf16.mxu1 %v19680_v60 }
 0xe6e   :  { %15372 = vmatpush3.bf16.msra.mxu1 %v19680_v60  ;;  %v21850_v60 = vld [vmem:[#allocation142_spill] sm:$0xff] }
 0xe6f   :  { %15374 = vmatprep.subr.bf16.mxu1 %v19690_v63 }
 0xe72   :  { %15376 = vmatpush3.bf16.msra.mxu1 %v19690_v63  ;;  %v9204_v63 = vld [vmem:[%s20743_s6] sm:$0xff] }
 0xe73   :  { %15378 = vmatprep.subr.bf16.mxu1 %v19711_v44 }
 0xe76   :  { %15380 = vmatpush3.bf16.msra.mxu1 %v19711_v44 }
 0xe77   :  { %15382 = vmatprep.subr.bf16.mxu1 %v19670_v30 }
 0xe79   :  { %13372 = vmatmul.mubr.f32.vlgmr.msra.gmra.mrb[24].mxu1 %v20154_v28 }
 0xe7a   :  { %13374 = vmatprep.mubr.f32.mxu1 %v20169_v40  ;;  %15384 = vmatpush3.bf16.msra.mxu1 %v19670_v30  ;;  %v21847_v30 = vld [vmem:[#allocation139_spill] sm:$0xff] }
 0xe7b   :  { %15386 = vmatprep.subr.bf16.mxu1 %v19678_v26 }
 0xe7d   :  { %13375 = vmatmul.mubr.f32.gmra.mrb[26].mxu1 %v20167_v24 }
 0xe7e   :  { %15388 = vmatpush3.bf16.msra.mxu1 %v19678_v26  ;;  %13409 = vmatprep.mubr.f32.mxu1 %v20163_v17  ;;  %v21849_v26 = vld [vmem:[#allocation141_spill] sm:$0xff]  ;;  %v20377_v17 = vld [vmem:[%s20743_s6 + $0x70] sm:$0xff] }
 0xe7f   :  { %15390 = vmatprep.subr.bf16.mxu1 %v19684_v62 }
 0xe82   :  { %15392 = vmatpush3.bf16.msra.mxu1 %v19684_v62  ;;  %v21851_v62 = vld [vmem:[#allocation143_spill] sm:$0xff] }
 0xe83   :  { %15394 = vmatprep.subr.bf16.mxu1 %v19688_v0 }
 0xe86   :  { %15396 = vmatpush3.bf16.msra.mxu1 %v19688_v0  ;;  %v21852_v0 = vld [vmem:[#allocation144_spill] sm:$0xff] }
 0xe87   :  { %15398 = vmatprep.subr.bf16.mxu1 %v19693_v10 }
 0xe8a   :  { %15400 = vmatpush3.bf16.msra.mxu1 %v19693_v10  ;;  %v9205_v10 = vld [vmem:[%s20743_s6 + $0x8] sm:$0xff] }
 0xe8b   :  { %15402 = vmatprep.subr.bf16.mxu1 %v19695_v14  ;;  %v9224_v44 = vand.u32 4294901760, %v9205_v10 }
 0xe8e   :  { %15404 = vmatpush3.bf16.msra.mxu1 %v19695_v14  ;;  %v9221_v14 = vand.u32 4294901760, %v9204_v63 }
 0xe8f   :  { %15406 = vmatprep.subr.bf16.mxu1 %v21843_v36 }
 0xe90   :  { %v20297_v35 = vpack.c.bf16 %v9224_v44, %v9221_v14  ;;  %v20361_v49 = vsub.f32 %v9204_v63, %v9221_v14 }
 0xe92   :  { %15408 = vmatpush3.bf16.msra.mxu1 %v21843_v36  ;;  %15510 = vmatprep.subr.bf16.mxu0 %v20297_v35 }
 0xe93   :  { %15410 = vmatprep.subr.bf16.mxu1 %v21844_v57  ;;  %15512 = vmatpush3.bf16.msra.mxu0 %v20297_v35 }
 0xe94   :  { %15514 = vmatprep.subr.bf16.mxu0 %v20307_v22 }
 0xe96   :  { %15412 = vmatpush3.bf16.msra.mxu1 %v21844_v57 }
 0xe97   :  { %15414 = vmatprep.subr.bf16.mxu1 %v21835_v46  ;;  %15516 = vmatpush3.bf16.msra.mxu0 %v20307_v22 }
 0xe99   :  { %13410 = vmatmul.mubr.f32.vlgmr.msra.gmra.mrb[24].mxu1 %v20159_v45  ;;  %v9257_v45 = vand.u32 4294901760, %v20350_v43 }
 0xe9a   :  { %13412 = vmatprep.mubr.f32.mxu1 %v20179_v34  ;;  %15416 = vmatpush3.bf16.msra.mxu1 %v21835_v46 }
 0xe9b   :  { %15418 = vmatprep.subr.bf16.mxu1 %v21836_v37 }
 0xe9d   :  { %13413 = vmatmul.mubr.f32.gmra.mrb[26].mxu1 %v20176_v48  ;;  %v20391_v48 = vsub.f32 %v9207_v29, %v9230_v41 }
 0xe9e   :  { %15420 = vmatpush3.bf16.msra.mxu1 %v21836_v37  ;;  %13447 = vmatprep.mubr.f32.mxu1 %v8482_v16  ;;  %v9266_v16 = vand.u32 4294901760, %v20382_v21 }
 0xe9f   :  { %15422 = vmatprep.subr.bf16.mxu1 %v21837_v20 }
 0xea2   :  { %15424 = vmatpush3.bf16.msra.mxu1 %v21837_v20 }
 0xea3   :  { %15426 = vmatprep.subr.bf16.mxu1 %v21838_v39 }
 0xea6   :  { %15428 = vmatpush3.bf16.msra.mxu1 %v21838_v39 }
 0xea7   :  { %15430 = vmatprep.subr.bf16.mxu1 %v21839_v53 }
 0xeaa   :  { %15432 = vmatpush3.bf16.msra.mxu1 %v21839_v53 }
 0xeab   :  { %15434 = vmatprep.subr.bf16.mxu1 %v21840_v38 }
 0xeae   :  { %15436 = vmatpush3.bf16.msra.mxu1 %v21840_v38 }
 0xeaf   :  { %15438 = vmatprep.subr.bf16.mxu1 %v21841_v59 }
 0xeb2   :  { %15440 = vmatpush3.bf16.msra.mxu1 %v21841_v59 }
 0xeb3   :  { %15442 = vmatprep.subr.bf16.mxu1 %v21842_v47 }
 0xeb6   :  { %15444 = vmatpush3.bf16.msra.mxu1 %v21842_v47 }
 0xeb7   :  { %15446 = vmatprep.subr.bf16.mxu1 %v21845_v3 }
 0xeb9   :  { %13448 = vmatmul.mubr.f32.vlgmr.msra.gmra.mrb[24].mxu1 %v8492_v56  ;;  %v9344_v56 = vand.u32 4294901760, %v20361_v49 }
 0xeba   :  { %13450 = vmatprep.mubr.f32.mxu1 %v8502_v19  ;;  %15448 = vmatpush3.bf16.msra.mxu1 %v21845_v3  ;;  %v21207_v19 = vand.u32 4294901760, %v20391_v48 }
 0xebb   :  { %15450 = vmatprep.subr.bf16.mxu1 %v21846_v18  ;;  %v9345_v1 = vsub.f32 %v20361_v49, %v9344_v56 }
 0xebc   :  { %v9366_v33 = vsub.f32 %v20391_v48, %v21207_v19 }
 0xebd   :  { %13451 = vmatmul.mubr.f32.gmra.mrb[26].mxu1 %v8512_v4  ;;  %v9346_v36 = vand.u32 4294901760, %v9345_v1 }
 0xebe   :  { %15452 = vmatpush3.bf16.msra.mxu1 %v21846_v18  ;;  %13485 = vmatprep.mubr.f32.mxu1 %v20156_v50 }
 0xebf   :  { %15454 = vmatprep.subr.bf16.mxu1 %v21847_v30 }
 0xec2   :  { %15456 = vmatpush3.bf16.msra.mxu1 %v21847_v30  ;;  %v9360_v30 = vand.u32 4294901760, %v9359_v31 }
 0xec3   :  { %15458 = vmatprep.subr.bf16.mxu1 %v21848_v58 }
 0xec6   :  { %15460 = vmatpush3.bf16.msra.mxu1 %v21848_v58  ;;  %v9367_v58 = vand.u32 4294901760, %v9366_v33 }
 0xec7   :  { %15462 = vmatprep.subr.bf16.mxu1 %v21849_v26 }
 0xec8   :  { %v20439_v63 = vpack.c.bf16 %v9367_v58, %v9360_v30 }
 0xeca   :  { %15464 = vmatpush3.bf16.msra.mxu1 %v21849_v26 }
 0xecb   :  { %15466 = vmatprep.subr.bf16.mxu1 %v21850_v60 }
 0xece   :  { %15468 = vmatpush3.bf16.msra.mxu1 %v21850_v60 }
 0xecf   :  { %15470 = vmatprep.subr.bf16.mxu1 %v21851_v62 }
 0xed2   :  { %15472 = vmatpush3.bf16.msra.mxu1 %v21851_v62 }
 0xed3   :  { %15474 = vmatprep.subr.bf16.mxu1 %v21852_v0 }
 0xed6   :  { %15476 = vmatpush3.bf16.msra.mxu1 %v21852_v0 }
 0xed7   :  { %15478 = vmatprep.subr.bf16.mxu1 %v21835_v46 }
 0xed9   :  { %13486 = vmatmul.mubr.f32.vlgmr.msra.gmra.mrb[24].mxu1 %v20154_v28 }
 0xeda   :  { %13488 = vmatprep.mubr.f32.mxu1 %v20169_v40  ;;  %15480 = vmatpush3.bf16.msra.mxu1 %v21835_v46  ;;  %v9208_v46 = vld [vmem:[%s20743_s6 + $0x20] sm:$0xff] }
 0xedb   :  { %15482 = vmatprep.subr.bf16.mxu1 %v21836_v37 }
 0xedd   :  { %13489 = vmatmul.mubr.f32.gmra.mrb[26].mxu1 %v20167_v24 }
 0xede   :  { %15484 = vmatpush3.bf16.msra.mxu1 %v21836_v37  ;;  %13523 = vmatprep.mubr.f32.mxu1 %v20156_v50  ;;  %v9209_v37 = vld [vmem:[%s20743_s6 + $0x28] sm:$0xff]  ;;  %v20363_v50 = vsub.f32 %v9205_v10, %v9224_v44 }
 0xedf   :  { %15486 = vmatprep.subr.bf16.mxu1 %v21837_v20 }
 0xee2   :  { %15488 = vmatpush3.bf16.msra.mxu1 %v21837_v20  ;;  %v9233_v20 = vand.u32 4294901760, %v9208_v46 }
 0xee3   :  { %15490 = vmatprep.subr.bf16.mxu1 %v21838_v39 }
 0xee4   :  { %v20408_v52 = vsub.f32 %v9208_v46, %v9233_v20  ;;  %v20452_v46 = vsub.f32 %v9212_v8, %v9245_v32  ;;  %v20473_v32 = vsub.f32 %v20336_v13, %v9251_v27  ;;  %v20490_v13 = vsub.f32 %v20350_v43, %v9257_v45 }
 0xee6   :  { %15492 = vmatpush3.bf16.msra.mxu1 %v21838_v39  ;;  %v9236_v39 = vand.u32 4294901760, %v9209_v37  ;;  %v21206_v3 = vand.u32 4294901760, %v20408_v52  ;;  %v21200_v31 = vand.u32 4294901760, %v20473_v32  ;;  %v21198_v30 = vand.u32 4294901760, %v20490_v13 }
 0xee7   :  { %15494 = vmatprep.subr.bf16.mxu1 %v21839_v53 }
 0xee8   :  { %v20410_v42 = vsub.f32 %v9209_v37, %v9236_v39  ;;  %v9373_v62 = vsub.f32 %v20408_v52, %v21206_v3  ;;  %v20454_v37 = vsub.f32 %v9213_v5, %v9248_v12  ;;  %v20478_v12 = vsub.f32 %v20343_v9, %v9254_v61 }
 0xee9   :  { %v9429_v43 = vsub.f32 %v20490_v13, %v21198_v30  ;;  %v21855_v30 = vld [vmem:[#allocation45_spill] sm:$0xff] }
 0xeea   :  { %15496 = vmatpush3.bf16.msra.mxu1 %v21839_v53  ;;  %v20317_v53 = vpack.c.bf16 %v9236_v39, %v9233_v20  ;;  %v21205_v18 = vand.u32 4294901760, %v20410_v42  ;;  %v9374_v15 = vand.u32 4294901760, %v9373_v62  ;;  %v21199_v33 = vand.u32 4294901760, %v20478_v12 }
 0xeeb   :  { %15498 = vmatprep.subr.bf16.mxu1 %v21840_v38 }
 0xeec   :  { %15518 = vmatprep.subr.bf16.mxu0 %v20317_v53  ;;  %v9380_v0 = vsub.f32 %v20410_v42, %v21205_v18  ;;  %v9422_v27 = vsub.f32 %v20478_v12, %v21199_v33 }
 0xeed   :  { %15520 = vmatpush3.bf16.msra.mxu0 %v20317_v53 }
 0xeee   :  { %15500 = vmatpush3.bf16.msra.mxu1 %v21840_v38  ;;  %v9210_v38 = vld [vmem:[%s20743_s6 + $0x30] sm:$0xff]  ;;  %v9381_v29 = vand.u32 4294901760, %v9380_v0  ;;  %v9423_v62 = vand.u32 4294901760, %v9422_v27  ;;  %v20554_v27 = vpack.c.bf16 %v20478_v12, %v20473_v32 }
 0xeef   :  { %15502 = vmatprep.subr.bf16.mxu1 %v21841_v59 }
 0xef0   :  { %v20456_v20 = vpack.c.bf16 %v9381_v29, %v9374_v15  ;;  %v9430_v15 = vand.u32 4294901760, %v9429_v43 }
 0xef2   :  { %15504 = vmatpush3.bf16.msra.mxu1 %v21841_v59  ;;  %v9211_v59 = vld [vmem:[%s20743_s6 + $0x38] sm:$0xff] }
 0xef3   :  { %15506 = vmatprep.subr.bf16.mxu1 %v21842_v47  ;;  %v9242_v23 = vand.u32 4294901760, %v9211_v59 }
 0xef5   :  { %v20430_v60 = vsub.f32 %v9211_v59, %v9242_v23  ;;  %v21202_v59 = vand.u32 4294901760, %v20452_v46 }
 0xef6   :  { %15508 = vmatpush3.bf16.msra.mxu1 %v21842_v47  ;;  %v9239_v47 = vand.u32 4294901760, %v9210_v38 }
 0xef7   :  { %v21203_v14 = vand.u32 4294901760, %v20430_v60  ;;  %v9401_v8 = vsub.f32 %v20452_v46, %v21202_v59  ;;  %v21856_v59 = vld [vmem:[#allocation46_spill] sm:$0xff] }
 0xef8   :  { %v20338_v54 = vpack.c.bf16 %v9242_v23, %v9239_v47  ;;  %v20428_v26 = vsub.f32 %v9210_v38, %v9239_v47  ;;  %v21201_v47 = vand.u32 4294901760, %v20454_v37 }
 0xef9   :  { %13524 = vmatmul.mubr.f32.vlgmr.msra.gmra.mrb[24].mxu1 %v20154_v28  ;;  %v20355_v28 = vld [vmem:[%s20743_s6 + $0x68] sm:$0xff]  ;;  %v9394_v41 = vsub.f32 %v20430_v60, %v21203_v14  ;;  %v9402_v1 = vand.u32 4294901760, %v9401_v8 }
 0xefa   :  { %13526 = vmatprep.mubr.f32.mxu1 %v20169_v40  ;;  %15522 = vmatprep.subr.bf16.mxu0 %v20338_v54  ;;  %v9260_v6 = vand.u32 4294901760, %v20355_v28  ;;  %v9263_v40 = vand.u32 4294901760, %v20377_v17  ;;  %v21204_v10 = vand.u32 4294901760, %v20428_v26  ;;  %v9408_v5 = vsub.f32 %v20454_v37, %v21201_v47 }
 0xefb   :  { %15524 = vmatpush3.bf16.msra.mxu0 %v20338_v54  ;;  %v9395_v38 = vand.u32 4294901760, %v9394_v41 }
 0xefc   :  { %15526 = vmatprep.subr.bf16.mxu0 %v20358_v55  ;;  %v20398_v34 = vpack.c.bf16 %v9260_v6, %v9257_v45  ;;  %v20417_v11 = vpack.c.bf16 %v9266_v16, %v9263_v40  ;;  %v9387_v25 = vsub.f32 %v20428_v26, %v21204_v10  ;;  %v20495_v9 = vsub.f32 %v20355_v28, %v9260_v6 }
 0xefd   :  { %13527 = vmatmul.mubr.f32.gmra.mrb[26].mxu1 %v20167_v24  ;;  %v9351_v24 = vand.u32 4294901760, %v20363_v50  ;;  %v20511_v28 = vsub.f32 %v20377_v17, %v9263_v40  ;;  %v20516_v6 = vsub.f32 %v20382_v21, %v9266_v16 }
 0xefe   :  { %v9388_v39 = vand.u32 4294901760, %v9387_v25  ;;  %v21197_v58 = vand.u32 4294901760, %v20495_v9 }
 0xeff   :  { %15528 = vmatpush3.bf16.msra.mxu0 %v20358_v55  ;;  %v9352_v4 = vsub.f32 %v20363_v50, %v9351_v24  ;;  %v21196_v25 = vand.u32 4294901760, %v20511_v28  ;;  %v21195_v41 = vand.u32 4294901760, %v20516_v6 }
 0xf00   :  { %15530 = vmatprep.subr.bf16.mxu0 %v20370_v51  ;;  %v20462_v23 = vpack.c.bf16 %v9395_v38, %v9388_v39  ;;  %v9436_v45 = vsub.f32 %v20495_v9, %v21197_v58  ;;  %v20532_v38 = vpack.c.bf16 %v20363_v50, %v20361_v49  ;;  %v21859_v49 = vand.u32 4294901760, %v20408_v52 }
 0xf01   :  { %v9353_v57 = vand.u32 4294901760, %v9352_v4  ;;  %v9409_v4 = vand.u32 4294901760, %v9408_v5  ;;  %v9443_v17 = vsub.f32 %v20511_v28, %v21196_v25  ;;  %v9450_v40 = vsub.f32 %v20516_v6, %v21195_v41 }
 0xf02   :  { %v9437_v29 = vand.u32 4294901760, %v9436_v45  ;;  %v20538_v5 = vpack.c.bf16 %v20391_v48, %v20389_v7  ;;  %v10020_v45 = vld [vmem:[%s20751_s14] ss:$0 sm:$0xff]  ;;  %v21860_v50 = vand.u32 4294901760, %v20410_v42  ;;  %s16234_s14 = smov [#allocation14]  }
 0xf03   :  { %15532 = vmatpush3.bf16.msra.mxu0 %v20370_v51  ;;  %v20444_v44 = vpack.c.bf16 %v9353_v57, %v9346_v36  ;;  %v20482_v36 = vpack.c.bf16 %v9409_v4, %v9402_v1  ;;  %v9415_v57 = vsub.f32 %v20473_v32, %v21200_v31  ;;  %v9444_v21 = vand.u32 4294901760, %v9443_v17  ;;  %s10000_s28 = sshll.u32 %s16234_s14, 4  ;;  %s10001_s28 = int_to_ptr.vmem [resolvable:$true] %s10000_s28 }
 0xf04   :  { %15534 = vmatprep.subr.bf16.mxu0 %v20398_v34  ;;  %v20522_v39 = vpack.c.bf16 %v9437_v29, %v9430_v15  ;;  %v9451_v16 = vand.u32 4294901760, %v9450_v40  ;;  %v20542_v1 = vpack.c.bf16 %v20410_v42, %v20408_v52  ;;  %v20546_v4 = vpack.c.bf16 %v20430_v60, %v20428_v26  ;;  %v21853_v15 = vld [vmem:[#allocation44_spill] sm:$0xff]  ;;  %v21854_v40 = vld [vmem:[#allocation47_spill] sm:$0xff]  ;;  %s16193_s9 = scalar_lea.vmem %s10001_s28, 512  ;;  %p16198_p1 = scmp.lt.s32.totalorder %s10001_s28, %s10001_s28 }
 0xf05   :  { %v9416_v61 = vand.u32 4294901760, %v9415_v57  ;;  %v20550_v57 = vpack.c.bf16 %v20454_v37, %v20452_v46  ;;  %v21864_v52 = vand.u32 4294901760, %v20454_v37  ;;  %v21870_v37 = vand.u32 4294901760, %v20516_v6  ;;  %p16194_p0 = scmp.ne.s32.totalorder %s10001_s28, %s16193_s9  ;;  %p16199_p2 = scmp.lt.s32.totalorder %s16193_s9, %s16193_s9 }
 0xf06   :  { %v20534_v8 = vpack.c.bf16 %v9451_v16, %v9444_v21 }
 0xf07   :  { %15536 = vmatpush3.bf16.msra.mxu0 %v20398_v34  ;;  %v20518_v0 = vpack.c.bf16 %v9423_v62, %v9416_v61  ;;  %v20558_v61 = vpack.c.bf16 %v20495_v9, %v20490_v13  ;;  %v20562_v62 = vpack.c.bf16 %v20516_v6, %v20511_v28  ;;  %p16200_p3 = por %p16199_p2, %p16198_p1 }
 0xf08   :  { %15538 = vmatprep.subr.bf16.mxu0 %v20417_v11 }
 0xf09   :  { %p16201_p4 = pnand %p16200_p3, %p16194_p0 }
 0xf0b   :  { %15540 = vmatpush3.bf16.msra.mxu0 %v20417_v11 }
 0xf0c   :  { %15542 = vmatprep.subr.bf16.mxu0 %v20444_v44 }
 0xfcc   :  { %v13525_v43 = vpop.f32.mrb[24].mxu1 }
 0xfcd   :  { %v15721_v29 = vadd.f32 %v13525_v43, %v21853_v15  ;;  %v9147_v17 = vpop.f32.mrb[25].mxu1 }
 0xfce   :  { %v15722_v21 = vadd.f32 %v9147_v17, %v21854_v40 }
 0xfcf   :  { %v9177_v16 = vadd.f32 %v15721_v29, %v10020_v45 }
 0xfd0   :  { %v9176_v41 = vadd.f32 %v15722_v21, %v10020_v45  ;;  %v13528_v25 = vpop.f32.mrb[26].mxu1 }
 0xfd1   :  { %v9185_v58 = vmin.f32 %v9177_v16, 0.0  ;;  %v15723_v33 = vadd.f32 %v13528_v25, %v21855_v30  ;;  %v9159_v31 = vpop.f32.mrb[27].mxu1  ;;  %vm9181_vm1 = vcmp.gt.f32.partialorder %v9177_v16, 0.0 }
 0xfd2   :  { %v9184_v47 = vmin.f32 %v9176_v41, 0.0  ;;  %v15724_v14 = vadd.f32 %v9159_v31, %v21856_v59  ;;  %vm9180_vm4 = vcmp.gt.f32.partialorder %v9176_v41, 0.0 }
 0xfd3   :  { %v9190_v10 = vmul.f32 1.442695, %v9185_v58  ;;  %v9179_v18 = vadd.f32 %v15723_v33, %v10020_v45 }
 0xfd4   :  { %v9188_v3 = vmul.f32 1.442695, %v9184_v47  ;;  %v9178_v19 = vadd.f32 %v15724_v14, %v10020_v45 }
 0xfd5   :  { %16027 = vpow2.f32 %v9190_v10  ;;  %v9187_v2 = vmin.f32 %v9179_v18, 0.0  ;;  %vm9183_vm5 = vcmp.gt.f32.partialorder %v9179_v18, 0.0 }
 0xfd6   :  { %16029 = vpow2.f32 %v9188_v3  ;;  %v9186_v43 = vmin.f32 %v9178_v19, 0.0  ;;  %vm9182_vm6 = vcmp.gt.f32.partialorder %v9178_v19, 0.0 }
 0xfd7   :  { %v9194_v15 = vmul.f32 1.442695, %v9187_v2 }
 0xfd8   :  { %v9192_v17 = vmul.f32 1.442695, %v9186_v43 }
 0xfd9   :  { %16031 = vpow2.f32 %v9194_v15 }
 0xfda   :  { %16033 = vpow2.f32 %v9192_v17 }
 0xfdf   :  { %v16028_v29 = vpop.eup %16027 }
 0xfe0   :  { %v16030_v40 = vpop.eup %16029  ;;  %v10022_v21 = vadd.f32 -1.0, %v16028_v29 }
 0xfe1   :  { %v10021_v30 = vadd.f32 -1.0, %v16030_v40 }
 0xfe2   :  { %v9201_v25 = vsel %vm9181_vm1, %v9177_v16, %v10022_v21 }
 0xfe3   :  { %v16032_v59 = vpop.eup %16031  ;;  %v20571_v31 = vand.u32 4294901760, %v9201_v25  ;;  %v9200_v47 = vsel %vm9180_vm4, %v9176_v41, %v10021_v30 }
 0xfe4   :  { %v16034_v14 = vpop.eup %16033  ;;  %v20573_v10 = vand.u32 4294901760, %v9200_v47  ;;  %v10024_v3 = vadd.f32 -1.0, %v16032_v59 }
 0xfe5   :  { %v20576_v2 = vsub.f32 %v9201_v25, %v20571_v31  ;;  %v10023_v33 = vadd.f32 -1.0, %v16034_v14 }
 0xfe6   :  { %v20579_v58 = vsub.f32 %v9200_v47, %v20573_v10  ;;  %v9203_v45 = vsel %vm9183_vm5, %v9179_v18, %v10024_v3 }
 0xfe7   :  { %v9313_v16 = vand.u32 4294901760, %v20576_v2  ;;  %v20582_v43 = vand.u32 4294901760, %v9203_v45  ;;  %v9202_v15 = vsel %vm9182_vm6, %v9178_v19, %v10023_v33 }
 0xfe8   :  { %v20584_v41 = vand.u32 4294901760, %v9202_v15  ;;  %v9303_v17 = vand.u32 4294901760, %v20579_v58 }
 0xfe9   :  { %v20588_v29 = vsub.f32 %v9203_v45, %v20582_v43  ;;  %v9314_v40 = vsub.f32 %v20576_v2, %v9313_v16 }
 0xfea   :  { %v20594_v21 = vsub.f32 %v9202_v15, %v20584_v41  ;;  %v9304_v18 = vsub.f32 %v20579_v58, %v9303_v17 }
 0xfeb   :  { %v9333_v30 = vand.u32 4294901760, %v20588_v29  ;;  %v9315_v59 = vand.u32 4294901760, %v9314_v40 }
 0xfec   :  { %v9305_v25 = vand.u32 4294901760, %v9304_v18  ;;  %v9323_v19 = vand.u32 4294901760, %v20594_v21 }
 0xfed   :  { %v9334_v47 = vsub.f32 %v20588_v29, %v9333_v30 }
 0xfee   :  { %13561 = vmatprep.mubr.f32.mxu0 %v9305_v25  ;;  %v9324_v14 = vsub.f32 %v20594_v21, %v9323_v19 }
 0xfef   :  { %13562 = vmatmul.mubr.f32.vlgmr.msra.gmra.mrb[28].mxu0 %v9315_v59  ;;  %v9335_v33 = vand.u32 4294901760, %v9334_v47 }
 0xff0   :  { %15544 = vmatpush3.bf16.msra.mxu0 %v20444_v44  ;;  %v9325_v3 = vand.u32 4294901760, %v9324_v14  ;;  %v21857_v44 = vand.u32 4294901760, %v20389_v7  ;;  %v21862_v7 = vand.u32 4294901760, %v20430_v60  ;;  %v21868_v60 = vand.u32 4294901760, %v20495_v9 }
 0xff1   :  { %15546 = vmatprep.subr.bf16.mxu0 %v20439_v63 }
 0xff2   :  { %13564 = vmatprep.mubr.f32.mxu0 %v9325_v3 }
 0xff3   :  { %13565 = vmatmul.mubr.f32.gmra.mrb[30].mxu0 %v9335_v33 }
 0xff4   :  { %15548 = vmatpush3.bf16.msra.mxu0 %v20439_v63  ;;  %13599 = vmatprep.mubr.f32.mxu0 %v20573_v10  ;;  %v15637_v63 = vpack.c.bf16 %v9351_v24, %v9344_v56  ;;  %v15645_v56 = vpack.c.bf16 %v21860_v50, %v21859_v49  ;;  %v21861_v24 = vand.u32 4294901760, %v20428_v26  ;;  %v21867_v26 = vand.u32 4294901760, %v20490_v13 }
 0xff5   :  { %15550 = vmatprep.subr.bf16.mxu0 %v20456_v20 }
 0xff8   :  { %15552 = vmatpush3.bf16.msra.mxu0 %v20456_v20  ;;  %v21858_v20 = vand.u32 4294901760, %v20391_v48  ;;  %v15649_v48 = vpack.c.bf16 %v21862_v7, %v21861_v24 }
 0xff9   :  { %15554 = vmatprep.subr.bf16.mxu0 %v20462_v23 }
 0xffc   :  { %15556 = vmatpush3.bf16.msra.mxu0 %v20462_v23  ;;  %v15641_v23 = vpack.c.bf16 %v21858_v20, %v21857_v44 }
 0xffd   :  { %15558 = vmatprep.subr.bf16.mxu0 %v20482_v36 }
0x1000   :  { %15560 = vmatpush3.bf16.msra.mxu0 %v20482_v36  ;;  %v21863_v36 = vand.u32 4294901760, %v20452_v46  ;;  %v21869_v46 = vand.u32 4294901760, %v20511_v28 }
0x1001   :  { %15562 = vmatprep.subr.bf16.mxu0 %v20518_v0 }
0x1002   :  { %v15653_v42 = vpack.c.bf16 %v21864_v52, %v21863_v36 }
0x1004   :  { %15564 = vmatpush3.bf16.msra.mxu0 %v20518_v0  ;;  %v21865_v0 = vand.u32 4294901760, %v20473_v32 }
0x1005   :  { %15566 = vmatprep.subr.bf16.mxu0 %v20522_v39 }
0x1008   :  { %15568 = vmatpush3.bf16.msra.mxu0 %v20522_v39  ;;  %v21866_v39 = vand.u32 4294901760, %v20478_v12 }
0x1009   :  { %15570 = vmatprep.subr.bf16.mxu0 %v20534_v8 }
0x100c   :  { %15572 = vmatpush3.bf16.msra.mxu0 %v20534_v8  ;;  %v15661_v8 = vpack.c.bf16 %v21868_v60, %v21867_v26 }
0x100d   :  { %15574 = vmatprep.subr.bf16.mxu0 %v20532_v38 }
0x100f   :  { %13600 = vmatmul.mubr.f32.vlgmr.msra.gmra.mrb[28].mxu0 %v20571_v31 }
0x1010   :  { %13602 = vmatprep.mubr.f32.mxu0 %v20584_v41  ;;  %15576 = vmatpush3.bf16.msra.mxu0 %v20532_v38  ;;  %v15657_v38 = vpack.c.bf16 %v21866_v39, %v21865_v0 }
0x1011   :  { %15578 = vmatprep.subr.bf16.mxu0 %v20538_v5 }
0x1013   :  { %13603 = vmatmul.mubr.f32.gmra.mrb[30].mxu0 %v20582_v43 }
0x1014   :  { %15580 = vmatpush3.bf16.msra.mxu0 %v20538_v5  ;;  %13637 = vmatprep.mubr.f32.mxu0 %v20579_v58  ;;  %v15665_v5 = vpack.c.bf16 %v21870_v37, %v21869_v46 }
0x1015   :  { %15582 = vmatprep.subr.bf16.mxu0 %v20542_v1 }
0x1018   :  { %15584 = vmatpush3.bf16.msra.mxu0 %v20542_v1 }
0x1019   :  { %15586 = vmatprep.subr.bf16.mxu0 %v20546_v4 }
0x101c   :  { %15588 = vmatpush3.bf16.msra.mxu0 %v20546_v4 }
0x101d   :  { %15590 = vmatprep.subr.bf16.mxu0 %v20550_v57 }
0x1020   :  { %15592 = vmatpush3.bf16.msra.mxu0 %v20550_v57 }
0x1021   :  { %15594 = vmatprep.subr.bf16.mxu0 %v20554_v27 }
0x1024   :  { %15596 = vmatpush3.bf16.msra.mxu0 %v20554_v27 }
0x1025   :  { %15598 = vmatprep.subr.bf16.mxu0 %v20558_v61 }
0x1028   :  { %15600 = vmatpush3.bf16.msra.mxu0 %v20558_v61 }
0x1029   :  { %15602 = vmatprep.subr.bf16.mxu0 %v20562_v62 }
0x102c   :  { %15604 = vmatpush3.bf16.msra.mxu0 %v20562_v62 }
0x102d   :  { %15606 = vmatprep.subr.bf16.mxu0 %v20297_v35 }
0x102f   :  { %13638 = vmatmul.mubr.f32.vlgmr.msra.gmra.mrb[28].mxu0 %v20576_v2 }
0x1030   :  { %13640 = vmatprep.mubr.f32.mxu0 %v20594_v21  ;;  %15608 = vmatpush3.bf16.msra.mxu0 %v20297_v35 }
0x1031   :  { %15610 = vmatprep.subr.bf16.mxu0 %v20307_v22 }
0x1033   :  { %13641 = vmatmul.mubr.f32.gmra.mrb[30].mxu0 %v20588_v29 }
0x1034   :  { %15612 = vmatpush3.bf16.msra.mxu0 %v20307_v22  ;;  %13675 = vmatprep.mubr.f32.mxu0 %v9303_v17 }
0x1035   :  { %15614 = vmatprep.subr.bf16.mxu0 %v20317_v53 }
0x1038   :  { %15616 = vmatpush3.bf16.msra.mxu0 %v20317_v53 }
0x1039   :  { %15618 = vmatprep.subr.bf16.mxu0 %v20338_v54 }
0x103c   :  { %15620 = vmatpush3.bf16.msra.mxu0 %v20338_v54 }
0x103d   :  { %15622 = vmatprep.subr.bf16.mxu0 %v20358_v55 }
0x1040   :  { %15624 = vmatpush3.bf16.msra.mxu0 %v20358_v55 }
0x1041   :  { %15626 = vmatprep.subr.bf16.mxu0 %v20370_v51 }
0x1044   :  { %15628 = vmatpush3.bf16.msra.mxu0 %v20370_v51 }
0x1045   :  { %15630 = vmatprep.subr.bf16.mxu0 %v20398_v34 }
0x1048   :  { %15632 = vmatpush3.bf16.msra.mxu0 %v20398_v34 }
0x1049   :  { %15634 = vmatprep.subr.bf16.mxu0 %v20417_v11 }
0x104c   :  { %15636 = vmatpush3.bf16.msra.mxu0 %v20417_v11 }
0x104d   :  { %15638 = vmatprep.subr.bf16.mxu0 %v15637_v63 }
0x104f   :  { %13676 = vmatmul.mubr.f32.vlgmr.msra.gmra.mrb[28].mxu0 %v9313_v16 }
0x1050   :  { %13678 = vmatprep.mubr.f32.mxu0 %v9323_v19  ;;  %15640 = vmatpush3.bf16.msra.mxu0 %v15637_v63 }
0x1051   :  { %15642 = vmatprep.subr.bf16.mxu0 %v15641_v23 }
0x1053   :  { %13679 = vmatmul.mubr.f32.gmra.mrb[30].mxu0 %v9333_v30 }
0x1054   :  { %15644 = vmatpush3.bf16.msra.mxu0 %v15641_v23  ;;  %13713 = vmatprep.mubr.f32.mxu0 %v20573_v10 }
0x1055   :  { %15646 = vmatprep.subr.bf16.mxu0 %v15645_v56 }
0x1058   :  { %15648 = vmatpush3.bf16.msra.mxu0 %v15645_v56 }
0x1059   :  { %15650 = vmatprep.subr.bf16.mxu0 %v15649_v48 }
0x105c   :  { %15652 = vmatpush3.bf16.msra.mxu0 %v15649_v48 }
0x105d   :  { %15654 = vmatprep.subr.bf16.mxu0 %v15653_v42 }
0x1060   :  { %15656 = vmatpush3.bf16.msra.mxu0 %v15653_v42 }
0x1061   :  { %15658 = vmatprep.subr.bf16.mxu0 %v15657_v38 }
0x1064   :  { %15660 = vmatpush3.bf16.msra.mxu0 %v15657_v38 }
0x1065   :  { %15662 = vmatprep.subr.bf16.mxu0 %v15661_v8 }
0x1068   :  { %15664 = vmatpush3.bf16.msra.mxu0 %v15661_v8 }
0x1069   :  { %15666 = vmatprep.subr.bf16.mxu0 %v15665_v5 }
0x106c   :  { %15668 = vmatpush3.bf16.msra.mxu0 %v15665_v5 }
0x106d   :  { %15670 = vmatprep.subr.bf16.mxu0 %v20297_v35 }
0x106f   :  { %13714 = vmatmul.mubr.f32.vlgmr.msra.gmra.mrb[28].mxu0 %v20571_v31 }
0x1070   :  { %13716 = vmatprep.mubr.f32.mxu0 %v20584_v41  ;;  %15672 = vmatpush3.bf16.msra.mxu0 %v20297_v35 }
0x1071   :  { %15674 = vmatprep.subr.bf16.mxu0 %v20307_v22 }
0x1073   :  { %13717 = vmatmul.mubr.f32.gmra.mrb[30].mxu0 %v20582_v43 }
0x1074   :  { %15676 = vmatpush3.bf16.msra.mxu0 %v20307_v22  ;;  %13751 = vmatprep.mubr.f32.mxu0 %v20573_v10 }
0x1075   :  { %15678 = vmatprep.subr.bf16.mxu0 %v20317_v53 }
0x1078   :  { %15680 = vmatpush3.bf16.msra.mxu0 %v20317_v53 }
0x1079   :  { %15682 = vmatprep.subr.bf16.mxu0 %v20338_v54 }
0x107c   :  { %15684 = vmatpush3.bf16.msra.mxu0 %v20338_v54 }
0x107d   :  { %15686 = vmatprep.subr.bf16.mxu0 %v20358_v55 }
0x1080   :  { %15688 = vmatpush3.bf16.msra.mxu0 %v20358_v55 }
0x1081   :  { %15690 = vmatprep.subr.bf16.mxu0 %v20370_v51 }
0x1084   :  { %15692 = vmatpush3.bf16.msra.mxu0 %v20370_v51 }
0x1085   :  { %15694 = vmatprep.subr.bf16.mxu0 %v20398_v34 }
0x1088   :  { %15696 = vmatpush3.bf16.msra.mxu0 %v20398_v34 }
0x1089   :  { %15698 = vmatprep.subr.bf16.mxu0 %v20417_v11 }
0x108c   :  { %15700 = vmatpush3.bf16.msra.mxu0 %v20417_v11 }
0x108f   :  { %13752 = vmatmul.mubr.f32.vlgmr.msra.gmra.mrb[28].mxu0 %v20571_v31 }
0x1090   :  { %13754 = vmatprep.mubr.f32.mxu0 %v20584_v41 }
0x1093   :  { %13755 = vmatmul.mubr.f32.gmra.mrb[30].mxu0 %v20582_v43 }
0x1162   :  { %v13753_v35 = vpop.f32.mrb[28].mxu0 }
0x1163   :  { %9992 = vst.msk [vmem:[#allocation14 + $0x8] sm:$0xff] %vm9990_vm7, %v13753_v35  ;;  %v9968_v22 = vpop.f32.mrb[29].mxu0 }
0x1164   :  { %9991 = vst.msk [vmem:[#allocation14] sm:$0xff] %vm9990_vm7, %v9968_v22 }
0x1166   :  { %v13756_v53 = vpop.f32.mrb[30].mxu0 }
0x1167   :  { %9994 = vst.msk [vmem:[#allocation14 + $0x18] sm:$0xff] %vm9990_vm7, %v13756_v53  ;;  %v9980_v54 = vpop.f32.mrb[31].mxu0 }
0x1168   :  { %9993 = vst.msk [vmem:[#allocation14 + $0x10] sm:$0xff] %vm9990_vm7, %v9980_v54 }
0x1169   :  { %16204 = shalt.err (!%p16201_p4)
}
0x116a   :  { %s16205_s23 = scalar_lea.hbm %s20752_s15, 512 }
0x116b   :  { %p16206_p5 = scmp.ne.s32.totalorder %s20752_s15, %s16205_s23  ;;  %p16209_p6 = scmp.lt.u32.totalorder %s16205_s23, %s20752_s15 }
0x116d   :  { %p16211_p7 = pnand %p16209_p6, %p16206_p5 }
0x116f   :  { %16214 = shalt.err (!%p16211_p7)
}
0x1170   :  { %10006 = dma.vmem_to_hbm [thread:$0]  %s10001_s28, 512, %s20752_s15, [#allocation4], %s16227_s30, %s16227_s30, %s16228_s16  }
0x1171   :  { %16223 = dma.done.wait [#allocation4], 512  }
0x1172   :  { %16224 = vsyncadd [#allocation4], 4294966784 }
0x1173   :  { %10010 = vsyncpa [#allocation3], 1 }
0x1174   :  { %10011 = vsyncpa [#allocation6], 1 }
0x1175   :  { %10012 = vsyncpa [#allocation9], 1 }
0x1176   :  { %10013 = vsyncpa [#allocation12], 1 }
0x1177   :  { %10014 = vsyncpa [#allocation4], 1 }

</bundles_post_ra>
